<compile_context>
chip_gen: v6e
topology: v6e:2x2x1
jax: 0.10.0
libtpu: 0.0.40
codegen_flags: <defaults>
</compile_context>

<pallas_src>
import jax
import jax.numpy as jnp
from jax import lax
from jax.experimental import pallas as pl
from jax.experimental.pallas import tpu as pltpu

LANE = 128
SUBLANE = 8


def _round_up(n, m):
    return ((n + m - 1) // m) * m


# ----------------------------- Pallas kernel -------------------------------- #
def _c2f_kernel(x_ref, w1_ref, b1_ref, w3_ref, b3_ref, w2_ref, b2_ref, o_ref,
                pad_ref, im2col_ref, bsum_ref):
    # x_ref   : (1, H, W, Cin_p)   bf16  one image, Cin padded only to sublane (8)
    # w1_ref  : (Cin_p, Cp)        bf16  folded 1x1 conv + BN1
    # b1_ref  : (1, Cp)            f32
    # w3_ref  : (K, Ck, Cp)        bf16  folded 3x3 convs + BN, taps packed tightly
    # b3_ref  : (K, 1, Cp)         f32
    # w2_ref  : (Cp, Cp)           bf16  folded 1x1 conv + BN2
    # b2_ref  : (1, Cp)            f32
    # o_ref   : (1, H, W, Cout)    f32   real channel width (no padded writeback)
    # pad_ref   : VMEM (H+2, W+2, Cout) bf16  spatially padded h1 (real channels)
    # im2col_ref: VMEM (H*W, Ck)        bf16  packed im2col slab (shared by all K)
    # bsum_ref  : VMEM (H*W, Cp)        f32   bottleneck-sum accumulator
    _, H, W, Cout = o_ref.shape
    Cin_p = x_ref.shape[3]
    Cp = bsum_ref.shape[1]
    Ck = im2col_ref.shape[1]
    K = w3_ref.shape[0]

    # ---- stage 1: 1x1 conv (channel matmul, bf16 in / f32 acc) + bias + ReLU
    x = x_ref[...].reshape(H * W, Cin_p)
    h1 = jnp.dot(x, w1_ref[...], preferred_element_type=jnp.float32) + b1_ref[...]
    h1 = jnp.maximum(h1, 0.0)                                    # (H*W, Cp) f32
    # single f32 -> bf16 cast; only the real channels enter the 3x3 stage
    h1b = h1[:, :Cout].astype(jnp.bfloat16).reshape(H, W, Cout)

    # ---- spatial zero-pad (padding=1): zero only the 1-element border each
    # image (interior is fully overwritten).  This stays correct when the
    # parallel batch axis is split across TensorCores (per-core scratch).
    zrow = jnp.zeros((1, W + 2, Cout), jnp.bfloat16)
    zcol = jnp.zeros((H + 2, 1, Cout), jnp.bfloat16)
    pad_ref[0:1, :, :] = zrow
    pad_ref[H + 1:H + 2, :, :] = zrow
    pad_ref[:, 0:1, :] = zcol
    pad_ref[:, W + 1:W + 2, :] = zcol
    pad_ref[1:H + 1, 1:W + 1, :] = h1b

    # ---- build the tightly packed im2col slab once (shared by all K
    # bottlenecks).  Tap t = 3*dy + dx occupies lanes [t*Cout, (t+1)*Cout),
    # matching the (K,3,3,C,C) -> (K, 9*Cout -> Ck, Cp) weight flattening done
    # in the wrapper.  The zero tail (lanes 9*Cout..Ck) is rewritten every
    # step, so no garbage can leak into the f32 accumulation.
    taps = []
    for dy in range(3):
        for dx in range(3):
            win = pad_ref[dy:dy + H, dx:dx + W, :]               # (H, W, Cout) bf16
            taps.append(win.reshape(H * W, Cout))
    if Ck > 9 * Cout:
        taps.append(jnp.zeros((H * W, Ck - 9 * Cout), jnp.bfloat16))
    im2col_ref[...] = jnp.concatenate(taps, axis=-1)             # one dense store

    # ---- bottlenecks: bsum = sum_k ReLU(im2col @ W3_k + b3_k)
    # k = 0 peeled: initialise bsum directly (no zero + read-add pass).
    # NOTE(v6e/v7x): pairing two bottleneck weights into a 256-wide output
    # matmul would fill their 2x256x256 MXU; kept 128-wide here (v5e sweet
    # spot, and it bounds the f32 partial to 32 vregs / one VMEM slab).
    z0 = jnp.dot(im2col_ref[...], w3_ref[0],
                 preferred_element_type=jnp.float32) + b3_ref[0]
    bsum_ref[...] = jnp.maximum(z0, 0.0)

    def bottleneck(k, carry):
        z = jnp.dot(im2col_ref[...], w3_ref[k],
                    preferred_element_type=jnp.float32) + b3_ref[k]
        bsum_ref[...] += jnp.maximum(z, 0.0)
        return carry

    lax.fori_loop(1, K, bottleneck, 0, unroll=True)

    # ---- stage 2: 1x1 conv + bias + ReLU; store only the real Cout channels.
    y = jnp.dot(bsum_ref[...].astype(jnp.bfloat16), w2_ref[...],
                preferred_element_type=jnp.float32) + b2_ref[...]
    y = jnp.maximum(y, 0.0)
    o_ref[...] = y[:, :Cout].reshape(1, H, W, Cout).astype(o_ref.dtype)


# ------------------------------ wrapper -------------------------------------- #
@jax.jit
def c2f_block_pallas(x, w1, b1, w3, b3, w2, b2):
    N, H, W, Cin = x.shape
    Cout = w1.shape[1]
    K = w3.shape[0]

    Cin_p = _round_up(Cin, SUBLANE)        # tiny sublane pad only (no 128 lane pad)
    Cp = _round_up(Cout, LANE)             # matmul output width (lane-dense)
    Ck = _round_up(9 * Cout, LANE)         # packed 3x3 contraction width

    # Input: bf16 cast + at most a (Cin -> multiple-of-8) channel pad.
    if Cin_p > Cin:
        x_p = jnp.pad(x, ((0, 0), (0, 0), (0, 0), (0, Cin_p - Cin)))
    else:
        x_p = x
    x_p = x_p.astype(jnp.bfloat16)

    # Folded weights.  Padded output channels have zero weights and zero
    # biases, so they stay exactly zero through every conv+BN+ReLU stage.
    w1_p = jnp.pad(w1, ((0, Cin_p - Cin), (0, Cp - Cout))).astype(jnp.bfloat16)
    b1_p = jnp.pad(b1, (0, Cp - Cout)).reshape(1, Cp).astype(jnp.float32)

    # (K,3,3,C,C) -> (K, 9*Cout, Cout) with row index (3*dy+dx)*Cout + c_in,
    # then pad the contraction to Ck and the output to Cp.
    w3_r = w3.reshape(K, 9 * Cout, Cout)
    w3_p = jnp.pad(w3_r, ((0, 0), (0, Ck - 9 * Cout), (0, Cp - Cout))).astype(jnp.bfloat16)
    b3_p = jnp.pad(b3, ((0, 0), (0, Cp - Cout))).reshape(K, 1, Cp).astype(jnp.float32)

    w2_p = jnp.pad(w2, ((0, Cp - Cout), (0, Cp - Cout))).astype(jnp.bfloat16)
    b2_p = jnp.pad(b2, (0, Cp - Cout)).reshape(1, Cp).astype(jnp.float32)

    # NOTE(v7x): pipeline_mode=pl.Buffered(1) on the constant-index weight
    # specs would reclaim their double-buffer VMEM; omitted here (weights are
    # tiny at these shapes and single-buffering is not needed).
    out = pl.pallas_call(
        _c2f_kernel,
        out_shape=jax.ShapeDtypeStruct((N, H, W, Cout), jnp.float32),
        grid_spec=pltpu.PrefetchScalarGridSpec(
            num_scalar_prefetch=0,
            grid=(N,),
            in_specs=[
                pl.BlockSpec((1, H, W, Cin_p), lambda n: (n, 0, 0, 0)),
                pl.BlockSpec((Cin_p, Cp), lambda n: (0, 0)),
                pl.BlockSpec((1, Cp), lambda n: (0, 0)),
                pl.BlockSpec((K, Ck, Cp), lambda n: (0, 0, 0)),
                pl.BlockSpec((K, 1, Cp), lambda n: (0, 0, 0)),
                pl.BlockSpec((Cp, Cp), lambda n: (0, 0)),
                pl.BlockSpec((1, Cp), lambda n: (0, 0)),
            ],
            out_specs=pl.BlockSpec((1, H, W, Cout), lambda n: (n, 0, 0, 0)),
            scratch_shapes=[
                pltpu.VMEM((H + 2, W + 2, Cout), jnp.bfloat16),  # padded h1
                pltpu.VMEM((H * W, Ck), jnp.bfloat16),           # packed im2col
                pltpu.VMEM((H * W, Cp), jnp.float32),            # bottleneck sum
            ],
        ),
        compiler_params=pltpu.CompilerParams(
            dimension_semantics=("parallel",),
            vmem_limit_bytes=32 * 1024 * 1024,
        ),
    )(x_p, w1_p, b1_p, w3_p, b3_p, w2_p, b2_p)

    return out


# -------------------- deterministic parameter construction ------------------- #
def _fold_bn(w, gamma, beta, mean, var, eps=1e-5):
    """Fold inference-mode BatchNorm into a conv weight -> (w', bias)."""
    s = gamma / jnp.sqrt(var + eps)      # (Cout,)
    return w * s, beta - mean * s        # scale along last (output) axis


def make_params(key, in_channels, out_channels, bottleneck_count):
    Cin, Cout, K = in_channels, out_channels, bottleneck_count
    ks = jax.random.split(key, 4 + 2 * K)

    def bn_params(k):
        k1, k2, k3, k4 = jax.random.split(k, 4)
        gamma = jax.random.uniform(k1, (Cout,), jnp.float32, 0.5, 1.5)
        beta = 0.1 * jax.random.normal(k2, (Cout,), jnp.float32)
        mean = 0.1 * jax.random.normal(k3, (Cout,), jnp.float32)
        var = jax.random.uniform(k4, (Cout,), jnp.float32, 0.5, 1.5)
        return gamma, beta, mean, var

    # conv1: 1x1, stored as a (Cin, Cout) matrix (HWIO[0,0]).
    w1_raw = 0.3 * jax.random.normal(ks[0], (Cin, Cout), jnp.float32)
    w1, b1 = _fold_bn(w1_raw, *bn_params(ks[1]))

    # bottleneck 3x3 convs, HWIO: (K, 3, 3, Cout, Cout)
    w3_list, b3_list = [], []
    for k in range(K):
        w_raw = 0.1 * jax.random.normal(ks[2 + 2 * k], (3, 3, Cout, Cout), jnp.float32)
        w_f, b_f = _fold_bn(w_raw, *bn_params(ks[3 + 2 * k]))
        w3_list.append(w_f)
        b3_list.append(b_f)
    w3 = jnp.stack(w3_list, axis=0)
    b3 = jnp.stack(b3_list, axis=0)

    # conv2: 1x1
    w2_raw = 0.3 * jax.random.normal(ks[2 + 2 * K], (Cout, Cout), jnp.float32)
    w2, b2 = _fold_bn(w2_raw, *bn_params(ks[3 + 2 * K]))
    return w1, b1, w3, b3, w2, b2


# ------------------------------ pure-JAX reference ---------------------------- #
def c2f_block_reference(x, w1, b1, w3, b3, w2, b2):
    """Reference with the same numerics contract as the kernel: conv operands
    cast to bf16, accumulation in f32, bias/ReLU in f32."""
    dn = ("NHWC", "HWIO", "NHWC")
    Cin, Cout = w1.shape
    K = w3.shape[0]

    def conv(inp, w_hwio, pad):
        return lax.conv_general_dilated(
            inp.astype(jnp.bfloat16), w_hwio.astype(jnp.bfloat16),
            window_strides=(1, 1), padding=pad, dimension_numbers=dn,
            preferred_element_type=jnp.float32)

    h1 = jax.nn.relu(conv(x, w1.reshape(1, 1, Cin, Cout), "VALID") + b1)
    bsum = jnp.zeros_like(h1)
    for k in range(K):
        bsum = bsum + jax.nn.relu(conv(h1, w3[k], ((1, 1), (1, 1))) + b3[k])
    out = jax.nn.relu(conv(bsum, w2.reshape(1, 1, Cout, Cout), "VALID") + b2)
    return out


# ----------------------------------- main ------------------------------------- #
if __name__ == "__main__":
    N, H, W = 2, 16, 16
    in_channels, out_channels, bottleneck_count = 4, 8, 2

    key = jax.random.PRNGKey(0)
    kx, kp = jax.random.split(key)
    # NHWC input (the PyTorch module would see the NCHW transpose (2, 4, 16, 16)).
    x = jax.random.normal(kx, (N, H, W, in_channels), jnp.float32)
    params = make_params(kp, in_channels, out_channels, bottleneck_count)

    out = jax.block_until_ready(c2f_block_pallas(x, *params))
    ref = c2f_block_reference(x, *params)

    assert out.shape == (N, H, W, out_channels)
    # Kernel and reference both feed the MXU bf16 operands with f32 accumulation;
    # residual differences are summation-order / bf16-rounding level.
    assert jnp.allclose(out, ref, rtol=1e-2, atol=1e-2), "mismatch vs reference"

    print("KERNEL_OK")
</pallas_src>

<mosaic_0001>
module attributes {stable_mosaic.version = 11 : i64} {
  func.func @_c2f_kernel(%arg0: i32, %arg1: memref<1x16x16x8xbf16, #tpu.memory_space<vmem>>, %arg2: memref<8x128xbf16, #tpu.memory_space<vmem>>, %arg3: memref<1x128xf32, #tpu.memory_space<vmem>>, %arg4: memref<2x128x128xbf16, #tpu.memory_space<vmem>>, %arg5: memref<2x1x128xf32, #tpu.memory_space<vmem>>, %arg6: memref<128x128xbf16, #tpu.memory_space<vmem>>, %arg7: memref<1x128xf32, #tpu.memory_space<vmem>>, %arg8: memref<1x16x16x8xf32, #tpu.memory_space<vmem>>, %arg9: memref<18x18x8xbf16, #tpu.memory_space<vmem>>, %arg10: memref<256x128xbf16, #tpu.memory_space<vmem>>, %arg11: memref<256x128xf32, #tpu.memory_space<vmem>>) attributes {dimension_semantics = [#tpu.dimension_semantics<parallel>], iteration_bounds = array<i64: 2>, scalar_prefetch = 0 : i64, scratch_operands = 3 : i64, tpu.core_type = #tpu.core_type<tc>, window_params = [{transform_indices = @transform_0, window_bounds = array<i64: 1, 16, 16, 8>}, {pipeline_mode = #tpu.pipeline_mode<synchronous>, transform_indices = @transform_1, window_bounds = array<i64: 8, 128>}, {pipeline_mode = #tpu.pipeline_mode<synchronous>, transform_indices = @transform_2, window_bounds = array<i64: 1, 128>}, {pipeline_mode = #tpu.pipeline_mode<synchronous>, transform_indices = @transform_3, window_bounds = array<i64: 2, 128, 128>}, {pipeline_mode = #tpu.pipeline_mode<synchronous>, transform_indices = @transform_4, window_bounds = array<i64: 2, 1, 128>}, {pipeline_mode = #tpu.pipeline_mode<synchronous>, transform_indices = @transform_5, window_bounds = array<i64: 128, 128>}, {pipeline_mode = #tpu.pipeline_mode<synchronous>, transform_indices = @transform_6, window_bounds = array<i64: 1, 128>}, {transform_indices = @transform_7, window_bounds = array<i64: 1, 16, 16, 8>}]} {
    %c0 = arith.constant 0 : index
    %c0_0 = arith.constant 0 : index
    %c0_1 = arith.constant 0 : index
    %c0_2 = arith.constant 0 : index
    %0 = vector.load %arg1[%c0, %c0_0, %c0_1, %c0_2] : memref<1x16x16x8xbf16, #tpu.memory_space<vmem>>, vector<1x16x16x8xbf16>
    %1 = vector.shape_cast %0 : vector<1x16x16x8xbf16> to vector<256x8xbf16>
    %c0_3 = arith.constant 0 : index
    %c0_4 = arith.constant 0 : index
    %2 = vector.load %arg2[%c0_3, %c0_4] : memref<8x128xbf16, #tpu.memory_space<vmem>>, vector<8x128xbf16>
    %cst = arith.constant dense<0.000000e+00> : vector<256x128xf32>
    %3 = tpu.matmul %1, %2, %cst {dimension_numbers = #tpu.dot_dimension_numbers<[1], [0], [0], [1], [0, 0, 1, 1], [], []>} : vector<256x8xbf16>, vector<8x128xbf16>, vector<256x128xf32> -> vector<256x128xf32>
    %c0_5 = arith.constant 0 : index
    %c0_6 = arith.constant 0 : index
    %4 = vector.load %arg3[%c0_5, %c0_6] : memref<1x128xf32, #tpu.memory_space<vmem>>, vector<1x128xf32>
    %5 = vector.broadcast %4 : vector<1x128xf32> to vector<256x128xf32>
    %6 = arith.addf %3, %5 : vector<256x128xf32>
    %cst_7 = arith.constant 0.000000e+00 : f32
    %7 = vector.broadcast %cst_7 : f32 to vector<256x128xf32>
    %8 = arith.maximumf %6, %7 : vector<256x128xf32>
    %9 = vector.extract_strided_slice %8 {offsets = [0, 0], sizes = [256, 8], strides = [1, 1]} : vector<256x128xf32> to vector<256x8xf32>
    %10 = arith.truncf %9 : vector<256x8xf32> to vector<256x8xbf16>
    %11 = vector.shape_cast %10 : vector<256x8xbf16> to vector<16x16x8xbf16>
    %cst_8 = arith.constant 0.000000e+00 : bf16
    %12 = vector.broadcast %cst_8 : bf16 to vector<1x18x8xbf16>
    %cst_9 = arith.constant 0.000000e+00 : bf16
    %13 = vector.broadcast %cst_9 : bf16 to vector<18x1x8xbf16>
    %c0_10 = arith.constant 0 : index
    %c0_11 = arith.constant 0 : index
    %c0_12 = arith.constant 0 : index
    %14 = vector.load %arg9[%c0_10, %c0_11, %c0_12] : memref<18x18x8xbf16, #tpu.memory_space<vmem>>, vector<1x18x8xbf16>
    tpu.vector_store %arg9[%c0_10, %c0_11, %c0_12], %12 {strides = array<i32>} : memref<18x18x8xbf16, #tpu.memory_space<vmem>>, vector<1x18x8xbf16>,
    %c17 = arith.constant 17 : index
    %c0_13 = arith.constant 0 : index
    %c0_14 = arith.constant 0 : index
    %15 = vector.load %arg9[%c17, %c0_13, %c0_14] : memref<18x18x8xbf16, #tpu.memory_space<vmem>>, vector<1x18x8xbf16>
    tpu.vector_store %arg9[%c17, %c0_13, %c0_14], %12 {strides = array<i32>} : memref<18x18x8xbf16, #tpu.memory_space<vmem>>, vector<1x18x8xbf16>,
    %c0_15 = arith.constant 0 : index
    %c0_16 = arith.constant 0 : index
    %c0_17 = arith.constant 0 : index
    %16 = vector.load %arg9[%c0_15, %c0_16, %c0_17] : memref<18x18x8xbf16, #tpu.memory_space<vmem>>, vector<18x1x8xbf16>
    tpu.vector_store %arg9[%c0_15, %c0_16, %c0_17], %13 {strides = array<i32>} : memref<18x18x8xbf16, #tpu.memory_space<vmem>>, vector<18x1x8xbf16>,
    %c0_18 = arith.constant 0 : index
    %c17_19 = arith.constant 17 : index
    %c0_20 = arith.constant 0 : index
    %17 = vector.load %arg9[%c0_18, %c17_19, %c0_20] : memref<18x18x8xbf16, #tpu.memory_space<vmem>>, vector<18x1x8xbf16>
    tpu.vector_store %arg9[%c0_18, %c17_19, %c0_20], %13 {strides = array<i32>} : memref<18x18x8xbf16, #tpu.memory_space<vmem>>, vector<18x1x8xbf16>,
    %c1 = arith.constant 1 : index
    %c1_21 = arith.constant 1 : index
    %c0_22 = arith.constant 0 : index
    %18 = vector.load %arg9[%c1, %c1_21, %c0_22] : memref<18x18x8xbf16, #tpu.memory_space<vmem>>, vector<16x16x8xbf16>
    tpu.vector_store %arg9[%c1, %c1_21, %c0_22], %11 {strides = array<i32>} : memref<18x18x8xbf16, #tpu.memory_space<vmem>>, vector<16x16x8xbf16>,
    %c0_23 = arith.constant 0 : index
    %c0_24 = arith.constant 0 : index
    %c0_25 = arith.constant 0 : index
    %19 = vector.load %arg9[%c0_23, %c0_24, %c0_25] : memref<18x18x8xbf16, #tpu.memory_space<vmem>>, vector<16x16x8xbf16>
    %20 = vector.shape_cast %19 : vector<16x16x8xbf16> to vector<256x8xbf16>
    %c0_26 = arith.constant 0 : index
    %c1_27 = arith.constant 1 : index
    %c0_28 = arith.constant 0 : index
    %21 = vector.load %arg9[%c0_26, %c1_27, %c0_28] : memref<18x18x8xbf16, #tpu.memory_space<vmem>>, vector<16x16x8xbf16>
    %22 = vector.shape_cast %21 : vector<16x16x8xbf16> to vector<256x8xbf16>
    %c0_29 = arith.constant 0 : index
    %c2 = arith.constant 2 : index
    %c0_30 = arith.constant 0 : index
    %23 = vector.load %arg9[%c0_29, %c2, %c0_30] : memref<18x18x8xbf16, #tpu.memory_space<vmem>>, vector<16x16x8xbf16>
    %24 = vector.shape_cast %23 : vector<16x16x8xbf16> to vector<256x8xbf16>
    %c1_31 = arith.constant 1 : index
    %c0_32 = arith.constant 0 : index
    %c0_33 = arith.constant 0 : index
    %25 = vector.load %arg9[%c1_31, %c0_32, %c0_33] : memref<18x18x8xbf16, #tpu.memory_space<vmem>>, vector<16x16x8xbf16>
    %26 = vector.shape_cast %25 : vector<16x16x8xbf16> to vector<256x8xbf16>
    %c1_34 = arith.constant 1 : index
    %c1_35 = arith.constant 1 : index
    %c0_36 = arith.constant 0 : index
    %27 = vector.load %arg9[%c1_34, %c1_35, %c0_36] : memref<18x18x8xbf16, #tpu.memory_space<vmem>>, vector<16x16x8xbf16>
    %28 = vector.shape_cast %27 : vector<16x16x8xbf16> to vector<256x8xbf16>
    %c1_37 = arith.constant 1 : index
    %c2_38 = arith.constant 2 : index
    %c0_39 = arith.constant 0 : index
    %29 = vector.load %arg9[%c1_37, %c2_38, %c0_39] : memref<18x18x8xbf16, #tpu.memory_space<vmem>>, vector<16x16x8xbf16>
    %30 = vector.shape_cast %29 : vector<16x16x8xbf16> to vector<256x8xbf16>
    %c2_40 = arith.constant 2 : index
    %c0_41 = arith.constant 0 : index
    %c0_42 = arith.constant 0 : index
    %31 = vector.load %arg9[%c2_40, %c0_41, %c0_42] : memref<18x18x8xbf16, #tpu.memory_space<vmem>>, vector<16x16x8xbf16>
    %32 = vector.shape_cast %31 : vector<16x16x8xbf16> to vector<256x8xbf16>
    %c2_43 = arith.constant 2 : index
    %c1_44 = arith.constant 1 : index
    %c0_45 = arith.constant 0 : index
    %33 = vector.load %arg9[%c2_43, %c1_44, %c0_45] : memref<18x18x8xbf16, #tpu.memory_space<vmem>>, vector<16x16x8xbf16>
    %34 = vector.shape_cast %33 : vector<16x16x8xbf16> to vector<256x8xbf16>
    %c2_46 = arith.constant 2 : index
    %c2_47 = arith.constant 2 : index
    %c0_48 = arith.constant 0 : index
    %35 = vector.load %arg9[%c2_46, %c2_47, %c0_48] : memref<18x18x8xbf16, #tpu.memory_space<vmem>>, vector<16x16x8xbf16>
    %36 = vector.shape_cast %35 : vector<16x16x8xbf16> to vector<256x8xbf16>
    %cst_49 = arith.constant 0.000000e+00 : bf16
    %37 = vector.broadcast %cst_49 : bf16 to vector<256x56xbf16>
    %38 = tpu.concatenate %20, %22, %24, %26, %28, %30, %32, %34, %36, %37 in 1 : vector<256x8xbf16>, vector<256x8xbf16>, vector<256x8xbf16>, vector<256x8xbf16>, vector<256x8xbf16>, vector<256x8xbf16>, vector<256x8xbf16>, vector<256x8xbf16>, vector<256x8xbf16>, vector<256x56xbf16> -> vector<256x128xbf16>
    %c0_50 = arith.constant 0 : index
    %c0_51 = arith.constant 0 : index
    %39 = vector.load %arg10[%c0_50, %c0_51] : memref<256x128xbf16, #tpu.memory_space<vmem>>, vector<256x128xbf16>
    tpu.vector_store %arg10[%c0_50, %c0_51], %38 {strides = array<i32>} : memref<256x128xbf16, #tpu.memory_space<vmem>>, vector<256x128xbf16>,
    %c0_52 = arith.constant 0 : index
    %c0_53 = arith.constant 0 : index
    %40 = vector.load %arg10[%c0_52, %c0_53] : memref<256x128xbf16, #tpu.memory_space<vmem>>, vector<256x128xbf16>
    %c0_54 = arith.constant 0 : index
    %c0_55 = arith.constant 0 : index
    %c0_56 = arith.constant 0 : index
    %41 = vector.load %arg4[%c0_54, %c0_55, %c0_56] : memref<2x128x128xbf16, #tpu.memory_space<vmem>>, vector<1x128x128xbf16>
    %42 = vector.shape_cast %41 : vector<1x128x128xbf16> to vector<128x128xbf16>
    %cst_57 = arith.constant dense<0.000000e+00> : vector<256x128xf32>
    %43 = tpu.matmul %40, %42, %cst_57 {dimension_numbers = #tpu.dot_dimension_numbers<[1], [0], [0], [1], [0, 0, 1, 1], [], []>} : vector<256x128xbf16>, vector<128x128xbf16>, vector<256x128xf32> -> vector<256x128xf32>
    %c0_58 = arith.constant 0 : index
    %c0_59 = arith.constant 0 : index
    %c0_60 = arith.constant 0 : index
    %44 = vector.load %arg5[%c0_58, %c0_59, %c0_60] : memref<2x1x128xf32, #tpu.memory_space<vmem>>, vector<1x1x128xf32>
    %45 = vector.shape_cast %44 : vector<1x1x128xf32> to vector<1x128xf32>
    %46 = vector.broadcast %45 : vector<1x128xf32> to vector<256x128xf32>
    %47 = arith.addf %43, %46 : vector<256x128xf32>
    %cst_61 = arith.constant 0.000000e+00 : f32
    %48 = vector.broadcast %cst_61 : f32 to vector<256x128xf32>
    %49 = arith.maximumf %47, %48 : vector<256x128xf32>
    %c0_62 = arith.constant 0 : index
    %c0_63 = arith.constant 0 : index
    %50 = vector.load %arg11[%c0_62, %c0_63] : memref<256x128xf32, #tpu.memory_space<vmem>>, vector<256x128xf32>
    tpu.vector_store %arg11[%c0_62, %c0_63], %49 {strides = array<i32>} : memref<256x128xf32, #tpu.memory_space<vmem>>, vector<256x128xf32>,
    %c1_i32 = arith.constant 1 : i32
    %c0_64 = arith.constant 0 : index
    %c0_65 = arith.constant 0 : index
    %51 = vector.load %arg10[%c0_64, %c0_65] : memref<256x128xbf16, #tpu.memory_space<vmem>>, vector<256x128xbf16>
    %52 = arith.index_cast %c1_i32 : i32 to index
    %c0_66 = arith.constant 0 : index
    %c0_67 = arith.constant 0 : index
    %53 = vector.load %arg4[%52, %c0_66, %c0_67] : memref<2x128x128xbf16, #tpu.memory_space<vmem>>, vector<1x128x128xbf16>
    %54 = vector.shape_cast %53 : vector<1x128x128xbf16> to vector<128x128xbf16>
    %cst_68 = arith.constant dense<0.000000e+00> : vector<256x128xf32>
    %55 = tpu.matmul %51, %54, %cst_68 {dimension_numbers = #tpu.dot_dimension_numbers<[1], [0], [0], [1], [0, 0, 1, 1], [], []>} : vector<256x128xbf16>, vector<128x128xbf16>, vector<256x128xf32> -> vector<256x128xf32>
    %56 = arith.index_cast %c1_i32 : i32 to index
    %c0_69 = arith.constant 0 : index
    %c0_70 = arith.constant 0 : index
    %57 = vector.load %arg5[%56, %c0_69, %c0_70] : memref<2x1x128xf32, #tpu.memory_space<vmem>>, vector<1x1x128xf32>
    %58 = vector.shape_cast %57 : vector<1x1x128xf32> to vector<1x128xf32>
    %59 = vector.broadcast %58 : vector<1x128xf32> to vector<256x128xf32>
    %60 = arith.addf %55, %59 : vector<256x128xf32>
    %c0_71 = arith.constant 0 : index
    %c0_72 = arith.constant 0 : index
    %61 = vector.load %arg11[%c0_71, %c0_72] : memref<256x128xf32, #tpu.memory_space<vmem>>, vector<256x128xf32>
    %cst_73 = arith.constant 0.000000e+00 : f32
    %62 = vector.broadcast %cst_73 : f32 to vector<256x128xf32>
    %63 = arith.maximumf %60, %62 : vector<256x128xf32>
    %64 = arith.addf %61, %63 : vector<256x128xf32>
    %c0_74 = arith.constant 0 : index
    %c0_75 = arith.constant 0 : index
    %65 = vector.load %arg11[%c0_74, %c0_75] : memref<256x128xf32, #tpu.memory_space<vmem>>, vector<256x128xf32>
    tpu.vector_store %arg11[%c0_74, %c0_75], %64 {strides = array<i32>} : memref<256x128xf32, #tpu.memory_space<vmem>>, vector<256x128xf32>,
    %c1_i32_76 = arith.constant 1 : i32
    %c0_77 = arith.constant 0 : index
    %c0_78 = arith.constant 0 : index
    %66 = vector.load %arg11[%c0_77, %c0_78] : memref<256x128xf32, #tpu.memory_space<vmem>>, vector<256x128xf32>
    %67 = arith.truncf %66 : vector<256x128xf32> to vector<256x128xbf16>
    %c0_79 = arith.constant 0 : index
    %c0_80 = arith.constant 0 : index
    %68 = vector.load %arg6[%c0_79, %c0_80] : memref<128x128xbf16, #tpu.memory_space<vmem>>, vector<128x128xbf16>
    %cst_81 = arith.constant dense<0.000000e+00> : vector<256x128xf32>
    %69 = tpu.matmul %67, %68, %cst_81 {dimension_numbers = #tpu.dot_dimension_numbers<[1], [0], [0], [1], [0, 0, 1, 1], [], []>} : vector<256x128xbf16>, vector<128x128xbf16>, vector<256x128xf32> -> vector<256x128xf32>
    %c0_82 = arith.constant 0 : index
    %c0_83 = arith.constant 0 : index
    %70 = vector.load %arg7[%c0_82, %c0_83] : memref<1x128xf32, #tpu.memory_space<vmem>>, vector<1x128xf32>
    %71 = vector.broadcast %70 : vector<1x128xf32> to vector<256x128xf32>
    %72 = arith.addf %69, %71 : vector<256x128xf32>
    %cst_84 = arith.constant 0.000000e+00 : f32
    %73 = vector.broadcast %cst_84 : f32 to vector<256x128xf32>
    %74 = arith.maximumf %72, %73 : vector<256x128xf32>
    %75 = vector.extract_strided_slice %74 {offsets = [0, 0], sizes = [256, 8], strides = [1, 1]} : vector<256x128xf32> to vector<256x8xf32>
    %76 = vector.shape_cast %75 : vector<256x8xf32> to vector<1x16x16x8xf32>
    %c0_85 = arith.constant 0 : index
    %c0_86 = arith.constant 0 : index
    %c0_87 = arith.constant 0 : index
    %c0_88 = arith.constant 0 : index
    %77 = vector.load %arg8[%c0_85, %c0_86, %c0_87, %c0_88] : memref<1x16x16x8xf32, #tpu.memory_space<vmem>>, vector<1x16x16x8xf32>
    tpu.vector_store %arg8[%c0_85, %c0_86, %c0_87, %c0_88], %76 {strides = array<i32>} : memref<1x16x16x8xf32, #tpu.memory_space<vmem>>, vector<1x16x16x8xf32>,
    return
  }
  func.func @transform_0(%arg0: i32) -> (i32, i32, i32, i32) {
    %c0_i32 = arith.constant 0 : i32
    %c0_i32_0 = arith.constant 0 : i32
    %c0_i32_1 = arith.constant 0 : i32
    %c0_i32_2 = arith.constant 0 : i32
    return %arg0, %c0_i32, %c0_i32_0, %c0_i32_1 : i32, i32, i32, i32
  }
  func.func @transform_1(%arg0: i32) -> (i32, i32) {
    %c0_i32 = arith.constant 0 : i32
    %c0_i32_0 = arith.constant 0 : i32
    %c0_i32_1 = arith.constant 0 : i32
    return %c0_i32, %c0_i32_0 : i32, i32
  }
  func.func @transform_2(%arg0: i32) -> (i32, i32) {
    %c0_i32 = arith.constant 0 : i32
    %c0_i32_0 = arith.constant 0 : i32
    %c0_i32_1 = arith.constant 0 : i32
    return %c0_i32, %c0_i32_0 : i32, i32
  }
  func.func @transform_3(%arg0: i32) -> (i32, i32, i32) {
    %c0_i32 = arith.constant 0 : i32
    %c0_i32_0 = arith.constant 0 : i32
    %c0_i32_1 = arith.constant 0 : i32
    %c0_i32_2 = arith.constant 0 : i32
    return %c0_i32, %c0_i32_0, %c0_i32_1 : i32, i32, i32
  }
  func.func @transform_4(%arg0: i32) -> (i32, i32, i32) {
    %c0_i32 = arith.constant 0 : i32
    %c0_i32_0 = arith.constant 0 : i32
    %c0_i32_1 = arith.constant 0 : i32
    %c0_i32_2 = arith.constant 0 : i32
    return %c0_i32, %c0_i32_0, %c0_i32_1 : i32, i32, i32
  }
  func.func @transform_5(%arg0: i32) -> (i32, i32) {
    %c0_i32 = arith.constant 0 : i32
    %c0_i32_0 = arith.constant 0 : i32
    %c0_i32_1 = arith.constant 0 : i32
    return %c0_i32, %c0_i32_0 : i32, i32
  }
  func.func @transform_6(%arg0: i32) -> (i32, i32) {
    %c0_i32 = arith.constant 0 : i32
    %c0_i32_0 = arith.constant 0 : i32
    %c0_i32_1 = arith.constant 0 : i32
    return %c0_i32, %c0_i32_0 : i32, i32
  }
  func.func @transform_7(%arg0: i32) -> (i32, i32, i32, i32) {
    %c0_i32 = arith.constant 0 : i32
    %c0_i32_0 = arith.constant 0 : i32
    %c0_i32_1 = arith.constant 0 : i32
    %c0_i32_2 = arith.constant 0 : i32
    return %arg0, %c0_i32, %c0_i32_0, %c0_i32_1 : i32, i32, i32, i32
  }
}

</mosaic_0001>

<bundles_post_ra>
// kernel: c2f_block_pallas.1
= control target key start
LH: loop header
LB: loop body
LE: loop exit
PB: predicated region body
PF: predicated region fallthrough
CT: control target
= control target key end

     0   :  { %s6529_s24 = smov 0   ;;  %s9022_s0 = inlined_call_operand.vmem [shape: bf16[2,16,16,8], index: 0, kind: input, shape index: {}]   ;;  %s9023_s1 = inlined_call_operand.vmem [shape: bf16[8,128], index: 1, kind: input, shape index: {}]   ;;  %s9024_s2 = inlined_call_operand.vmem [shape: f32[1,128], index: 2, kind: input, shape index: {}]   ;;  %s9025_s3 = inlined_call_operand.vmem [shape: bf16[2,128,128], index: 3, kind: input, shape index: {}]   ;;  %s9026_s4 = inlined_call_operand.vmem [shape: f32[2,1,128], index: 4, kind: input, shape index: {}]   ;;  %s9027_s5 = inlined_call_operand.vmem [shape: bf16[128,128], index: 5, kind: input, shape index: {}]   ;;  %s9028_s6 = inlined_call_operand.vmem [shape: f32[1,128], index: 6, kind: input, shape index: {}]   ;;  %s9029_s7 = inlined_call_operand.vmem [shape: f32[2,16,16,8], index: 7, kind: output, shape index: {}]  }
   0x1 LB: > { %s5622_s25 = sadd.s32 4294967295, %s6478_s24   ;;  %p5626_p0 = scmp.ge.s32.totalorder %s6478_s24, 1  ;;  %s6478_s24 = sphi %s6529_s24, %s17_s24  }
   0x2   : > { %p237_p1 = scmp.lt.s32.totalorder %s6478_s24, 3 }
   0x4   : > { %p238_p2 = pnand %p5626_p0, %p237_p1 }
   0x6   : > { %241 = sbr.rel (%p238_p2) target bundleno = 1156 (0x484), region = 48 }
   0xb   : > { %v312_v0 = vld [vmem:[%s9023_s1] sm:$0xf]  ;;  %vm449_vm0 = vcmask 1043456   ;;  %p269_p3 = scmp.lt.s32.totalorder %s5622_s25, 1  ;;  %vm400_vm1 = vcmask 64512   ;;  %vm662_vm2 = vcmask 60416  }
   0xc   : > { %6315 = vmatprep.subr.msk.bf16.mxu0 %vm449_vm0, %v312_v0  ;;  %v451_v1 = vsel %vm449_vm0, %v312_v0, 0  ;;  %v6480_v18 = vmov 0   ;;  %vm665_vm3 = vcmask 57344   ;;  %vm672_vm4 = vsmask.f32 256  ;;  %s6481_s9 = smov 48  }
   0xd   : > { %6122 = vmatpush3.bf16.msra.mxu0 %v451_v1  ;;  %s9149_s25 = smov (!%p269_p3, %s5622_s25), 1  ;;  %668 = vst.msk [vmem:[#allocation2 + $0xcc] sm:$0xf] %vm662_vm2, %v6480_v18  ;;  %669 = vst.msk [vmem:[#allocation2 + $0xd0] sm:$0xf] %vm662_vm2, %v6480_v18  ;;  %v9040_v22 = vmov 0 }
   0xe   : > { %s5998_s28 = sshll.u32 %s9149_s25, 7  ;;  %663 = vst.msk [vmem:[#allocation2] sm:$0xf] %vm662_vm2, %v6480_v18  ;;  %664 = vst.msk [vmem:[#allocation2 + $0x4] sm:$0xf] %vm662_vm2, %v6480_v18  ;;  %vm1800_vm8 = vcmask 1042432  }
   0xf   : > { %s6546_s8 = scalar_lea.vmem %s9022_s0, %s5998_s28  ;;  %666 = vst.msk [vmem:[#allocation2 + $0x8] sm:$0x1] %vm665_vm3, %v6480_v18  ;;  %670 = vst.msk [vmem:[#allocation2 + $0xd4] sm:$0x1] %vm665_vm3, %v6480_v18  ;;  %v680_v20 = vld [vmem:[#allocation2 + $0x18] sm:$0x1] }
  0x10   : > { %v6333_v2 = vld [vmem:[%s6546_s8] sm:$0xff]   ;;  %v6334_v3 = vld [vmem:[%s6546_s8 + $0x8] sm:$0xff]   ;;  %v6335_v4 = vld [vmem:[%s6546_s8 + $0x10] sm:$0xff]   ;;  %vm728_vm6 = vsmask.f32 7938  ;;  %vm1801_vm9 = vcmask 1046532  }
  0x11   : > { %6123 = vmatprep.mubr.msk.bf16.mxu0 %vm400_vm1, %v6333_v2  ;;  %v6336_v5 = vld [vmem:[%s6546_s8 + $0x18] sm:$0xff]   ;;  %v6337_v6 = vld [vmem:[%s6546_s8 + $0x20] sm:$0xff]   ;;  %v6338_v7 = vld [vmem:[%s6546_s8 + $0x28] sm:$0xff]   ;;  %vm1349_vm11 = vsmask.f32 3328  ;;  %s6482_s10 = smov 16  }
  0x12   : > { %6124 = vmatmul.mubr.msk.bf16.vlgmr.msra.gmra.mxu0 %vm400_vm1, %v6334_v3  ;;  %v6339_v8 = vld [vmem:[%s6546_s8 + $0x30] sm:$0xff]   ;;  %v6340_v9 = vld [vmem:[%s6546_s8 + $0x38] sm:$0xff]   ;;  %v6341_v10 = vld [vmem:[%s6546_s8 + $0x40] sm:$0xff]   ;;  %vm1350_vm12 = vsmask.f32 7440  ;;  %s6483_s11 = smov 8  }
  0x13   : > { %6127 = vmatprep.mubr.msk.bf16.mxu0 %vm400_vm1, %v6335_v4  ;;  %v6342_v11 = vld [vmem:[%s6546_s8 + $0x48] sm:$0xff]   ;;  %v6343_v12 = vld [vmem:[%s6546_s8 + $0x50] sm:$0xff]   ;;  %v6344_v13 = vld [vmem:[%s6546_s8 + $0x58] sm:$0xff]   ;;  %vm864_vm14 = vsmask.f32 4368  ;;  %s6484_s14 = smov 24  }
  0x14   : > { %v6345_v14 = vld [vmem:[%s6546_s8 + $0x60] sm:$0xff]   ;;  %v6346_v15 = vld [vmem:[%s6546_s8 + $0x68] sm:$0xff]   ;;  %v6347_v16 = vld [vmem:[%s6546_s8 + $0x70] sm:$0xff]   ;;  %s6485_s15 = smov 40   ;;  %s6486_s16 = smov 64  }
  0x15   : > { %v6348_v17 = vld [vmem:[%s6546_s8 + $0x78] sm:$0xff]   ;;  %vm6585_vm5 = vmand %vm665_vm3, %vm672_vm4  ;;  %v677_v23 = vld [vmem:[#allocation2 + $0xc] sm:$0x1]  ;;  %s6487_s17 = smov 32   ;;  %s6488_s18 = smov 56  }
  0x16   : > { %v681_v21 = vsel %vm6585_vm5, 0, %v680_v20  ;;  %vm6592_vm7 = vmand %vm665_vm3, %vm728_vm6  ;;  %v674_v24 = vld [vmem:[#allocation2] sm:$0x1]  ;;  %v678_v25 = vsel %vm6585_vm5, 0, %v677_v23  ;;  %v730_v29 = vld [vmem:[#allocation2 + $0x8] sm:$0x1] }
  0x17   : > { %682 = vst [vmem:[#allocation2 + $0x18] sm:$0x1] %v681_v21  ;;  %v9041_v22 = vsel %vm6592_vm7, 4294967295, %v9040_v22  ;;  %v675_v26 = vsel %vm6585_vm5, 0, %v674_v24  ;;  %679 = vst [vmem:[#allocation2 + $0xc] sm:$0x1] %v678_v25 }
  0x18   : > { %9042 = vst [vmem:[#allocation5_spill] sm:$0xff] %v9041_v22  ;;  %v736_v27 = vld [vmem:[#allocation2 + $0x20] sm:$0x1]  ;;  %676 = vst [vmem:[#allocation2] sm:$0x1] %v675_v26  ;;  %v731_v32 = vsel %vm6592_vm7, 0, %v730_v29 }
  0x19   : > { %v737_v28 = vsel %vm6592_vm7, 0, %v736_v27  ;;  %v733_v30 = vld [vmem:[#allocation2 + $0x14] sm:$0x1]  ;;  %v725_v31 = vld [vmem:[#allocation2 + $0xcc] sm:$0x1]  ;;  %vm6623_vm10 = vmor %vm1800_vm8, %vm1801_vm9  ;;  %vm3916_vm3 = vcmask 130048  }
  0x1a   : > { %6128 = vmatmul.mubr.msk.bf16.gmra.mxu0 %vm400_vm1, %v6336_v5  ;;  %738 = vst [vmem:[#allocation2 + $0x20] sm:$0x1] %v737_v28  ;;  %v734_v33 = vsel %vm6592_vm7, 0, %v733_v30  ;;  %v726_v34 = vsel %vm6585_vm5, 0, %v725_v31  ;;  %732 = vst [vmem:[#allocation2 + $0x8] sm:$0x1] %v731_v32 }
  0x1b   : > { %6131 = vmatprep.mubr.msk.bf16.mxu0 %vm400_vm1, %v6337_v6  ;;  %735 = vst [vmem:[#allocation2 + $0x14] sm:$0x1] %v734_v33  ;;  %727 = vst [vmem:[#allocation2 + $0xcc] sm:$0x1] %v726_v34  ;;  %v1302_v35 = vld [vmem:[#allocation2 + $0x4] sm:$0xf] }
  0x1c   : > { %v686_v37 = vld [vmem:[#allocation2 + $0x30] sm:$0x1]  ;;  %v683_v38 = vld [vmem:[#allocation2 + $0x24] sm:$0x1]  ;;  %v1362_v43 = vshll.u32 %v1302_v35, 16  ;;  %v1366_v46 = vshrl.u32 %v1302_v35, 16  ;;  %vm6631_vm13 = vmor %vm1349_vm11, %vm1350_vm12 }
  0x1d   : > { %v687_v39 = vsel %vm6585_vm5, 0, %v686_v37  ;;  %v684_v40 = vsel %vm6585_vm5, 0, %v683_v38  ;;  %v6614_v48 = vld [vmem:[#allocation2 + $0xd0] sm:$0xf]  ;;  %v742_v50 = vld [vmem:[#allocation2 + $0x38] sm:$0x1]  ;;  %vm6687_vm15 = vmand %vm662_vm2, %vm728_vm6 }
  0x1e   : > { %688 = vst [vmem:[#allocation2 + $0x30] sm:$0x1] %v687_v39  ;;  %685 = vst [vmem:[#allocation2 + $0x24] sm:$0x1] %v684_v40  ;;  %v1736_v52 = vld [vmem:[#allocation2] sm:$0xe] }
  0x1f   : > { %v1301_v36 = vld [vmem:[#allocation2] sm:$0xf]  ;;  %9043 = vst [vmem:[#allocation6_spill] sm:$0xff] %v6614_v48  ;;  %v1805_v53 = vrot.slane %v1302_v35, 5  ;;  %v1364_v55 = vrot.slane %v1362_v43, 5  ;;  %v743_v56 = vsel %vm6592_vm7, 0, %v742_v50  ;;  %vm6699_vm0 = vmor %vm672_vm4, %vm864_vm14 }
  0x20   : > { %v1353_v41 = vshrl.u32 %v1301_v36, 16  ;;  %v1356_v42 = vshll.u32 %v1301_v36, 16  ;;  %v739_v57 = vld [vmem:[#allocation2 + $0x2c] sm:$0x1]  ;;  %744 = vst [vmem:[#allocation2 + $0x38] sm:$0x1] %v743_v56 }
  0x21   : > { %v1333_v49 = vld [vmem:[#allocation2 + $0x8] sm:$0x1]  ;;  %v740_v58 = vsel %vm6592_vm7, 0, %v739_v57  ;;  %v5696_v60 = vrot.slane %v1736_v52, 9  ;;  %v1807_v61 = vrot.slane %v1805_v53, 4  ;;  %v1368_v63 = vrot.slane %v1366_v46, 4 }
  0x22   : > { %6132 = vmatmul.mubr.msk.bf16.gmra.mxu0 %vm400_vm1, %v6338_v7  ;;  %v1355_v44 = vrot.slane %v1353_v41, 4  ;;  %v1358_v45 = vrot.slane %v1356_v42, 5  ;;  %v6612_v47 = vld [vmem:[#allocation2 + $0xcc] sm:$0xf]  ;;  %v1808_v62 = vrot.slane %v1333_v49, 5  ;;  %v1372_v3 = vshll.u32 %v1333_v49, 16 }
  0x23   : > { %6135 = vmatprep.mubr.msk.bf16.mxu0 %vm400_vm1, %v6339_v8  ;;  %v5855_v51 = vcombine.low %v6612_v47, %v6614_v48  ;;  %741 = vst [vmem:[#allocation2 + $0x2c] sm:$0x1] %v740_v58  ;;  %v1806_v0 = vsel %vm6623_vm10, %v5696_v60, %v1805_v53  ;;  %v1369_v6 = vor.u32 %v1368_v63, %v1364_v55  ;;  %v745_v18 = vld [vmem:[#allocation2 + $0x44] sm:$0x1]  ;;  %v698_v21 = vld [vmem:[#allocation2 + $0x60] sm:$0x1] }
  0x24   : > { %v1359_v54 = vor.u32 %v1358_v45, %v1355_v44  ;;  %v1809_v1 = vsel %vm6623_vm10, %v1807_v61, %v1808_v62  ;;  %v1374_v7 = vrot.slane %v1372_v3, 5  ;;  %v746_v20 = vsel %vm6592_vm7, 0, %v745_v18  ;;  %v695_v24 = vld [vmem:[#allocation2 + $0x54] sm:$0x1]  ;;  %v754_v26 = vld [vmem:[#allocation2 + $0x68] sm:$0x1] }
  0x25   : > { %3706 = vrot.lane.b32.xlu1 %v5855_v51, %s6481_s9  ;;  %v5776_v4 = vcombine.low %v1806_v0, %v1809_v1  ;;  %v1370_v8 = vrot.slane %v1369_v6, 4  ;;  %747 = vst [vmem:[#allocation2 + $0x44] sm:$0x1] %v746_v20  ;;  %v699_v23 = vsel %vm6585_vm5, 0, %v698_v21  ;;  %v696_v25 = vsel %vm6585_vm5, 0, %v695_v24 }
  0x26   : > { %v1360_v2 = vrot.slane %v1359_v54, 4  ;;  %700 = vst [vmem:[#allocation2 + $0x60] sm:$0x1] %v699_v23  ;;  %697 = vst [vmem:[#allocation2 + $0x54] sm:$0x1] %v696_v25  ;;  %v755_v27 = vsel %vm6592_vm7, 0, %v754_v26 }
  0x27   : > { %756 = vst [vmem:[#allocation2 + $0x68] sm:$0x1] %v755_v27  ;;  %v751_v28 = vld [vmem:[#allocation2 + $0x5c] sm:$0x1]  ;;  %v704_v30 = vld [vmem:[#allocation2 + $0x78] sm:$0x1] }
  0x28   : > { %v752_v29 = vsel %vm6592_vm7, 0, %v751_v28  ;;  %v705_v31 = vsel %vm6585_vm5, 0, %v704_v30  ;;  %v6662_v32 = vld [vmem:[%s9024_s2] ss:$0 sm:$0xff]  ;;  %v701_v36 = vld [vmem:[#allocation2 + $0x6c] sm:$0x1] }
  0x29   : > { %3324 = vrot.lane.b32.xlu1 %v5776_v4, %s6482_s10  ;;  %753 = vst [vmem:[#allocation2 + $0x5c] sm:$0x1] %v752_v29  ;;  %706 = vst [vmem:[#allocation2 + $0x78] sm:$0x1] %v705_v31  ;;  %v2942_v39 = vshll.u32 %v6614_v48, 16  ;;  %v702_v40 = vsel %vm6585_vm5, 0, %v701_v36 }
  0x2a   : > { %6136 = vmatmul.mubr.msk.bf16.gmra.mxu0 %vm400_vm1, %v6340_v9  ;;  %v1365_v9 = vsel %vm6631_vm13, %v1360_v2, %v1364_v55  ;;  %v760_v41 = vld [vmem:[#allocation2 + $0x80] sm:$0x1]  ;;  %v2946_v43 = vshrl.u32 %v6614_v48, 16  ;;  %v2933_v44 = vshrl.u32 %v6612_v47, 16  ;;  %703 = vst [vmem:[#allocation2 + $0x6c] sm:$0x1] %v702_v40 }
  0x2b   : > { %6139 = vmatprep.mubr.msk.bf16.mxu0 %vm400_vm1, %v6341_v10  ;;  %v1375_v10 = vsel %vm6631_vm13, %v1370_v8, %v1374_v7  ;;  %v761_v45 = vsel %vm6592_vm7, 0, %v760_v41  ;;  %v9030_v52 = vrot.slane %v6614_v48, 5  ;;  %v2936_v53 = vshll.u32 %v6612_v47, 16  ;;  %v757_v54 = vld [vmem:[#allocation2 + $0x74] sm:$0x1] }
  0x2c   : > { %762 = vst [vmem:[#allocation2 + $0x80] sm:$0x1] %v761_v45  ;;  %v6676_v58 = vrot.slane %v2942_v39, 5  ;;  %v6679_v62 = vrot.slane %v2946_v43, 4  ;;  %v6681_v63 = vrot.slane %v2933_v44, 4  ;;  %v758_v0 = vsel %vm6592_vm7, 0, %v757_v54 }
  0x2d   : > { %759 = vst [vmem:[#allocation2 + $0x74] sm:$0x1] %v758_v0  ;;  %v1196_v6 = vld [vmem:[#allocation2 + $0x18] sm:$0xf]  ;;  %v1200_v29 = vld [vmem:[#allocation2 + $0x20] sm:$0x1] }
  0x2e   : > { %9048 = vst [vmem:[#allocation7_spill] sm:$0xff] %v6676_v58  ;;  %9049 = vst [vmem:[#allocation8_spill] sm:$0xff] %v6679_v62  ;;  %v6714_v0 = vrot.slane %v9030_v52, 4  ;;  %vm3949_vm4 = vcmask 195584   ;;  %vm3982_vm6 = vcmask 261120   ;;  %vm4015_vm8 = vcmask 326656  }
  0x2f   : > { %vm4048_vm9 = vcmask 392192   ;;  %vm4081_vm11 = vcmask 457728   ;;  %vm4114_vm12 = vcmask 523264   ;;  %vm4147_vm14 = vcmask 588800  }
  0x30   : > { %9054 = vst [vmem:[#allocation9_spill] sm:$0xff] %v6714_v0 }
  0x32   : > { %6140 = vmatmul.mubr.msk.bf16.gmra.mxu0 %vm400_vm1, %v6342_v11  ;;  %v5760_v11 = vcombine.low %v1365_v9, %v1375_v10 }
  0x33   : > { %6143 = vmatprep.mubr.msk.bf16.mxu0 %vm400_vm1, %v6343_v12  ;;  %v692_v12 = vld [vmem:[#allocation2 + $0x48] sm:$0x1] }
  0x34   : > { %3244 = vrot.lane.b32.xlu0 %v5760_v11, %s6483_s11  ;;  %v6692_v11 = vrot.slane %v2936_v53, 5 }
  0x3a   : > { %6144 = vmatmul.mubr.msk.bf16.gmra.mxu0 %vm400_vm1, %v6344_v13  ;;  %v693_v13 = vsel %vm6585_vm5, 0, %v692_v12 }
  0x3b   : > { %6147 = vmatprep.mubr.msk.bf16.mxu0 %vm400_vm1, %v6345_v14  ;;  %694 = vst [vmem:[#allocation2 + $0x48] sm:$0x1] %v693_v13  ;;  %v689_v14 = vld [vmem:[#allocation2 + $0x3c] sm:$0x1] }
  0x42   : > { %6148 = vmatmul.mubr.msk.bf16.gmra.mxu0 %vm400_vm1, %v6346_v15  ;;  %v690_v15 = vsel %vm6585_vm5, 0, %v689_v14 }
  0x43   : > { %6151 = vmatprep.mubr.msk.bf16.mxu0 %vm400_vm1, %v6347_v16  ;;  %691 = vst [vmem:[#allocation2 + $0x3c] sm:$0x1] %v690_v15  ;;  %v748_v16 = vld [vmem:[#allocation2 + $0x50] sm:$0x1] }
  0x4a   : > { %6152 = vmatmul.mubr.msk.bf16.gmra.mxu0 %vm400_vm1, %v6348_v17  ;;  %v749_v17 = vsel %vm6592_vm7, 0, %v748_v16  ;;  %v1189_v16 = vld [vmem:[#allocation2 + $0xc] sm:$0xf] }
  0x4b   : > { %750 = vst [vmem:[#allocation2 + $0x50] sm:$0x1] %v749_v17 }
  0xd2   : > { %v6125_v33 = vpop.f32.mrf.mxu0 }
  0xd3   : > { %v496_v34 = vadd.f32 %v6125_v33, %v6662_v32 }
  0xd4   : > { %v487_v35 = vpop.f32.mrf.mxu0 }
  0xd5   : > { %v616_v37 = vmax.f32 %v496_v34, 0.0  ;;  %v488_v38 = vadd.f32 %v6662_v32, %v487_v35 }
  0xd6   : > { %v6126_v42 = vpop.f32.mrf.mxu0 }
  0xd7   : > { %v6002_v46 = vpack.c.bf16 %v616_v37, %v616_v37  ;;  %v614_v49 = vmax.f32 %v488_v38, 0.0  ;;  %v499_v50 = vadd.f32 %v6126_v42, %v6662_v32 }
  0xd8   : > { %v490_v51 = vpop.f32.mrf.mxu0 }
  0xd9   : > { %v884_v55 = vshrl.u32 %v6002_v46, 16  ;;  %v6000_v56 = vpack.c.bf16 %v614_v49, %v614_v49  ;;  %v617_v57 = vmax.f32 %v499_v50, 0.0  ;;  %v491_v60 = vadd.f32 %v6662_v32, %v490_v51 }
  0xda   : > { %v6129_v61 = vpop.f32.mrf.mxu0  ;;  %v887_v2 = vshll.u32 %v6002_v46, 16  ;;  %v1193_v46 = vld [vmem:[#allocation2 + $0x14] sm:$0x1] }
  0xdb   : > { %v886_v1 = vrot.slane %v884_v55, 7  ;;  %v867_v3 = vshrl.u32 %v6000_v56, 16  ;;  %v6003_v47 = vpack.c.bf16 %v617_v57, %v617_v57  ;;  %v870_v7 = vshll.u32 %v6000_v56, 16  ;;  %v1210_v56 = vld [vmem:[#allocation2 + $0x30] sm:$0xf] }
  0xdc   : > { %v615_v8 = vmax.f32 %v491_v60, 0.0  ;;  %v512_v9 = vadd.f32 %v6129_v61, %v6662_v32  ;;  %v503_v10 = vpop.f32.mrf.mxu0 }
  0xdd   : > { %v889_v12 = vor.u32 %v887_v2, %v886_v1  ;;  %v890_v13 = vrot.slane %v886_v1, 4  ;;  %v869_v14 = vrot.slane %v867_v3, 7  ;;  %v892_v15 = vshrl.u32 %v6003_v47, 16 }
  0xde   : > { %v895_v17 = vshll.u32 %v6003_v47, 16  ;;  %v6001_v18 = vpack.c.bf16 %v615_v8, %v615_v8  ;;  %v620_v20 = vmax.f32 %v512_v9, 0.0  ;;  %v504_v21 = vadd.f32 %v6662_v32, %v503_v10  ;;  %v6130_v23 = vpop.f32.mrf.mxu0 }
  0xdf   : > { %v1197_v24 = vsel %vm6687_vm15, %v889_v12, %v1196_v6  ;;  %v872_v25 = vor.u32 %v870_v7, %v869_v14  ;;  %v873_v26 = vrot.slane %v869_v14, 4  ;;  %v894_v27 = vrot.slane %v892_v15, 7  ;;  %v1203_v15 = vld [vmem:[#allocation2 + $0x24] sm:$0xf] }
  0xe0   : > { %1198 = vst [vmem:[#allocation2 + $0x18] sm:$0xf] %v1197_v24  ;;  %v875_v30 = vshrl.u32 %v6001_v18, 16  ;;  %v878_v31 = vshll.u32 %v6001_v18, 16  ;;  %v6006_v33 = vpack.c.bf16 %v620_v20, %v620_v20  ;;  %v618_v34 = vmax.f32 %v504_v21, 0.0  ;;  %v506_v35 = vpop.f32.mrf.mxu0 }
  0xe1   : > { %v1190_v36 = vsel %vm6687_vm15, %v872_v25, %v1189_v16  ;;  %v897_v37 = vor.u32 %v895_v17, %v894_v27  ;;  %v899_v38 = vrot.slane %v894_v27, 4  ;;  %v515_v39 = vadd.f32 %v6130_v23, %v6662_v32  ;;  %v1214_v27 = vld [vmem:[#allocation2 + $0x38] sm:$0x1] }
  0xe2   : > { %1191 = vst [vmem:[#allocation2 + $0xc] sm:$0xf] %v1190_v36  ;;  %v877_v40 = vrot.slane %v875_v30, 7  ;;  %v918_v41 = vshrl.u32 %v6006_v33, 16  ;;  %v921_v42 = vshll.u32 %v6006_v33, 16  ;;  %v6004_v43 = vpack.c.bf16 %v618_v34, %v618_v34  ;;  %v6133_v1 = vpop.f32.mrf.mxu0 }
  0xe3   : > { %v898_v44 = vsel %vm6699_vm0, %v890_v13, %v897_v37  ;;  %v1201_v45 = vsel %vm6585_vm5, %v899_v38, %v1200_v29  ;;  %v621_v49 = vmax.f32 %v515_v39, 0.0  ;;  %v507_v50 = vadd.f32 %v6662_v32, %v506_v35 }
  0xe4   : > { %1199 = vst.msk [vmem:[#allocation2 + $0x1c] sm:$0xf] %vm662_vm2, %v898_v44  ;;  %1202 = vst [vmem:[#allocation2 + $0x20] sm:$0x1] %v1201_v45  ;;  %v880_v51 = vor.u32 %v878_v31, %v877_v40  ;;  %v882_v53 = vrot.slane %v877_v40, 4  ;;  %v920_v54 = vrot.slane %v918_v41, 7  ;;  %v528_v6 = vadd.f32 %v6133_v1, %v6662_v32  ;;  %v519_v25 = vpop.f32.mrf.mxu0 }
  0xe5   : > { %v901_v55 = vshrl.u32 %v6004_v43, 16  ;;  %v904_v57 = vshll.u32 %v6004_v43, 16  ;;  %v6007_v60 = vpack.c.bf16 %v621_v49, %v621_v49  ;;  %v619_v61 = vmax.f32 %v507_v50, 0.0 }
  0xe6   : > { %v881_v2 = vsel %vm6699_vm0, %v873_v26, %v880_v51  ;;  %v1194_v3 = vsel %vm6585_vm5, %v882_v53, %v1193_v46  ;;  %v923_v47 = vor.u32 %v921_v42, %v920_v54  ;;  %v924_v13 = vrot.slane %v920_v54, 4  ;;  %v6134_v46 = vpop.f32.mrf.mxu0 }
  0xe7   : > { %1192 = vst.msk [vmem:[#allocation2 + $0x10] sm:$0xf] %vm662_vm2, %v881_v2  ;;  %1195 = vst [vmem:[#allocation2 + $0x14] sm:$0x1] %v1194_v3  ;;  %v903_v7 = vrot.slane %v901_v55, 7  ;;  %v926_v8 = vshrl.u32 %v6007_v60, 16  ;;  %v6005_v10 = vpack.c.bf16 %v619_v61, %v619_v61  ;;  %v2939_v17 = vor.u32 %v6692_v11, %v6681_v63 }
  0xe8   : > { %v929_v9 = vshll.u32 %v6007_v60, 16  ;;  %v2524_v12 = vld [vmem:[#allocation2 + $0x18] sm:$0xf]  ;;  %v1211_v14 = vsel %vm6687_vm15, %v923_v47, %v1210_v56  ;;  %v624_v31 = vmax.f32 %v528_v6, 0.0  ;;  %v1207_v11 = vld [vmem:[#allocation2 + $0x2c] sm:$0x1]  ;;  %v520_v60 = vadd.f32 %v6662_v32, %v519_v25 }
  0xe9   : > { %1212 = vst [vmem:[#allocation2 + $0x30] sm:$0xf] %v1211_v14  ;;  %v906_v18 = vor.u32 %v904_v57, %v903_v7  ;;  %v928_v20 = vrot.slane %v926_v8, 7  ;;  %v909_v21 = vshrl.u32 %v6005_v10, 16  ;;  %v2573_v23 = vshrl.u32 %v2524_v12, 16 }
  0xea   : > { %v1917_v24 = vld [vmem:[#allocation2 + $0x18] sm:$0xf]  ;;  %v907_v26 = vrot.slane %v903_v7, 4  ;;  %v912_v29 = vshll.u32 %v6005_v10, 16  ;;  %v2576_v30 = vshll.u32 %v2524_v12, 16  ;;  %v6734_v38 = vrot.slane %v2939_v17, 4 }
  0xeb   : > { %v1204_v33 = vsel %vm6687_vm15, %v906_v18, %v1203_v15  ;;  %v931_v34 = vor.u32 %v929_v9, %v928_v20  ;;  %v933_v35 = vrot.slane %v928_v20, 4  ;;  %v911_v36 = vrot.slane %v909_v21, 7  ;;  %v6730_v37 = vld [vmem:[#allocation2 + $0x1c] sm:$0xf]  ;;  %v6756_v61 = vld [vmem:[#allocation2 + $0xc] sm:$0xf] }
  0xec   : > { %v6732_v63 = vld [vmem:[#allocation2 + $0x1c] sm:$0xf]  ;;  %1205 = vst [vmem:[#allocation2 + $0x24] sm:$0xf] %v1204_v33  ;;  %9055 = vst [vmem:[#allocation10_spill] sm:$0xff] %v6734_v38  ;;  %v5840_v39 = vcombine.low %v2524_v12, %v6730_v37  ;;  %v1988_v40 = vshrl.u32 %v1917_v24, 16  ;;  %v6010_v53 = vpack.c.bf16 %v624_v31, %v624_v31  ;;  %v531_v18 = vadd.f32 %v6134_v46, %v6662_v32 }
  0xed   : > { %v1991_v41 = vshll.u32 %v1917_v24, 16  ;;  %v932_v42 = vsel %vm6699_vm0, %v924_v13, %v931_v34  ;;  %v1215_v43 = vsel %vm6585_vm5, %v933_v35, %v1214_v27  ;;  %v914_v44 = vor.u32 %v912_v29, %v911_v36  ;;  %v2348_v1 = vld [vmem:[#allocation2 + $0x18] sm:$0xe]  ;;  %v6764_v7 = vld [vmem:[#allocation2 + $0x20] sm:$0x1]  ;;  %v522_v13 = vpop.f32.mrf.mxu0 }
  0xee   : > { %v916_v45 = vrot.slane %v911_v36, 4  ;;  %1213 = vst.msk [vmem:[#allocation2 + $0x34] sm:$0xf] %vm662_vm2, %v932_v42  ;;  %1216 = vst [vmem:[#allocation2 + $0x38] sm:$0x1] %v1215_v43  ;;  %v6742_v49 = vrot.slane %v2573_v23, 4  ;;  %3676 = vrot.lane.b32.xlu0 %v5840_v39, %s6481_s9  ;;  %v5793_v51 = vcombine.low %v1917_v24, %v6732_v63 }
  0xef   : > { %v6744_v50 = vrot.slane %v2576_v30, 5  ;;  %v6748_v54 = vld [vmem:[#allocation2 + $0x10] sm:$0xf]  ;;  %v915_v55 = vsel %vm6699_vm0, %v907_v26, %v914_v44  ;;  %v2586_v57 = vshrl.u32 %v6730_v37, 16  ;;  %v6759_v2 = vrot.slane %v1988_v40, 4 }
  0xf0   : > { %v1208_v56 = vsel %vm6585_vm5, %v916_v45, %v1207_v11  ;;  %1206 = vst.msk [vmem:[#allocation2 + $0x28] sm:$0xf] %vm662_vm2, %v915_v55  ;;  %3422 = vrot.lane.b32.xlu1 %v5793_v51, %s6484_s14  ;;  %v952_v3 = vshrl.u32 %v6010_v53, 16  ;;  %v955_v47 = vshll.u32 %v6010_v53, 16  ;;  %v5792_v6 = vcombine.low %v6756_v61, %v6748_v54  ;;  %v1224_v20 = vld [vmem:[#allocation2 + $0x48] sm:$0xf] }
  0xf1   : > { %1209 = vst [vmem:[#allocation2 + $0x2c] sm:$0x1] %v1208_v56  ;;  %v6766_v8 = vrot.slane %v1991_v41, 5  ;;  %v2001_v9 = vshrl.u32 %v6732_v63, 16  ;;  %v622_v10 = vmax.f32 %v520_v60, 0.0  ;;  %v2420_v12 = vrot.slane %v6732_v63, 5 }
  0xf2   : > { %v6770_v14 = vrot.slane %v952_v3, 7  ;;  %v1977_v15 = vshrl.u32 %v6748_v54, 16  ;;  %3420 = vrot.lane.b32.xlu0 %v5792_v6, %s6484_s14  ;;  %v5713_v17 = vrot.slane %v2348_v1, 9  ;;  %v1964_v23 = vshrl.u32 %v6756_v61, 16  ;;  %v6781_v31 = vld [vmem:[#allocation2 + $0x20] sm:$0x1] }
  0xf3   : > { %v6008_v21 = vpack.c.bf16 %v622_v10, %v622_v10  ;;  %v2422_v24 = vrot.slane %v2420_v12, 4  ;;  %v2423_v25 = vrot.slane %v6764_v7, 5  ;;  %v625_v29 = vmax.f32 %v531_v18, 0.0  ;;  %v2956_v33 = vld [vmem:[#allocation2 + $0x18] sm:$0xe] }
  0xf4   : > { %v957_v26 = vor.u32 %v955_v47, %v6770_v14  ;;  %v2421_v27 = vsel %vm6623_vm10, %v5713_v17, %v2420_v12  ;;  %v523_v30 = vadd.f32 %v6662_v32, %v522_v13  ;;  %v958_v34 = vrot.slane %v6770_v14, 4  ;;  %v6786_v39 = vld [vmem:[#allocation2 + $0x10] sm:$0xf]  ;;  %v1737_v44 = vld [vmem:[#allocation2 + $0xc] sm:$0xe] }
  0xf5   : > { %v935_v35 = vshrl.u32 %v6008_v21, 16  ;;  %v938_v36 = vshll.u32 %v6008_v21, 16  ;;  %v2424_v11 = vsel %vm6623_vm10, %v2422_v24, %v2423_v25  ;;  %v6011_v42 = vpack.c.bf16 %v625_v29, %v625_v29  ;;  %v1217_v46 = vld [vmem:[#allocation2 + $0x3c] sm:$0xf]  ;;  %v6793_v3 = vld [vmem:[#allocation2 + $0x14] sm:$0x1] }
  0xf6   : > { %v1225_v40 = vsel %vm6687_vm15, %v957_v26, %v1224_v20  ;;  %v5825_v41 = vcombine.low %v2421_v27, %v2424_v11  ;;  %v623_v43 = vmax.f32 %v523_v30, 0.0  ;;  %v5728_v51 = vrot.slane %v2956_v33, 9  ;;  %v6798_v21 = vld [vmem:[#allocation2 + $0x1c] sm:$0xf]  ;;  %v1228_v25 = vld [vmem:[#allocation2 + $0x50] sm:$0x1] }
  0xf7   : > { %1226 = vst [vmem:[#allocation2 + $0x48] sm:$0xf] %v1225_v40  ;;  %v937_v45 = vrot.slane %v935_v35, 7  ;;  %v3022_v53 = vrot.slane %v6730_v37, 5  ;;  %v3025_v55 = vrot.slane %v6781_v31, 5  ;;  %v960_v56 = vshrl.u32 %v6011_v42, 16 }
  0xf8   : > { %3582 = vrot.lane.b32.xlu1 %v5825_v41, %s6485_s15  ;;  %v963_v60 = vshll.u32 %v6011_v42, 16  ;;  %v6009_v1 = vpack.c.bf16 %v623_v43, %v623_v43  ;;  %v1812_v47 = vrot.slane %v6786_v39, 5  ;;  %v5697_v13 = vrot.slane %v1737_v44, 9  ;;  %v6805_v11 = vld [vmem:[#allocation2 + $0x20] sm:$0x1] }
  0xf9   : > { %v940_v6 = vor.u32 %v938_v36, %v937_v45  ;;  %v941_v10 = vrot.slane %v937_v45, 4  ;;  %v3024_v12 = vrot.slane %v3022_v53, 4  ;;  %v962_v14 = vrot.slane %v960_v56, 7  ;;  %v1738_v40 = vld [vmem:[#allocation2 + $0x18] sm:$0xe] }
  0xfa   : > { %v943_v17 = vshrl.u32 %v6009_v1, 16  ;;  %v946_v18 = vshll.u32 %v6009_v1, 16  ;;  %v3023_v20 = vsel %vm6623_vm10, %v5728_v51, %v3022_v53  ;;  %v1814_v27 = vrot.slane %v1812_v47, 4  ;;  %v1221_v42 = vld [vmem:[#allocation2 + $0x44] sm:$0x1] }
  0xfb   : > { %v1218_v24 = vsel %vm6687_vm15, %v940_v6, %v1217_v46  ;;  %v3026_v26 = vsel %vm6623_vm10, %v3024_v12, %v3025_v55  ;;  %v1815_v29 = vrot.slane %v6793_v3, 5  ;;  %v965_v30 = vor.u32 %v963_v60, %v962_v14  ;;  %v1921_v46 = vld [vmem:[#allocation2 + $0x30] sm:$0xf]  ;;  %v2347_v12 = vld [vmem:[#allocation2 + $0xc] sm:$0xe] }
  0xfc   : > { %1219 = vst [vmem:[#allocation2 + $0x3c] sm:$0xf] %v1218_v24  ;;  %v967_v33 = vrot.slane %v962_v14, 4  ;;  %v945_v35 = vrot.slane %v943_v17, 7  ;;  %v5872_v36 = vcombine.low %v3023_v20, %v3026_v26  ;;  %v1967_v41 = vshll.u32 %v6756_v61, 16 }
  0xfd   : > { %v1813_v43 = vsel %vm6623_vm10, %v5697_v13, %v1812_v47  ;;  %v1816_v44 = vsel %vm6623_vm10, %v1814_v27, %v1815_v29  ;;  %v1819_v45 = vrot.slane %v6798_v21, 5  ;;  %v966_v51 = vsel %vm6699_vm0, %v958_v34, %v965_v30  ;;  %v6838_v24 = vld [vmem:[#allocation2 + $0x14] sm:$0x1] }
  0xfe   : > { %v1229_v53 = vsel %vm6585_vm5, %v967_v33, %v1228_v25  ;;  %v948_v55 = vor.u32 %v946_v18, %v945_v35  ;;  %v950_v56 = vrot.slane %v945_v35, 4  ;;  %3836 = vrot.lane.b32.xlu0 %v5872_v36, %s6486_s16  ;;  %1227 = vst.msk [vmem:[#allocation2 + $0x4c] sm:$0xf] %vm662_vm2, %v966_v51  ;;  %v5777_v60 = vcombine.low %v1813_v43, %v1816_v44  ;;  %v6860_v51 = vld [vmem:[#allocation2 + $0x34] sm:$0xf] }
  0xff   : > { %1230 = vst [vmem:[#allocation2 + $0x50] sm:$0x1] %v1229_v53  ;;  %v5698_v1 = vrot.slane %v1738_v40, 9  ;;  %v1821_v47 = vrot.slane %v1819_v45, 4  ;;  %v1822_v6 = vrot.slane %v6805_v11, 5  ;;  %v6822_v34 = vrot.slane %v1964_v23, 4 }
 0x100   : > { %v949_v13 = vsel %vm6699_vm0, %v941_v10, %v948_v55  ;;  %v1222_v14 = vsel %vm6585_vm5, %v950_v56, %v1221_v42  ;;  %v2036_v17 = vshrl.u32 %v1921_v46, 16  ;;  %v6828_v18 = vrot.slane %v1967_v41, 5  ;;  %3326 = vrot.lane.b32.xlu1 %v5777_v60, %s6482_s10  ;;  %v6836_v23 = vld [vmem:[#allocation2 + $0x34] sm:$0xf]  ;;  %v2528_v40 = vld [vmem:[#allocation2 + $0x30] sm:$0xf] }
 0x101   : > { %1220 = vst.msk [vmem:[#allocation2 + $0x40] sm:$0xf] %vm662_vm2, %v949_v13  ;;  %1223 = vst [vmem:[#allocation2 + $0x44] sm:$0x1] %v1222_v14  ;;  %v1820_v20 = vsel %vm6623_vm10, %v5698_v1, %v1819_v45  ;;  %v1823_v61 = vsel %vm6623_vm10, %v1821_v47, %v1822_v6  ;;  %v2039_v10 = vshll.u32 %v1921_v46, 16  ;;  %v5795_v26 = vcombine.low %v1921_v46, %v6836_v23 }
 0x102   : > { %v5778_v25 = vcombine.low %v1820_v20, %v1823_v61  ;;  %v5712_v27 = vrot.slane %v2347_v12, 9  ;;  %v2413_v29 = vrot.slane %v6748_v54, 5  ;;  %v1994_v30 = vor.u32 %v6766_v8, %v6759_v2  ;;  %v1305_v45 = vld [vmem:[#allocation2 + $0x18] sm:$0xf] }
 0x103   : > { %v1997_v33 = vshll.u32 %v6732_v63, 16  ;;  %v2003_v35 = vrot.slane %v2001_v9, 4  ;;  %v2007_v36 = vshll.u32 %v6764_v7, 16  ;;  %v6849_v41 = vrot.slane %v2036_v17, 4 }
 0x104   : > { %3328 = vrot.lane.b32.xlu0 %v5778_v25, %s6482_s10  ;;  %v2049_v42 = vshrl.u32 %v6836_v23, 16  ;;  %v2415_v43 = vrot.slane %v2413_v29, 4  ;;  %v2416_v44 = vrot.slane %v6838_v24, 5  ;;  %v6853_v46 = vrot.slane %v2039_v10, 5  ;;  %3426 = vrot.lane.b32.xlu1 %v5795_v26, %s6484_s14 }
 0x105   : > { %v2414_v63 = vsel %vm6623_vm10, %v5712_v27, %v2413_v29  ;;  %v1995_v2 = vrot.slane %v1994_v30, 4  ;;  %v1999_v7 = vrot.slane %v1997_v33, 5  ;;  %v2009_v9 = vrot.slane %v2007_v36, 5  ;;  %v6872_v30 = vld [vmem:[#allocation2 + $0x24] sm:$0xf] }
 0x106   : > { %v2417_v8 = vsel %vm6623_vm10, %v2415_v43, %v2416_v44  ;;  %v2621_v53 = vshrl.u32 %v2528_v40, 16  ;;  %v2624_v55 = vshll.u32 %v2528_v40, 16  ;;  %v5842_v1 = vcombine.low %v2528_v40, %v6860_v51  ;;  %v6879_v44 = vld [vmem:[#allocation2 + $0x28] sm:$0xf] }
 0x107   : > { %v5824_v56 = vcombine.low %v2414_v63, %v2417_v8  ;;  %v2004_v60 = vor.u32 %v2003_v35, %v1999_v7  ;;  %v1401_v47 = vshrl.u32 %v1305_v45, 16  ;;  %v2000_v6 = vsel %vm6631_vm13, %v1995_v2, %v1999_v7  ;;  %v6885_v7 = vld [vmem:[#allocation2 + $0x24] sm:$0xf] }
 0x108   : > { %v1404_v12 = vshll.u32 %v1305_v45, 16  ;;  %v1410_v13 = vshll.u32 %v6798_v21, 16  ;;  %v1414_v14 = vshrl.u32 %v6798_v21, 16  ;;  %v2579_v61 = vor.u32 %v6744_v50, %v6742_v49 }
 0x109   : > { %3580 = vrot.lane.b32.xlu0 %v5824_v56, %s6485_s15  ;;  %v2005_v17 = vrot.slane %v2004_v60, 4  ;;  %v1403_v20 = vrot.slane %v1401_v47, 4  ;;  %v2582_v10 = vshll.u32 %v6730_v37, 16  ;;  %v1420_v29 = vshll.u32 %v6805_v11, 16 }
 0x10a   : > { %v1406_v25 = vrot.slane %v1404_v12, 5  ;;  %v1412_v26 = vrot.slane %v1410_v13, 5  ;;  %v1416_v27 = vrot.slane %v1414_v14, 4  ;;  %v2580_v21 = vrot.slane %v2579_v61, 4 }
 0x10b   : > { %v2010_v33 = vsel %vm6631_vm13, %v2005_v17, %v2009_v9  ;;  %v2584_v35 = vrot.slane %v2582_v10, 5  ;;  %v2588_v36 = vrot.slane %v2586_v57, 4  ;;  %v2592_v50 = vshll.u32 %v6781_v31, 16  ;;  %v6890_v9 = vld [vmem:[#allocation2 + $0x28] sm:$0xf] }
 0x10c   : > { %v5809_v40 = vcombine.low %v2000_v6, %v2010_v33  ;;  %v1407_v43 = vor.u32 %v1406_v25, %v1403_v20  ;;  %v1417_v49 = vor.u32 %v1416_v27, %v1412_v26  ;;  %v2634_v45 = vshrl.u32 %v6860_v51, 16  ;;  %v2350_v6 = vld [vmem:[#allocation2 + $0x30] sm:$0xe]  ;;  %v6903_v17 = vld [vmem:[#allocation2 + $0x38] sm:$0x1] }
 0x10d   : > { %3680 = vrot.lane.b32.xlu0 %v5842_v1, %s6481_s9  ;;  %v2589_v11 = vor.u32 %v2588_v36, %v2584_v35  ;;  %v2597_v63 = vshrl.u32 %v6872_v30, 16  ;;  %v2600_v2 = vshll.u32 %v6872_v30, 16  ;;  %v6888_v37 = vrot.slane %v2621_v53, 4 }
 0x10e   : > { %3502 = vrot.lane.b32.xlu1 %v5809_v40, %s6487_s17  ;;  %v1408_v57 = vrot.slane %v1407_v43, 4  ;;  %v1418_v31 = vrot.slane %v1417_v49, 4  ;;  %v1422_v8 = vrot.slane %v1420_v29, 5  ;;  %v6892_v56 = vrot.slane %v2624_v55, 5  ;;  %v1303_v55 = vld [vmem:[#allocation2 + $0xc] sm:$0xf]  ;;  %v6137_v43 = vpop.f32.mrf.mxu0 }
 0x10f   : > { %v2585_v60 = vsel %vm6631_vm13, %v2580_v21, %v2584_v35  ;;  %v2590_v1 = vrot.slane %v2589_v11, 4  ;;  %v2594_v47 = vrot.slane %v2592_v50, 5  ;;  %v6900_v13 = vrot.slane %v2597_v63, 4  ;;  %v6917_v49 = vld [vmem:[#allocation2 + $0x28] sm:$0xf] }
 0x110   : > { %v1413_v12 = vsel %vm6631_vm13, %v1408_v57, %v1412_v26  ;;  %v1423_v53 = vsel %vm6631_vm13, %v1418_v31, %v1422_v8  ;;  %v2610_v14 = vshrl.u32 %v6879_v44, 16  ;;  %v6907_v10 = vrot.slane %v2600_v2, 5  ;;  %v1739_v2 = vld [vmem:[#allocation2 + $0x24] sm:$0xe] }
 0x111   : > { %v5762_v20 = vcombine.low %v1413_v12, %v1423_v53  ;;  %v2595_v61 = vsel %vm6631_vm13, %v2590_v1, %v2594_v47  ;;  %v5841_v25 = vcombine.low %v6872_v30, %v6879_v44  ;;  %v2012_v27 = vshrl.u32 %v6885_v7, 16  ;;  %v6926_v1 = vld [vmem:[#allocation2 + $0x2c] sm:$0x1] }
 0x112   : > { %v5856_v26 = vcombine.low %v2585_v60, %v2595_v61  ;;  %v5794_v29 = vcombine.low %v6885_v7, %v6890_v9  ;;  %v5715_v33 = vrot.slane %v2350_v6, 9  ;;  %v2434_v21 = vrot.slane %v6836_v23, 5  ;;  %v535_v61 = vpop.f32.mrf.mxu0 }
 0x113   : > { %3248 = vrot.lane.b32.xlu1 %v5762_v20, %s6483_s11  ;;  %v2437_v35 = vrot.slane %v6903_v17, 5  ;;  %v1377_v36 = vshrl.u32 %v1303_v55, 16  ;;  %v1380_v40 = vshll.u32 %v1303_v55, 16  ;;  %v1386_v30 = vshll.u32 %v6786_v39, 16 }
 0x114   : > { %3756 = vrot.lane.b32.xlu0 %v5856_v26, %s6488_s18  ;;  %v1390_v50 = vshrl.u32 %v6786_v39, 16  ;;  %v1396_v11 = vshll.u32 %v6793_v3, 16  ;;  %v544_v63 = vadd.f32 %v6137_v43, %v6662_v32  ;;  %v2435_v57 = vsel %vm6623_vm10, %v5715_v33, %v2434_v21 }
 0x115   : > { %v2436_v31 = vrot.slane %v2434_v21, 4  ;;  %v1379_v8 = vrot.slane %v1377_v36, 4  ;;  %v1382_v60 = vrot.slane %v1380_v40, 5  ;;  %v1388_v47 = vrot.slane %v1386_v30, 5 }
 0x116   : > { %v1392_v6 = vrot.slane %v1390_v50, 4  ;;  %v1398_v12 = vrot.slane %v1396_v11, 5  ;;  %v628_v53 = vmax.f32 %v544_v63, 0.0  ;;  %v5699_v55 = vrot.slane %v1739_v2, 9 }
 0x117   : > { %3678 = vrot.lane.b32.xlu1 %v5841_v25, %s6481_s9  ;;  %v2438_v39 = vsel %vm6623_vm10, %v2436_v31, %v2437_v35  ;;  %v1383_v3 = vor.u32 %v1382_v60, %v1379_v8  ;;  %v1826_v20 = vrot.slane %v6917_v49, 5  ;;  %v1829_v36 = vrot.slane %v6926_v1, 5  ;;  %v6138_v8 = vpop.f32.mrf.mxu0 }
 0x118   : > { %3424 = vrot.lane.b32.xlu0 %v5794_v29, %s6484_s14  ;;  %v5827_v26 = vcombine.low %v2435_v57, %v2438_v39  ;;  %v1393_v33 = vor.u32 %v1392_v6, %v1388_v47  ;;  %v6014_v21 = vpack.c.bf16 %v628_v53, %v628_v53  ;;  %v536_v30 = vadd.f32 %v6662_v32, %v535_v61 }
 0x119   : > { %v1384_v40 = vrot.slane %v1383_v3, 4  ;;  %v1827_v43 = vsel %vm6623_vm10, %v5699_v55, %v1826_v20  ;;  %v1828_v25 = vrot.slane %v1826_v20, 4  ;;  %v1970_v63 = vor.u32 %v6828_v18, %v6822_v34  ;;  %v1238_v18 = vld [vmem:[#allocation2 + $0x60] sm:$0xf] }
 0x11a   : > { %v1394_v35 = vrot.slane %v1393_v33, 4  ;;  %v986_v50 = vshrl.u32 %v6014_v21, 16  ;;  %v989_v11 = vshll.u32 %v6014_v21, 16  ;;  %v626_v57 = vmax.f32 %v536_v30, 0.0  ;;  %v1231_v30 = vld [vmem:[#allocation2 + $0x54] sm:$0xf] }
 0x11b   : > { %3586 = vrot.lane.b32.xlu1 %v5827_v26, %s6485_s15  ;;  %v1389_v29 = vsel %vm6631_vm13, %v1384_v40, %v1388_v47  ;;  %v1830_v2 = vsel %vm6623_vm10, %v1828_v25, %v1829_v36  ;;  %v1973_v31 = vshll.u32 %v6748_v54, 16  ;;  %v1971_v39 = vrot.slane %v1970_v63, 4  ;;  %v538_v54 = vpop.f32.mrf.mxu0 }
 0x11c   : > { %v1399_v60 = vsel %vm6631_vm13, %v1394_v35, %v1398_v12  ;;  %v6947_v6 = vrot.slane %v986_v50, 7  ;;  %v5779_v53 = vcombine.low %v1827_v43, %v1830_v2  ;;  %v6012_v3 = vpack.c.bf16 %v626_v57, %v626_v57  ;;  %v6958_v43 = vld [vmem:[#allocation2 + $0x48] sm:$0xf]  ;;  %v6971_v2 = vld [vmem:[#allocation2 + $0x4c] sm:$0xf] }
 0x11d   : > { %v5761_v34 = vcombine.low %v1389_v29, %v1399_v60  ;;  %v1975_v55 = vrot.slane %v1973_v31, 5  ;;  %v1979_v47 = vrot.slane %v1977_v15, 4  ;;  %v2015_v20 = vshll.u32 %v6885_v7, 16  ;;  %v6977_v60 = vld [vmem:[#allocation2 + $0x38] sm:$0x1] }
 0x11e   : > { %v991_v61 = vor.u32 %v989_v11, %v6947_v6  ;;  %v1983_v26 = vshll.u32 %v6838_v24, 16  ;;  %v547_v33 = vadd.f32 %v6138_v8, %v6662_v32  ;;  %v2025_v12 = vshrl.u32 %v6890_v9, 16 }
 0x11f   : > { %3246 = vrot.lane.b32.xlu0 %v5761_v34, %s6483_s11  ;;  %3330 = vrot.lane.b32.xlu1 %v5779_v53, %s6482_s10  ;;  %v969_v21 = vshrl.u32 %v6012_v3, 16  ;;  %v972_v36 = vshll.u32 %v6012_v3, 16  ;;  %v1980_v40 = vor.u32 %v1979_v47, %v1975_v55  ;;  %v6962_v15 = vrot.slane %v2012_v27, 4 }
 0x120   : > { %v992_v24 = vrot.slane %v6947_v6, 4  ;;  %v1239_v25 = vsel %vm6687_vm15, %v991_v61, %v1238_v18  ;;  %v629_v35 = vmax.f32 %v547_v33, 0.0  ;;  %v1976_v11 = vsel %vm6631_vm13, %v1971_v39, %v1975_v55  ;;  %v2958_v6 = vld [vmem:[#allocation2 + $0x30] sm:$0xe] }
 0x121   : > { %1240 = vst [vmem:[#allocation2 + $0x60] sm:$0xf] %v1239_v25  ;;  %v6967_v50 = vrot.slane %v969_v21, 7  ;;  %v1981_v63 = vrot.slane %v1980_v40, 4  ;;  %v1985_v29 = vrot.slane %v1983_v26, 5  ;;  %v2084_v27 = vshrl.u32 %v6958_v43, 16 }
 0x122   : > { %v6015_v57 = vpack.c.bf16 %v629_v35, %v629_v35  ;;  %v5797_v31 = vcombine.low %v6958_v43, %v6971_v2  ;;  %v539_v8 = vadd.f32 %v6662_v32, %v538_v54  ;;  %v2087_v18 = vshll.u32 %v6958_v43, 16  ;;  %v1242_v40 = vld [vmem:[#allocation2 + $0x68] sm:$0x1] }
 0x123   : > { %v974_v53 = vor.u32 %v972_v36, %v6967_v50  ;;  %v975_v34 = vrot.slane %v6967_v50, 4  ;;  %v1986_v39 = vsel %vm6631_vm13, %v1981_v63, %v1985_v29  ;;  %v5730_v26 = vrot.slane %v2958_v6, 9  ;;  %v1310_v50 = vld [vmem:[#allocation2 + $0x34] sm:$0xf] }
 0x124   : > { %v5808_v3 = vcombine.low %v1976_v11, %v1986_v39  ;;  %v994_v55 = vshrl.u32 %v6015_v57, 16  ;;  %v997_v47 = vshll.u32 %v6015_v57, 16  ;;  %3430 = vrot.lane.b32.xlu1 %v5797_v31, %s6484_s14  ;;  %v627_v61 = vmax.f32 %v539_v8, 0.0  ;;  %v1337_v57 = vld [vmem:[#allocation2 + $0x38] sm:$0x1] }
 0x125   : > { %v1232_v32 = vsel %vm6687_vm15, %v974_v53, %v1231_v30  ;;  %v3036_v33 = vrot.slane %v6860_v51, 5  ;;  %v3039_v21 = vrot.slane %v6977_v60, 5  ;;  %v2042_v25 = vor.u32 %v6853_v46, %v6849_v41  ;;  %v1740_v39 = vld [vmem:[#allocation2 + $0x30] sm:$0xe] }
 0x126   : > { %1233 = vst [vmem:[#allocation2 + $0x54] sm:$0xf] %v1232_v32  ;;  %3500 = vrot.lane.b32.xlu0 %v5808_v3, %s6487_s17  ;;  %v996_v36 = vrot.slane %v994_v55, 7  ;;  %v6013_v54 = vpack.c.bf16 %v627_v61, %v627_v61  ;;  %v2045_v35 = vshll.u32 %v6836_v23, 16  ;;  %v2051_v63 = vrot.slane %v2049_v42, 4 }
 0x127   : > { %v3037_v30 = vsel %vm6623_vm10, %v5730_v26, %v3036_v33  ;;  %v3038_v11 = vrot.slane %v3036_v33, 4  ;;  %v2055_v29 = vshll.u32 %v6903_v17, 16  ;;  %v2043_v46 = vrot.slane %v2042_v25, 4  ;;  %v1309_v61 = vld [vmem:[#allocation2 + $0x30] sm:$0xf] }
 0x128   : > { %v999_v31 = vor.u32 %v997_v47, %v996_v36  ;;  %v1001_v8 = vrot.slane %v996_v36, 4  ;;  %v977_v6 = vshrl.u32 %v6013_v54, 16  ;;  %v980_v53 = vshll.u32 %v6013_v54, 16  ;;  %v1235_v47 = vld [vmem:[#allocation2 + $0x5c] sm:$0x1] }
 0x129   : > { %v3040_v41 = vsel %vm6623_vm10, %v3038_v11, %v3039_v21  ;;  %v2047_v3 = vrot.slane %v2045_v35, 5  ;;  %v2057_v55 = vrot.slane %v2055_v29, 5  ;;  %v5700_v21 = vrot.slane %v1740_v39, 9 }
 0x12a   : > { %v1000_v32 = vsel %vm6699_vm0, %v992_v24, %v999_v31  ;;  %v1243_v23 = vsel %vm6585_vm5, %v1001_v8, %v1242_v40  ;;  %v979_v42 = vrot.slane %v977_v6, 7  ;;  %v5874_v17 = vcombine.low %v3037_v30, %v3040_v41 }
 0x12b   : > { %1241 = vst.msk [vmem:[#allocation2 + $0x64] sm:$0xf] %vm662_vm2, %v1000_v32  ;;  %1244 = vst [vmem:[#allocation2 + $0x68] sm:$0x1] %v1243_v23  ;;  %v2048_v26 = vsel %vm6631_vm13, %v2043_v46, %v2047_v3  ;;  %v2052_v33 = vor.u32 %v2051_v63, %v2047_v3  ;;  %v1833_v36 = vrot.slane %v1310_v50, 5  ;;  %v1836_v24 = vrot.slane %v1337_v57, 5 }
 0x12c   : > { %v982_v54 = vor.u32 %v980_v53, %v979_v42  ;;  %v984_v25 = vrot.slane %v979_v42, 4  ;;  %3840 = vrot.lane.b32.xlu0 %v5874_v17, %s6486_s16  ;;  %v1449_v35 = vshrl.u32 %v1309_v61, 16  ;;  %v1452_v29 = vshll.u32 %v1309_v61, 16  ;;  %v2957_v53 = vld [vmem:[#allocation2 + $0x24] sm:$0xe] }
 0x12d   : > { %v2053_v11 = vrot.slane %v2052_v33, 4  ;;  %v1834_v40 = vsel %vm6623_vm10, %v5700_v21, %v1833_v36  ;;  %v1835_v30 = vrot.slane %v1833_v36, 4  ;;  %v1458_v6 = vshll.u32 %v1310_v50, 16  ;;  %v2557_v61 = vld [vmem:[#allocation2 + $0x2c] sm:$0x1] }
 0x12e   : > { %v983_v31 = vsel %vm6699_vm0, %v975_v34, %v982_v54  ;;  %v1236_v63 = vsel %vm6585_vm5, %v984_v25, %v1235_v47  ;;  %v1451_v8 = vrot.slane %v1449_v35, 4  ;;  %v1454_v46 = vrot.slane %v1452_v29, 5  ;;  %v2530_v36 = vld [vmem:[#allocation2 + $0x3c] sm:$0xf]  ;;  %v2349_v25 = vld [vmem:[#allocation2 + $0x24] sm:$0xe] }
 0x12f   : > { %1234 = vst.msk [vmem:[#allocation2 + $0x58] sm:$0xf] %vm662_vm2, %v983_v31  ;;  %1237 = vst [vmem:[#allocation2 + $0x5c] sm:$0x1] %v1236_v63  ;;  %v2058_v39 = vsel %vm6631_vm13, %v2053_v11, %v2057_v55  ;;  %v1837_v41 = vsel %vm6623_vm10, %v1835_v30, %v1836_v24  ;;  %v1462_v3 = vshrl.u32 %v1310_v50, 16  ;;  %v1460_v23 = vrot.slane %v1458_v6, 5 }
 0x130   : > { %v5811_v32 = vcombine.low %v2048_v26, %v2058_v39  ;;  %v5780_v34 = vcombine.low %v1834_v40, %v1837_v41  ;;  %v1468_v42 = vshll.u32 %v1337_v57, 16  ;;  %v1455_v17 = vor.u32 %v1454_v46, %v1451_v8  ;;  %v7029_v40 = vld [vmem:[#allocation2 + $0x2c] sm:$0x1]  ;;  %v7043_v39 = vld [vmem:[#allocation2 + $0x40] sm:$0xf] }
 0x131   : > { %v1464_v47 = vrot.slane %v1462_v3, 4  ;;  %v5729_v33 = vrot.slane %v2957_v53, 9  ;;  %v3029_v21 = vrot.slane %v6879_v44, 5  ;;  %v7022_v54 = vrot.slane %v2015_v20, 5 }
 0x132   : > { %v2097_v55 = vshrl.u32 %v6971_v2, 16  ;;  %3506 = vrot.lane.b32.xlu1 %v5811_v32, %s6487_s17  ;;  %3332 = vrot.lane.b32.xlu0 %v5780_v34, %s6482_s10  ;;  %v1470_v50 = vrot.slane %v1468_v42, 5  ;;  %v3032_v26 = vrot.slane %v2557_v61, 5  ;;  %v1456_v57 = vrot.slane %v1455_v17, 4  ;;  %v1307_v34 = vld [vmem:[#allocation2 + $0x24] sm:$0xf] }
 0x133   : > { %v1465_v24 = vor.u32 %v1464_v47, %v1460_v23  ;;  %v3030_v35 = vsel %vm6623_vm10, %v5729_v33, %v3029_v21  ;;  %v3031_v11 = vrot.slane %v3029_v21, 4  ;;  %v7033_v7 = vrot.slane %v2084_v27, 4 }
 0x134   : > { %v7037_v20 = vrot.slane %v2087_v18, 5  ;;  %v2645_v30 = vshrl.u32 %v2530_v36, 16  ;;  %v2648_v29 = vshll.u32 %v2530_v36, 16  ;;  %v1461_v31 = vsel %vm6631_vm13, %v1456_v57, %v1460_v23 }
 0x135   : > { %v1466_v63 = vrot.slane %v1465_v24, 4  ;;  %v3033_v8 = vsel %vm6623_vm10, %v3031_v11, %v3032_v26  ;;  %v5714_v6 = vrot.slane %v2349_v25, 9  ;;  %v2427_v27 = vrot.slane %v6890_v9, 5  ;;  %v7066_v24 = vld [vmem:[#allocation2 + $0x4c] sm:$0xf] }
 0x136   : > { %v5873_v53 = vcombine.low %v3030_v35, %v3033_v8  ;;  %v2430_v41 = vrot.slane %v7029_v40, 5  ;;  %v2603_v43 = vor.u32 %v6907_v10, %v6900_v13  ;;  %v2606_v46 = vshll.u32 %v6879_v44, 16  ;;  %v2532_v13 = vld [vmem:[#allocation2 + $0x48] sm:$0xf] }
 0x137   : > { %v1471_v18 = vsel %vm6631_vm13, %v1466_v63, %v1470_v50  ;;  %v2612_v3 = vrot.slane %v2610_v14, 4  ;;  %v2616_v32 = vshll.u32 %v2557_v61, 16  ;;  %v7055_v42 = vrot.slane %v2645_v30, 4 }
 0x138   : > { %v5764_v23 = vcombine.low %v1461_v31, %v1471_v18  ;;  %3838 = vrot.lane.b32.xlu0 %v5873_v53, %s6486_s16  ;;  %v2428_v17 = vsel %vm6623_vm10, %v5714_v6, %v2427_v27  ;;  %v2429_v47 = vrot.slane %v2427_v27, 4  ;;  %v7059_v10 = vrot.slane %v2648_v29, 5 }
 0x139   : > { %v2658_v33 = vshrl.u32 %v7043_v39, 16  ;;  %v5843_v21 = vcombine.low %v2530_v36, %v7043_v39  ;;  %v2608_v44 = vrot.slane %v2606_v46, 5  ;;  %v2604_v61 = vrot.slane %v2603_v43, 4  ;;  %v2352_v46 = vld [vmem:[#allocation2 + $0x48] sm:$0xe] }
 0x13a   : > { %3252 = vrot.lane.b32.xlu1 %v5764_v23, %s6483_s11  ;;  %v2431_v14 = vsel %vm6623_vm10, %v2429_v47, %v2430_v41  ;;  %v2618_v50 = vrot.slane %v2616_v32, 5  ;;  %v1425_v26 = vshrl.u32 %v1307_v34, 16  ;;  %v2669_v35 = vshrl.u32 %v2532_v13, 16 }
 0x13b   : > { %v5826_v25 = vcombine.low %v2428_v17, %v2431_v14  ;;  %v2613_v57 = vor.u32 %v2612_v3, %v2608_v44  ;;  %v2672_v11 = vshll.u32 %v2532_v13, 16  ;;  %v5844_v30 = vcombine.low %v2532_v13, %v7066_v24 }
 0x13c   : > { %v1427_v29 = vrot.slane %v1425_v26, 4  ;;  %v1428_v31 = vshll.u32 %v1307_v34, 16  ;;  %v1434_v36 = vshll.u32 %v6917_v49, 16  ;;  %v1438_v8 = vshrl.u32 %v6917_v49, 16  ;;  %v7083_v34 = vld [vmem:[#allocation2 + $0x50] sm:$0x1] }
 0x13d   : > { %3584 = vrot.lane.b32.xlu0 %v5826_v25, %s6485_s15  ;;  %v2614_v63 = vrot.slane %v2613_v57, 4  ;;  %v1444_v6 = vshll.u32 %v6926_v1, 16  ;;  %v2627_v53 = vor.u32 %v6892_v56, %v6888_v37  ;;  %v2630_v43 = vshll.u32 %v6860_v51, 16  ;;  %v7090_v26 = vld [vmem:[#allocation2 + $0x3c] sm:$0xf] }
 0x13e   : > { %3682 = vrot.lane.b32.xlu1 %v5843_v21, %s6481_s9  ;;  %v1430_v27 = vrot.slane %v1428_v31, 5  ;;  %v1436_v41 = vrot.slane %v1434_v36, 5  ;;  %v2636_v18 = vrot.slane %v2634_v45, 4  ;;  %v2609_v3 = vsel %vm6631_vm13, %v2604_v61, %v2608_v44  ;;  %v6141_v21 = vpop.f32.mrf.mxu0 }
 0x13f   : > { %v2619_v49 = vsel %vm6631_vm13, %v2614_v63, %v2618_v50  ;;  %v1440_v1 = vrot.slane %v1438_v8, 4  ;;  %v2628_v32 = vrot.slane %v2627_v53, 4  ;;  %v2632_v23 = vrot.slane %v2630_v43, 5  ;;  %v1741_v8 = vld [vmem:[#allocation2 + $0x3c] sm:$0xe] }
 0x140   : > { %v5857_v37 = vcombine.low %v2609_v3, %v2619_v49  ;;  %v1431_v56 = vor.u32 %v1430_v27, %v1427_v29  ;;  %v2640_v17 = vshll.u32 %v6977_v60, 16  ;;  %v1446_v45 = vrot.slane %v1444_v6, 5  ;;  %v7105_v53 = vld [vmem:[#allocation2 + $0x40] sm:$0xf]  ;;  %v7109_v43 = vld [vmem:[#allocation2 + $0x44] sm:$0x1] }
 0x141   : > { %3684 = vrot.lane.b32.xlu0 %v5844_v30, %s6481_s9  ;;  %v1441_v51 = vor.u32 %v1440_v1, %v1436_v41  ;;  %v5717_v47 = vrot.slane %v2352_v46, 9  ;;  %v2448_v13 = vrot.slane %v6971_v2, 5  ;;  %v2637_v14 = vor.u32 %v2636_v18, %v2632_v23  ;;  %v551_v18 = vpop.f32.mrf.mxu0  ;;  %v7117_v1 = vld [vmem:[#allocation2 + $0x40] sm:$0xf] }
 0x142   : > { %3758 = vrot.lane.b32.xlu1 %v5857_v37, %s6488_s18  ;;  %v1432_v44 = vrot.slane %v1431_v56, 4  ;;  %v2642_v61 = vrot.slane %v2640_v17, 5  ;;  %v2451_v50 = vrot.slane %v7083_v34, 5  ;;  %v7092_v25 = vrot.slane %v2669_v35, 4  ;;  %v7122_v37 = vld [vmem:[%s9024_s2] ss:$0 sm:$0xff] }
 0x143   : > { %v2682_v60 = vshrl.u32 %v7066_v24, 16  ;;  %v1442_v57 = vrot.slane %v1441_v51, 4  ;;  %v2450_v30 = vrot.slane %v2448_v13, 4  ;;  %v7095_v29 = vrot.slane %v2672_v11, 5 }
 0x144   : > { %v2633_v31 = vsel %vm6631_vm13, %v2628_v32, %v2632_v23  ;;  %v2638_v36 = vrot.slane %v2637_v14, 4  ;;  %v2449_v63 = vsel %vm6623_vm10, %v5717_v47, %v2448_v13  ;;  %v1437_v6 = vsel %vm6631_vm13, %v1432_v44, %v1436_v41 }
 0x145   : > { %v1447_v35 = vsel %vm6631_vm13, %v1442_v57, %v1446_v45  ;;  %v2060_v27 = vshrl.u32 %v7090_v26, 16  ;;  %v2063_v11 = vshll.u32 %v7090_v26, 16  ;;  %v2452_v49 = vsel %vm6623_vm10, %v2450_v30, %v2451_v50  ;;  %v6142_v50 = vpop.f32.mrf.mxu0 }
 0x146   : > { %v5763_v46 = vcombine.low %v1437_v6, %v1447_v35  ;;  %v2643_v3 = vsel %vm6631_vm13, %v2638_v36, %v2642_v61  ;;  %v5796_v41 = vcombine.low %v7090_v26, %v7105_v53  ;;  %v560_v56 = vadd.f32 %v7122_v37, %v6141_v21 }
 0x147   : > { %v5858_v32 = vcombine.low %v2633_v31, %v2643_v3  ;;  %v5701_v23 = vrot.slane %v1741_v8, 9  ;;  %v1840_v17 = vrot.slane %v7117_v1, 5  ;;  %v1843_v51 = vrot.slane %v7109_v43, 5 }
 0x148   : > { %3250 = vrot.lane.b32.xlu1 %v5763_v46, %s6483_s11  ;;  %v552_v45 = vadd.f32 %v7122_v37, %v551_v18  ;;  %v2018_v47 = vor.u32 %v7022_v54, %v6962_v15  ;;  %v2021_v13 = vshll.u32 %v6890_v9, 16  ;;  %v5829_v44 = vcombine.low %v2449_v63, %v2452_v49  ;;  %v7145_v18 = vld [vmem:[#allocation2 + $0x60] sm:$0xf] }
 0x149   : > { %3760 = vrot.lane.b32.xlu0 %v5858_v32, %s6488_s18  ;;  %v632_v14 = vmax.f32 %v560_v56, 0.0  ;;  %v1842_v61 = vrot.slane %v1840_v17, 4  ;;  %v2027_v21 = vrot.slane %v2025_v12, 4  ;;  %v1841_v57 = vsel %vm6623_vm10, %v5701_v23, %v1840_v17  ;;  %v554_v32 = vpop.f32.mrf.mxu0 }
 0x14a   : > { %v630_v30 = vmax.f32 %v552_v45, 0.0  ;;  %v2023_v31 = vrot.slane %v2021_v13, 5  ;;  %v2031_v36 = vshll.u32 %v7029_v40, 16  ;;  %v2019_v54 = vrot.slane %v2018_v47, 4 }
 0x14b   : > { %v6018_v8 = vpack.c.bf16 %v632_v14, %v632_v14  ;;  %v1844_v15 = vsel %vm6623_vm10, %v1842_v61, %v1843_v51  ;;  %v563_v63 = vadd.f32 %v7122_v37, %v6142_v50  ;;  %v7142_v6 = vrot.slane %v2060_v27, 4  ;;  %v1252_v27 = vld [vmem:[#allocation2 + $0x78] sm:$0xf]  ;;  %v7156_v61 = vld [vmem:[#allocation2 + $0x64] sm:$0xf] }
 0x14c   : > { %3590 = vrot.lane.b32.xlu1 %v5829_v44, %s6485_s15  ;;  %v2073_v9 = vshrl.u32 %v7105_v53, 16  ;;  %v6016_v12 = vpack.c.bf16 %v630_v30, %v630_v30  ;;  %v2028_v35 = vor.u32 %v2027_v21, %v2023_v31  ;;  %v2033_v3 = vrot.slane %v2031_v36, 5  ;;  %v1245_v36 = vld [vmem:[#allocation2 + $0x6c] sm:$0xf] }
 0x14d   : > { %3428 = vrot.lane.b32.xlu0 %v5796_v41, %s6484_s14  ;;  %v1020_v40 = vshrl.u32 %v6018_v8, 16  ;;  %v1023_v46 = vshll.u32 %v6018_v8, 16  ;;  %v633_v49 = vmax.f32 %v563_v63, 0.0  ;;  %v5781_v56 = vcombine.low %v1841_v57, %v1844_v15  ;;  %v2960_v57 = vld [vmem:[#allocation2 + $0x48] sm:$0xe] }
 0x14e   : > { %v1003_v23 = vshrl.u32 %v6016_v12, 16  ;;  %v1006_v17 = vshll.u32 %v6016_v12, 16  ;;  %v2029_v51 = vrot.slane %v2028_v35, 4  ;;  %v2024_v47 = vsel %vm6631_vm13, %v2019_v54, %v2023_v31  ;;  %v7162_v54 = vld [vmem:[#allocation2 + $0x50] sm:$0x1] }
 0x14f   : > { %v1022_v45 = vrot.slane %v1020_v40, 7  ;;  %v6019_v13 = vpack.c.bf16 %v633_v49, %v633_v49  ;;  %v2132_v44 = vshrl.u32 %v7145_v18, 16  ;;  %v2135_v21 = vshll.u32 %v7145_v18, 16 }
 0x150   : > { %3334 = vrot.lane.b32.xlu1 %v5781_v56, %s6482_s10  ;;  %v7152_v41 = vrot.slane %v1003_v23, 7  ;;  %v2034_v14 = vsel %vm6631_vm13, %v2029_v51, %v2033_v3  ;;  %v555_v50 = vadd.f32 %v7122_v37, %v554_v32  ;;  %v5799_v15 = vcombine.low %v7145_v18, %v7156_v61  ;;  %v1256_v23 = vld [vmem:[#allocation2 + $0x80] sm:$0x1] }
 0x151   : > { %v1025_v30 = vor.u32 %v1023_v46, %v1022_v45  ;;  %v5810_v31 = vcombine.low %v2024_v47, %v2034_v14  ;;  %v1028_v8 = vshrl.u32 %v6019_v13, 16  ;;  %v1026_v63 = vrot.slane %v1022_v45, 4 }
 0x152   : > { %v1008_v12 = vor.u32 %v1006_v17, %v7152_v41  ;;  %v1009_v35 = vrot.slane %v7152_v41, 4  ;;  %v1031_v40 = vshll.u32 %v6019_v13, 16  ;;  %v631_v49 = vmax.f32 %v555_v50, 0.0  ;;  %v1742_v50 = vld [vmem:[#allocation2 + $0x48] sm:$0xe] }
 0x153   : > { %v1253_v3 = vsel %vm6687_vm15, %v1025_v30, %v1252_v27  ;;  %3504 = vrot.lane.b32.xlu0 %v5810_v31, %s6487_s17  ;;  %v1030_v46 = vrot.slane %v1028_v8, 7  ;;  %v5732_v32 = vrot.slane %v2960_v57, 9  ;;  %v3050_v17 = vrot.slane %v7066_v24, 5  ;;  %v6371_v57 = vld [vmem:[%s9025_s3 + $0x38] sm:$0xff]   ;;  %v7187_v8 = vld [vmem:[#allocation2 + $0x50] sm:$0x1] }
 0x154   : > { %1254 = vst [vmem:[#allocation2 + $0x78] sm:$0xf] %v1253_v3  ;;  %v1246_v56 = vsel %vm6687_vm15, %v1008_v12, %v1245_v36  ;;  %3434 = vrot.lane.b32.xlu1 %v5799_v15, %s6484_s14  ;;  %v3053_v51 = vrot.slane %v7162_v54, 5  ;;  %v2090_v45 = vor.u32 %v7037_v20, %v7033_v7  ;;  %v6017_v13 = vpack.c.bf16 %v631_v49, %v631_v49  ;;  %v6372_v30 = vld [vmem:[%s9025_s3 + $0x78] sm:$0xff]  }
 0x155   : > { %1247 = vst [vmem:[#allocation2 + $0x6c] sm:$0xf] %v1246_v56  ;;  %v1033_v27 = vor.u32 %v1031_v40, %v1030_v46  ;;  %v1035_v47 = vrot.slane %v1030_v46, 4  ;;  %v2093_v14 = vshll.u32 %v6971_v2, 16  ;;  %v3051_v36 = vsel %vm6623_vm10, %v5732_v32, %v3050_v17  ;;  %v1313_v46 = vld [vmem:[#allocation2 + $0x48] sm:$0xf]  ;;  %6155 = vmatprep.subr.bf16.mxu1 %v6371_v57  ;;  %6203 = vmatprep.subr.bf16.mxu0 %v6372_v30 }
 0x156   : > { %v3052_v31 = vrot.slane %v3050_v17, 4  ;;  %v2091_v7 = vrot.slane %v2090_v45, 4  ;;  %v2099_v20 = vrot.slane %v2097_v55, 4  ;;  %v1011_v40 = vshrl.u32 %v6017_v13, 16  ;;  %v1314_v32 = vld [vmem:[#allocation2 + $0x4c] sm:$0xf]  ;;  %6156 = vmatpush3.bf16.msra.mxu1 %v6371_v57  ;;  %6204 = vmatpush3.bf16.msra.mxu0 %v6372_v30 }
 0x157   : > { %v1034_v15 = vsel %vm6699_vm0, %v1026_v63, %v1033_v27  ;;  %v1257_v12 = vsel %vm6585_vm5, %v1035_v47, %v1256_v23  ;;  %v1014_v3 = vshll.u32 %v6017_v13, 16  ;;  %v2095_v55 = vrot.slane %v2093_v14, 5  ;;  %v1249_v27 = vld [vmem:[#allocation2 + $0x74] sm:$0x1] }
 0x158   : > { %1255 = vst.msk [vmem:[#allocation2 + $0x7c] sm:$0xf] %vm662_vm2, %v1034_v15  ;;  %1258 = vst [vmem:[#allocation2 + $0x80] sm:$0x1] %v1257_v12  ;;  %v3054_v2 = vsel %vm6623_vm10, %v3052_v31, %v3053_v51  ;;  %v2103_v49 = vshll.u32 %v7083_v34, 16  ;;  %v5702_v56 = vrot.slane %v1742_v50, 9 }
 0x159   : > { %v1013_v63 = vrot.slane %v1011_v40, 7  ;;  %v5876_v23 = vcombine.low %v3051_v36, %v3054_v2  ;;  %v1847_v17 = vrot.slane %v1314_v32, 5  ;;  %v1850_v45 = vrot.slane %v7187_v8, 5  ;;  %v2959_v40 = vld [vmem:[#allocation2 + $0x3c] sm:$0xe] }
 0x15a   : > { %v2096_v47 = vsel %vm6631_vm13, %v2091_v7, %v2095_v55  ;;  %v2100_v13 = vor.u32 %v2099_v20, %v2095_v55  ;;  %v2105_v15 = vrot.slane %v2103_v49, 5  ;;  %v1497_v12 = vshrl.u32 %v1313_v46, 16  ;;  %v7211_v55 = vld [vmem:[#allocation2 + $0x44] sm:$0x1] }
 0x15b   : > { %v1016_v51 = vor.u32 %v1014_v3, %v1013_v63  ;;  %v1018_v14 = vrot.slane %v1013_v63, 4  ;;  %3844 = vrot.lane.b32.xlu0 %v5876_v23, %s6486_s16  ;;  %v1848_v34 = vsel %vm6623_vm10, %v5702_v56, %v1847_v17  ;;  %v1849_v50 = vrot.slane %v1847_v17, 4 }
 0x15c   : > { %v2101_v57 = vrot.slane %v2100_v13, 4  ;;  %v1499_v30 = vrot.slane %v1497_v12, 4  ;;  %v1500_v36 = vshll.u32 %v1313_v46, 16  ;;  %v1506_v31 = vshll.u32 %v1314_v32, 16  ;;  %v6374_v46 = vld [vmem:[%s9025_s3 + $0x30] sm:$0xff]  }
 0x15d   : > { %v1017_v7 = vsel %vm6699_vm0, %v1009_v35, %v1016_v51  ;;  %v1250_v20 = vsel %vm6585_vm5, %v1018_v14, %v1249_v27  ;;  %v1851_v3 = vsel %vm6623_vm10, %v1849_v50, %v1850_v45  ;;  %v1510_v2 = vshrl.u32 %v1314_v32, 16  ;;  %v2351_v45 = vld [vmem:[#allocation2 + $0x3c] sm:$0xe]  ;;  %6157 = vmatprep.subr.bf16.mxu1 %v6374_v46  ;;  %v6375_v27 = vld [vmem:[%s9025_s3 + $0x70] sm:$0xff]   ;;  %v7241_v50 = vld [vmem:[#allocation2 + $0x44] sm:$0x1] }
 0x15e   : > { %1248 = vst.msk [vmem:[#allocation2 + $0x70] sm:$0xf] %vm662_vm2, %v1017_v7  ;;  %1251 = vst [vmem:[#allocation2 + $0x74] sm:$0x1] %v1250_v20  ;;  %v2106_v41 = vsel %vm6631_vm13, %v2101_v57, %v2105_v15  ;;  %v5782_v35 = vcombine.low %v1848_v34, %v1851_v3  ;;  %v1502_v49 = vrot.slane %v1500_v36, 5  ;;  %v1508_v56 = vrot.slane %v1506_v31, 5  ;;  %6158 = vmatpush3.bf16.msra.mxu1 %v6374_v46  ;;  %v7243_v57 = vpop.permute.xlu0 %3244 }
 0x15f   : > { %v5813_v63 = vcombine.low %v2096_v47, %v2106_v41  ;;  %v1512_v23 = vrot.slane %v1510_v2, 4  ;;  %v1516_v17 = vshll.u32 %v7187_v8, 16  ;;  %v5731_v32 = vrot.slane %v2959_v40, 9  ;;  %v7230_v51 = vld [vmem:[#allocation2 + $0x54] sm:$0xf]  ;;  %v6376_v8 = vld [vmem:[%s9025_s3 + $0x28] sm:$0xff]   ;;  %6205 = vmatprep.subr.bf16.mxu0 %v6375_v27 }
 0x160   : > { %v7225_v13 = vrot.slane %v2063_v11, 5  ;;  %3336 = vrot.lane.b32.xlu0 %v5782_v35, %s6482_s10  ;;  %v1503_v15 = vor.u32 %v1502_v49, %v1499_v30  ;;  %v3043_v12 = vrot.slane %v7043_v39, 5  ;;  %v3046_v47 = vrot.slane %v7211_v55, 5  ;;  %v6377_v30 = vld [vmem:[%s9025_s3 + $0x68] sm:$0xff]   ;;  %6206 = vmatpush3.bf16.msra.mxu0 %v6375_v27  ;;  %v7428_v26 = vld [vmem:[#allocation2 + $0x7c] sm:$0xf] }
 0x161   : > { %v7237_v14 = vrot.slane %v2132_v44, 4  ;;  %3510 = vrot.lane.b32.xlu1 %v5813_v63, %s6487_s17  ;;  %v1513_v11 = vor.u32 %v1512_v23, %v1508_v56  ;;  %v1518_v34 = vrot.slane %v1516_v17, 5  ;;  %v7250_v36 = vrot.slane %v2135_v21, 5  ;;  %6159 = vmatprep.subr.bf16.mxu1 %v6376_v8  ;;  %v7260_v21 = vld [vmem:[#allocation2 + $0x58] sm:$0xf] }
 0x162   : > { %v1504_v44 = vrot.slane %v1503_v15, 4  ;;  %v3044_v31 = vsel %vm6623_vm10, %v5731_v32, %v3043_v12  ;;  %v3045_v40 = vrot.slane %v3043_v12, 4  ;;  %v2693_v20 = vshrl.u32 %v7230_v51, 16  ;;  %6207 = vmatprep.subr.bf16.mxu0 %v6377_v30  ;;  %6160 = vmatpush3.bf16.msra.mxu1 %v6376_v8  ;;  %v7416_v12 = vld [vmem:[#allocation2 + $0x68] sm:$0x1] }
 0x163   : > { %v1514_v7 = vrot.slane %v1513_v11, 4  ;;  %v2696_v3 = vshll.u32 %v7230_v51, 16  ;;  %v5716_v2 = vrot.slane %v2351_v45, 9  ;;  %v2441_v41 = vrot.slane %v7105_v53, 5  ;;  %v7278_v11 = vpop.permute.xlu0 %3676  ;;  %v7581_v62 = vld [vmem:[#allocation2 + $0x80] sm:$0x1] }
 0x164   : > { %v1509_v46 = vsel %vm6631_vm13, %v1504_v44, %v1508_v56  ;;  %v3047_v18 = vsel %vm6623_vm10, %v3045_v40, %v3046_v47  ;;  %v2444_v35 = vrot.slane %v7241_v50, 5  ;;  %v2651_v23 = vor.u32 %v7059_v10, %v7055_v42  ;;  %v7269_v56 = vld [vmem:[#allocation2 + $0x60] sm:$0xf]  ;;  %6208 = vmatpush3.bf16.msra.mxu0 %v6377_v30  ;;  %v1311_v10 = vld [vmem:[#allocation2 + $0x3c] sm:$0xf]  ;;  %v7288_v44 = vpop.permute.xlu1 %3706 }
 0x165   : > { %v1519_v49 = vsel %vm6631_vm13, %v1514_v7, %v1518_v34  ;;  %v5875_v63 = vcombine.low %v3044_v31, %v3047_v18  ;;  %v2654_v17 = vshll.u32 %v7043_v39, 16  ;;  %v2442_v45 = vsel %vm6623_vm10, %v5716_v2, %v2441_v41  ;;  %9056 = vst [vmem:[#allocation11_spill] sm:$0xff] %v7288_v44  ;;  %v7290_v7 = vld [vmem:[#allocation2 + $0x64] sm:$0xf] }
 0x166   : > { %v5766_v32 = vcombine.low %v1509_v46, %v1519_v49  ;;  %v2443_v27 = vrot.slane %v2441_v41, 4  ;;  %v2660_v15 = vrot.slane %v2658_v33, 4  ;;  %v2652_v47 = vrot.slane %v2651_v23, 4 }
 0x167   : > { %3842 = vrot.lane.b32.xlu0 %v5875_v63, %s6486_s16  ;;  %v2656_v8 = vrot.slane %v2654_v17, 5  ;;  %v2664_v42 = vshll.u32 %v7211_v55, 16  ;;  %v7281_v34 = vrot.slane %v2693_v20, 4  ;;  %v5845_v39 = vcombine.low %v7230_v51, %v7260_v21 }
 0x168   : > { %3256 = vrot.lane.b32.xlu1 %v5766_v32, %s6483_s11  ;;  %v2445_v33 = vsel %vm6623_vm10, %v2443_v27, %v2444_v35  ;;  %v2717_v30 = vshrl.u32 %v7269_v56, 16  ;;  %v2720_v2 = vshll.u32 %v7269_v56, 16  ;;  %v5846_v46 = vcombine.low %v7269_v56, %v7290_v7  ;;  %v2354_v27 = vld [vmem:[#allocation2 + $0x60] sm:$0xe] }
 0x169   : > { %v5828_v31 = vcombine.low %v2442_v45, %v2445_v33  ;;  %v2661_v40 = vor.u32 %v2660_v15, %v2656_v8  ;;  %v2666_v55 = vrot.slane %v2664_v42, 5  ;;  %v2657_v20 = vsel %vm6631_vm13, %v2652_v47, %v2656_v8  ;;  %v6379_v15 = vld [vmem:[%s9025_s3 + $0x20] sm:$0xff]   ;;  %v7310_v42 = vld [vmem:[#allocation2 + $0x68] sm:$0x1] }
 0x16a   : > { %v1473_v18 = vshrl.u32 %v1311_v10, 16  ;;  %v1476_v41 = vshll.u32 %v1311_v10, 16  ;;  %v1482_v49 = vshll.u32 %v7117_v1, 16  ;;  %v1486_v63 = vshrl.u32 %v7117_v1, 16  ;;  %v7312_v10 = vpop.permute.xlu0 %3420  ;;  %6161 = vmatprep.subr.bf16.mxu1 %v6379_v15 }
 0x16b   : > { %3588 = vrot.lane.b32.xlu0 %v5828_v31, %s6485_s15  ;;  %v2662_v35 = vrot.slane %v2661_v40, 4  ;;  %v1492_v23 = vshll.u32 %v7109_v43, 16  ;;  %v2675_v45 = vor.u32 %v7095_v29, %v7092_v25  ;;  %v2678_v56 = vshll.u32 %v7066_v24, 16  ;;  %v6380_v25 = vld [vmem:[%s9025_s3 + $0x60] sm:$0xff]   ;;  %v7317_v40 = vpop.permute.xlu1 %3324  ;;  %6162 = vmatpush3.bf16.msra.mxu1 %v6379_v15  ;;  %v1743_v15 = vld [vmem:[#allocation2 + $0x54] sm:$0xe] }
 0x16c   : > { %3686 = vrot.lane.b32.xlu1 %v5845_v39, %s6481_s9  ;;  %v1475_v17 = vrot.slane %v1473_v18, 4  ;;  %v1478_v32 = vrot.slane %v1476_v41, 5  ;;  %v1484_v1 = vrot.slane %v1482_v49, 5  ;;  %v1488_v8 = vrot.slane %v1486_v63, 4  ;;  %6209 = vmatprep.subr.bf16.mxu0 %v6380_v25 }
 0x16d   : > { %v2667_v47 = vsel %vm6631_vm13, %v2662_v35, %v2666_v55  ;;  %v1494_v43 = vrot.slane %v1492_v23, 5  ;;  %v2676_v33 = vrot.slane %v2675_v45, 4  ;;  %v2680_v31 = vrot.slane %v2678_v56, 5  ;;  %6210 = vmatpush3.bf16.msra.mxu0 %v6380_v25 }
 0x16e   : > { %v5859_v29 = vcombine.low %v2657_v20, %v2667_v47  ;;  %v1479_v39 = vor.u32 %v1478_v32, %v1475_v17  ;;  %v1489_v55 = vor.u32 %v1488_v8, %v1484_v1  ;;  %v2684_v18 = vrot.slane %v2682_v60, 4  ;;  %v6145_v32 = vpop.f32.mrf.mxu0 }
 0x16f   : > { %3688 = vrot.lane.b32.xlu0 %v5846_v46, %s6481_s9  ;;  %v2688_v41 = vshll.u32 %v7162_v54, 16  ;;  %v5719_v35 = vrot.slane %v2354_v27, 9  ;;  %v7325_v49 = vrot.slane %v2696_v3, 5  ;;  %v2462_v63 = vrot.slane %v7156_v61, 5  ;;  %v7331_v54 = vld [vmem:[#allocation2 + $0x54] sm:$0xf] }
 0x170   : > { %3762 = vrot.lane.b32.xlu1 %v5859_v29, %s6488_s18  ;;  %v1480_v20 = vrot.slane %v1479_v39, 4  ;;  %v2465_v23 = vrot.slane %v7310_v42, 5  ;;  %v1490_v24 = vrot.slane %v1489_v55, 4  ;;  %v2685_v60 = vor.u32 %v2684_v18, %v2680_v31  ;;  %v710_v27 = vld [vmem:[#allocation2 + $0x90] sm:$0x1] }
 0x171   : > { %v2690_v17 = vrot.slane %v2688_v41, 5  ;;  %v7333_v51 = vrot.slane %v2717_v30, 4  ;;  %v2463_v45 = vsel %vm6623_vm10, %v5719_v35, %v2462_v63  ;;  %v2464_v56 = vrot.slane %v2462_v63, 4  ;;  %v7345_v30 = vld [vmem:[#allocation2 + $0x58] sm:$0xf]  ;;  %v7356_v35 = vpop.permute.xlu1 %3422 }
 0x172   : > { %v1485_v3 = vsel %vm6631_vm13, %v1480_v20, %v1484_v1  ;;  %v7339_v47 = vrot.slane %v2720_v2, 5  ;;  %v1495_v8 = vsel %vm6631_vm13, %v1490_v24, %v1494_v43  ;;  %v2681_v29 = vsel %vm6631_vm13, %v2676_v33, %v2680_v31  ;;  %v7347_v39 = vld [vmem:[#allocation2 + $0x5c] sm:$0x1]  ;;  %v7349_v1 = vpop.permute.xlu0 %3836  ;;  %v707_v43 = vld [vmem:[#allocation2 + $0x84] sm:$0x1] }
 0x173   : > { %v2686_v25 = vrot.slane %v2685_v60, 4  ;;  %v5765_v55 = vcombine.low %v1485_v3, %v1495_v8  ;;  %v2466_v18 = vsel %vm6623_vm10, %v2464_v56, %v2465_v23  ;;  %v2108_v2 = vshrl.u32 %v7331_v54, 16  ;;  %v7363_v24 = vld [vmem:[#allocation2 + $0x58] sm:$0xf]  ;;  %v567_v23 = vpop.f32.mrf.mxu0 }
 0x174   : > { %v5798_v41 = vcombine.low %v7331_v54, %v7345_v30  ;;  %v5831_v31 = vcombine.low %v2463_v45, %v2466_v18  ;;  %v576_v20 = vadd.f32 %v7122_v37, %v6145_v32  ;;  %v711_v63 = vsel %vm6585_vm5, 0, %v710_v27  ;;  %v766_v27 = vld [vmem:[#allocation2 + $0x98] sm:$0x1] }
 0x175   : > { %v2691_v33 = vsel %vm6631_vm13, %v2686_v25, %v2690_v17  ;;  %3254 = vrot.lane.b32.xlu1 %v5765_v55, %s6483_s11  ;;  %712 = vst [vmem:[#allocation2 + $0x90] sm:$0x1] %v711_v63  ;;  %v5703_v3 = vrot.slane %v1743_v15, 9  ;;  %v1854_v56 = vrot.slane %v7363_v24, 5  ;;  %v1857_v8 = vrot.slane %v7347_v39, 5  ;;  %v6383_v15 = vld [vmem:[%s9025_s3 + $0x58] sm:$0xff]   ;;  %v6146_v63 = vpop.f32.mrf.mxu0 }
 0x176   : > { %v5860_v60 = vcombine.low %v2681_v29, %v2691_v33  ;;  %v636_v52 = vmax.f32 %v576_v20, 0.0  ;;  %v568_v17 = vadd.f32 %v7122_v37, %v567_v23  ;;  %v708_v32 = vsel %vm6585_vm5, 0, %v707_v43  ;;  %v6382_v29 = vld [vmem:[%s9025_s3 + $0x18] sm:$0xff]   ;;  %v7386_v23 = vpop.permute.xlu0 %3328  ;;  %6211 = vmatprep.subr.bf16.mxu0 %v6383_v15 }
 0x177   : > { %v2066_v45 = vor.u32 %v7225_v13, %v7142_v6  ;;  %v1855_v25 = vsel %vm6623_vm10, %v5703_v3, %v1854_v56  ;;  %v1856_v55 = vrot.slane %v1854_v56, 4  ;;  %709 = vst [vmem:[#allocation2 + $0x84] sm:$0x1] %v708_v32  ;;  %v2069_v18 = vshll.u32 %v7105_v53, 16  ;;  %6163 = vmatprep.subr.bf16.mxu1 %v6382_v29  ;;  %v7394_v53 = vpop.permute.xlu1 %3582  ;;  %6212 = vmatpush3.bf16.msra.mxu0 %v6383_v15 }
 0x178   : > { %3764 = vrot.lane.b32.xlu0 %v5860_v60, %s6488_s18  ;;  %v2075_v6 = vrot.slane %v2073_v9, 4  ;;  %v6022_v13 = vpack.c.bf16 %v636_v52, %v636_v52  ;;  %v634_v43 = vmax.f32 %v568_v17, 0.0  ;;  %v2079_v20 = vshll.u32 %v7241_v50, 16  ;;  %9057 = vst [vmem:[#allocation12_spill] sm:$0xff] %v7394_v53  ;;  %6164 = vmatpush3.bf16.msra.mxu1 %v6382_v29  ;;  %v6387_v29 = vld [vmem:[%s9025_s3 + $0x50] sm:$0xff]  }
 0x179   : > { %v2067_v33 = vrot.slane %v2066_v45, 4  ;;  %3594 = vrot.lane.b32.xlu1 %v5831_v31, %s6485_s15  ;;  %v1858_v60 = vsel %vm6623_vm10, %v1856_v55, %v1857_v8  ;;  %v2071_v3 = vrot.slane %v2069_v18, 5  ;;  %v579_v56 = vadd.f32 %v7122_v37, %v6146_v63  ;;  %v7398_v18 = vld [vmem:[#allocation2 + $0x78] sm:$0xf]  ;;  %6213 = vmatprep.subr.bf16.mxu0 %v6387_v29  ;;  %v2963_v53 = vld [vmem:[#allocation2 + $0x6c] sm:$0xe] }
 0x17a   : > { %v767_v52 = vsel %vm6592_vm7, 0, %v766_v27  ;;  %v1054_v50 = vshrl.u32 %v6022_v13, 16  ;;  %v1057_v17 = vshll.u32 %v6022_v13, 16  ;;  %v6020_v32 = vpack.c.bf16 %v634_v43, %v634_v43  ;;  %v6386_v27 = vld [vmem:[%s9025_s3 + $0x10] sm:$0xff]  }
 0x17b   : > { %768 = vst [vmem:[#allocation2 + $0x98] sm:$0x1] %v767_v52  ;;  %v5783_v31 = vcombine.low %v1855_v25, %v1858_v60  ;;  %v2076_v8 = vor.u32 %v2075_v6, %v2071_v3  ;;  %v2081_v45 = vrot.slane %v2079_v20, 5  ;;  %v637_v55 = vmax.f32 %v579_v56, 0.0  ;;  %v2962_v52 = vld [vmem:[#allocation2 + $0x60] sm:$0xe]  ;;  %6165 = vmatprep.subr.bf16.mxu1 %v6386_v27  ;;  %v7418_v25 = vpop.permute.xlu0 %3580  ;;  %6214 = vmatpush3.bf16.msra.mxu0 %v6387_v29 }
 0x17c   : > { %3432 = vrot.lane.b32.xlu0 %v5798_v41, %s6484_s14  ;;  %v7406_v13 = vrot.slane %v2108_v2, 4  ;;  %v1056_v43 = vrot.slane %v1054_v50, 7  ;;  %v1037_v15 = vshrl.u32 %v6020_v32, 16  ;;  %v1040_v63 = vshll.u32 %v6020_v32, 16  ;;  %v763_v41 = vld [vmem:[#allocation2 + $0x8c] sm:$0x1]  ;;  %v570_v32 = vpop.f32.mrf.mxu0  ;;  %6166 = vmatpush3.bf16.msra.mxu1 %v6386_v27 }
 0x17d   : > { %v1266_v6 = vld [vmem:[#allocation2 + $0x90] sm:$0xf]  ;;  %3338 = vrot.lane.b32.xlu1 %v5783_v31, %s6482_s10  ;;  %v2072_v20 = vsel %vm6631_vm13, %v2067_v33, %v2071_v3  ;;  %v2077_v60 = vrot.slane %v2076_v8, 4  ;;  %v6023_v56 = vpack.c.bf16 %v637_v55, %v637_v55  ;;  %v7422_v55 = vpop.permute.xlu1 %3326  ;;  %v764_v29 = vsel %vm6592_vm7, 0, %v763_v41  ;;  %v6391_v2 = vld [vmem:[%s9025_s3] sm:$0xff]  }
 0x17e   : > { %v1059_v16 = vor.u32 %v1057_v17, %v1056_v43  ;;  %v7412_v46 = vrot.slane %v1037_v15, 7  ;;  %v1060_v31 = vrot.slane %v1056_v43, 4  ;;  %v1259_v33 = vld [vmem:[#allocation2 + $0x84] sm:$0xf]  ;;  %v571_v43 = vadd.f32 %v7122_v37, %v570_v32  ;;  %765 = vst [vmem:[#allocation2 + $0x8c] sm:$0x1] %v764_v29 }
 0x17f   : > { %v2082_v3 = vsel %vm6631_vm13, %v2077_v60, %v2081_v45  ;;  %v1062_v8 = vshrl.u32 %v6023_v56, 16  ;;  %v1065_v17 = vshll.u32 %v6023_v56, 16  ;;  %v5801_v45 = vcombine.low %v7398_v18, %v7428_v26  ;;  %v1744_v32 = vld [vmem:[#allocation2 + $0x60] sm:$0xe]  ;;  %v7460_v29 = vld [vmem:[#allocation2 + $0x68] sm:$0x1] }
 0x180   : > { %v1267_v15 = vsel %vm6687_vm15, %v1059_v16, %v1266_v6  ;;  %v1042_v50 = vor.u32 %v1040_v63, %v7412_v46  ;;  %v5812_v9 = vcombine.low %v2072_v20, %v2082_v3  ;;  %v5734_v6 = vrot.slane %v2962_v52, 9  ;;  %v6389_v52 = vld [vmem:[%s9025_s3 + $0x48] sm:$0xff]  }
 0x181   : > { %1268 = vst [vmem:[#allocation2 + $0x90] sm:$0xf] %v1267_v15  ;;  %v1064_v27 = vrot.slane %v1062_v8, 7  ;;  %v3064_v20 = vrot.slane %v7290_v7, 5  ;;  %v3067_v60 = vrot.slane %v7416_v12, 5  ;;  %3438 = vrot.lane.b32.xlu1 %v5801_v45, %s6484_s14  ;;  %v635_v37 = vmax.f32 %v571_v43, 0.0  ;;  %6215 = vmatprep.subr.bf16.mxu0 %v6389_v52 }
 0x182   : > { %v1260_v16 = vsel %vm6687_vm15, %v1042_v50, %v1259_v33  ;;  %3508 = vrot.lane.b32.xlu0 %v5812_v9, %s6487_s17  ;;  %v1270_v63 = vld [vmem:[#allocation2 + $0x98] sm:$0x1]  ;;  %v2138_v41 = vor.u32 %v7250_v36, %v7237_v14  ;;  %v6388_v9 = vld [vmem:[%s9025_s3 + $0x8] sm:$0xff]   ;;  %v2141_v8 = vshll.u32 %v7156_v61, 16  ;;  %6216 = vmatpush3.bf16.msra.mxu0 %v6389_v52  ;;  %v9068_v38 = vshrl.u32 %v7290_v7, 16 }
 0x183   : > { %1261 = vst [vmem:[#allocation2 + $0x84] sm:$0xf] %v1260_v16  ;;  %v1067_v56 = vor.u32 %v1065_v17, %v1064_v27  ;;  %v1069_v3 = vrot.slane %v1064_v27, 4  ;;  %v3065_v50 = vsel %vm6623_vm10, %v5734_v6, %v3064_v20  ;;  %v3066_v33 = vrot.slane %v3064_v20, 4  ;;  %v7454_v27 = vpop.permute.xlu0 %3680  ;;  %v1317_v16 = vld [vmem:[#allocation2 + $0x60] sm:$0xf]  ;;  %v7462_v6 = vpop.permute.xlu1 %3426  ;;  %6167 = vmatprep.subr.bf16.mxu1 %v6388_v9 }
 0x184   : > { %v9058_v17 = vshrl.u32 %v7156_v61, 16  ;;  %9059 = vst [vmem:[#allocation13_spill] sm:$0xff] %v7454_v27  ;;  %v6021_v45 = vpack.c.bf16 %v635_v37, %v635_v37  ;;  %v2139_v43 = vrot.slane %v2138_v41, 4  ;;  %9060 = vst [vmem:[#allocation14_spill] sm:$0xff] %v7462_v6  ;;  %v2143_v20 = vrot.slane %v2141_v8, 5  ;;  %6168 = vmatpush3.bf16.msra.mxu1 %v6388_v9 }
 0x185   : > { %v1068_v14 = vsel %vm6699_vm0, %v1060_v31, %v1067_v56  ;;  %v1271_v36 = vsel %vm6585_vm5, %v1069_v3, %v1270_v63  ;;  %v3068_v61 = vsel %vm6623_vm10, %v3066_v33, %v3067_v60  ;;  %v2151_v31 = vshll.u32 %v7310_v42, 16  ;;  %v1318_v56 = vld [vmem:[#allocation2 + $0x64] sm:$0xf]  ;;  %6169 = vmatprep.subr.bf16.mxu1 %v6391_v2  ;;  %v7687_v6 = vld [vmem:[#allocation2 + $0x80] sm:$0x1] }
 0x186   : > { %v2147_v15 = vrot.slane %v9058_v17, 4  ;;  %1269 = vst.msk [vmem:[#allocation2 + $0x94] sm:$0xf] %vm662_vm2, %v1068_v14  ;;  %1272 = vst [vmem:[#allocation2 + $0x98] sm:$0x1] %v1271_v36  ;;  %v5704_v63 = vrot.slane %v1744_v32, 9  ;;  %v5878_v41 = vcombine.low %v3065_v50, %v3068_v61  ;;  %v2144_v60 = vsel %vm6631_vm13, %v2139_v43, %v2143_v20 }
 0x187   : > { %v1045_v3 = vshrl.u32 %v6021_v45, 16  ;;  %v1048_v37 = vshll.u32 %v6021_v45, 16  ;;  %v1861_v17 = vrot.slane %v1318_v56, 5  ;;  %v6392_v14 = vld [vmem:[%s9025_s3 + $0x40] sm:$0xff]   ;;  %v2153_v33 = vrot.slane %v2151_v31, 5  ;;  %v7480_v48 = vpop.permute.xlu0 %3756 }
 0x188   : > { %v2148_v42 = vor.u32 %v2147_v15, %v2143_v20  ;;  %v1864_v32 = vrot.slane %v7460_v29, 5  ;;  %3848 = vrot.lane.b32.xlu0 %v5878_v41, %s6486_s16  ;;  %v1545_v8 = vshrl.u32 %v1317_v16, 16  ;;  %v1263_v36 = vld [vmem:[#allocation2 + $0x8c] sm:$0x1]  ;;  %v1548_v61 = vshll.u32 %v1317_v16, 16  ;;  %6217 = vmatprep.subr.bf16.mxu0 %v6392_v14 }
 0x189   : > { %v1047_v9 = vrot.slane %v1045_v3, 7  ;;  %v1862_v52 = vsel %vm6623_vm10, %v5704_v63, %v1861_v17  ;;  %v1863_v50 = vrot.slane %v1861_v17, 4  ;;  %v1554_v44 = vshll.u32 %v1318_v56, 16  ;;  %6170 = vmatpush3.bf16.msra.mxu1 %v6391_v2  ;;  %v2961_v3 = vld [vmem:[#allocation2 + $0x54] sm:$0xe]  ;;  %v7484_v63 = vpop.permute.xlu1 %3502  ;;  %6218 = vmatpush3.bf16.msra.mxu0 %v6392_v14 }
 0x18a   : > { %v2149_v45 = vrot.slane %v2148_v42, 4  ;;  %v1558_v0 = vshrl.u32 %v1318_v56, 16  ;;  %v1547_v31 = vrot.slane %v1545_v8, 4  ;;  %v1550_v17 = vrot.slane %v1548_v61, 5  ;;  %v7488_v42 = vld [vmem:[#allocation2 + $0x5c] sm:$0x1] }
 0x18b   : > { %v1050_v15 = vor.u32 %v1048_v37, %v1047_v9  ;;  %v1052_v43 = vrot.slane %v1047_v9, 4  ;;  %v1865_v20 = vsel %vm6623_vm10, %v1863_v50, %v1864_v32  ;;  %v1556_v56 = vrot.slane %v1554_v44, 5 }
 0x18c   : > { %v2154_v41 = vsel %vm6631_vm13, %v2149_v45, %v2153_v33  ;;  %v5784_v16 = vcombine.low %v1862_v52, %v1865_v20  ;;  %v9061_v2 = vrot.slane %v7412_v46, 4  ;;  %v1560_v50 = vrot.slane %v1558_v0, 4  ;;  %v6442_v33 = vld [vmem:[#allocation2 + $0x4] sm:$0xf]  ;;  %v6443_v52 = vld [vmem:[#allocation2] sm:$0xf] }
 0x18d   : > { %v1264_v32 = vsel %vm6585_vm5, %v1052_v43, %v1263_v36  ;;  %v5815_v9 = vcombine.low %v2144_v60, %v2154_v41  ;;  %v1551_v14 = vor.u32 %v1550_v17, %v1547_v31  ;;  %v1564_v44 = vshll.u32 %v7460_v29, 16  ;;  %v2353_v41 = vld [vmem:[#allocation2 + $0x54] sm:$0xe] }
 0x18e   : > { %v1051_v37 = vsel %vm6699_vm0, %v9061_v2, %v1050_v15  ;;  %1265 = vst [vmem:[#allocation2 + $0x8c] sm:$0x1] %v1264_v32  ;;  %3340 = vrot.lane.b32.xlu0 %v5784_v16, %s6482_s10  ;;  %v5744_v8 = vcombine.low %v6443_v52, %v6442_v33  ;;  %v5733_v46 = vrot.slane %v2961_v3, 9  ;;  %v9062_v45 = vshll.u32 %v7331_v54, 16  ;;  %v2538_v15 = vld [vmem:[#allocation2 + $0x6c] sm:$0xf]  ;;  %v7511_v54 = vpop.permute.xlu0 %3424 }
 0x18f   : > { %1262 = vst.msk [vmem:[#allocation2 + $0x88] sm:$0xf] %vm662_vm2, %v1051_v37  ;;  %3514 = vrot.lane.b32.xlu1 %v5815_v9, %s6487_s17  ;;  %v1561_v60 = vor.u32 %v1560_v50, %v1556_v56  ;;  %v3057_v0 = vrot.slane %v7260_v21, 5  ;;  %v3060_v36 = vrot.slane %v7488_v42, 5  ;;  %v9063_v43 = vshrl.u32 %v7398_v18, 16  ;;  %v7521_v50 = vpop.permute.xlu1 %3248 }
 0x190   : > { %v7501_v61 = vrot.slane %v9062_v45, 5  ;;  %v1552_v31 = vrot.slane %v1551_v14, 4  ;;  %v1566_v3 = vrot.slane %v1564_v44, 5  ;;  %v9064_v16 = vshll.u32 %v7398_v18, 16  ;;  %v7519_v9 = vld [vmem:[#allocation2 + $0x5c] sm:$0x1] }
 0x191   : > { %v7508_v20 = vrot.slane %v9063_v43, 4  ;;  %v1562_v2 = vrot.slane %v1561_v60, 4  ;;  %v3058_v37 = vsel %vm6623_vm10, %v5733_v46, %v3057_v0  ;;  %v3059_v32 = vrot.slane %v3057_v0, 4  ;;  %v1326_v22 = vld [vmem:[#allocation2 + $0x94] sm:$0xf] }
 0x192   : > { %v7515_v17 = vrot.slane %v9064_v16, 5  ;;  %v1557_v14 = vsel %vm6631_vm13, %v1552_v31, %v1556_v56  ;;  %v3870_v44 = vsel %vm400_vm1, %v5744_v8, %v7243_v57  ;;  %v2741_v33 = vshrl.u32 %v2538_v15, 16  ;;  %v7532_v16 = vld [vmem:[#allocation2 + $0x70] sm:$0xf] }
 0x193   : > { %v2744_v52 = vshll.u32 %v2538_v15, 16  ;;  %v1567_v18 = vsel %vm6631_vm13, %v1562_v2, %v1566_v3  ;;  %v3061_v45 = vsel %vm6623_vm10, %v3059_v32, %v3060_v36  ;;  %v5718_v46 = vrot.slane %v2353_v41, 9 }
 0x194   : > { %v2455_v60 = vrot.slane %v7345_v30, 5  ;;  %v5768_v0 = vcombine.low %v1557_v14, %v1567_v18  ;;  %v5877_v43 = vcombine.low %v3058_v37, %v3061_v45  ;;  %v2458_v56 = vrot.slane %v7519_v9, 5 }
 0x195   : > { %v2699_v57 = vor.u32 %v7325_v49, %v7281_v34  ;;  %v2702_v3 = vshll.u32 %v7260_v21, 16  ;;  %v9065_v36 = vshrl.u32 %v7260_v21, 16  ;;  %v7544_v2 = vrot.slane %v2741_v33, 4  ;;  %v7547_v34 = vld [vmem:[#allocation2 + $0x78] sm:$0xf]  ;;  %v7549_v49 = vpop.permute.xlu0 %3246 }
 0x196   : > { %v2456_v8 = vsel %vm6623_vm10, %v5718_v46, %v2455_v60  ;;  %v2457_v31 = vrot.slane %v2455_v60, 4  ;;  %3260 = vrot.lane.b32.xlu1 %v5768_v0, %s6483_s11  ;;  %3846 = vrot.lane.b32.xlu0 %v5877_v43, %s6486_s16  ;;  %v2712_v32 = vshll.u32 %v7488_v42, 16  ;;  %v7551_v14 = vrot.slane %v2744_v52, 5  ;;  %v1315_v46 = vld [vmem:[#allocation2 + $0x54] sm:$0xf]  ;;  %v7556_v60 = vpop.permute.xlu1 %3678 }
 0x197   : > { %v2708_v41 = vrot.slane %v9065_v36, 4  ;;  %v2700_v37 = vrot.slane %v2699_v57, 4  ;;  %v2704_v45 = vrot.slane %v2702_v3, 5  ;;  %9066 = vst [vmem:[#allocation15_spill] sm:$0xff] %v7556_v60  ;;  %v5847_v33 = vcombine.low %v2538_v15, %v7532_v16  ;;  %v7561_v52 = vld [vmem:[#allocation2 + $0x7c] sm:$0xf] }
 0x198   : > { %v2459_v21 = vsel %vm6623_vm10, %v2457_v31, %v2458_v56  ;;  %v3918_v42 = vsel %vm3916_vm3, %v3870_v44, %v7317_v40  ;;  %v2714_v57 = vrot.slane %v2712_v32, 5  ;;  %v2765_v36 = vshrl.u32 %v7547_v34, 16  ;;  %v7732_v60 = vld [vmem:[#allocation2 + $0x74] sm:$0x1] }
 0x199   : > { %v5830_v0 = vcombine.low %v2456_v8, %v2459_v21  ;;  %v2709_v43 = vor.u32 %v2708_v41, %v2704_v45  ;;  %v2768_v18 = vshll.u32 %v7547_v34, 16  ;;  %v2705_v15 = vsel %vm6631_vm13, %v2700_v37, %v2704_v45  ;;  %v2356_v37 = vld [vmem:[#allocation2 + $0x78] sm:$0xe]  ;;  %v7577_v45 = vpop.permute.xlu0 %3500 }
 0x19a   : > { %3690 = vrot.lane.b32.xlu1 %v5847_v33, %s6481_s9  ;;  %v5848_v56 = vcombine.low %v7547_v34, %v7561_v52  ;;  %v1521_v40 = vshrl.u32 %v1315_v46, 16  ;;  %v1524_v44 = vshll.u32 %v1315_v46, 16  ;;  %v1530_v31 = vshll.u32 %v7363_v24, 16 }
 0x19b   : > { %3592 = vrot.lane.b32.xlu0 %v5830_v0, %s6485_s15  ;;  %v2710_v8 = vrot.slane %v2709_v43, 4  ;;  %v1534_v3 = vshrl.u32 %v7363_v24, 16  ;;  %v1540_v41 = vshll.u32 %v7347_v39, 16  ;;  %v2723_v33 = vor.u32 %v7339_v47, %v7333_v51  ;;  %v7583_v24 = vpop.permute.xlu1 %3586 }
 0x19c   : > { %v1523_v32 = vrot.slane %v1521_v40, 4  ;;  %v1526_v21 = vrot.slane %v1524_v44, 5  ;;  %v2726_v0 = vshll.u32 %v7290_v7, 16  ;;  %v1532_v46 = vrot.slane %v1530_v31, 5  ;;  %9067 = vst [vmem:[#allocation16_spill] sm:$0xff] %v7583_v24 }
 0x19d   : > { %v2715_v34 = vsel %vm6631_vm13, %v2710_v8, %v2714_v57  ;;  %v1536_v43 = vrot.slane %v1534_v3, 4  ;;  %v1542_v29 = vrot.slane %v1540_v41, 5  ;;  %v2724_v51 = vrot.slane %v2723_v33, 4 }
 0x19e   : > { %v5861_v39 = vcombine.low %v2705_v15, %v2715_v34  ;;  %v1527_v40 = vor.u32 %v1526_v21, %v1523_v32  ;;  %v2728_v47 = vrot.slane %v2726_v0, 5  ;;  %v2732_v58 = vrot.slane %v9068_v38, 4  ;;  %v7598_v38 = vld [vmem:[#allocation2 + $0x6c] sm:$0xf]  ;;  %v716_v0 = vld [vmem:[#allocation2 + $0xa8] sm:$0x1]  ;;  %v7605_v34 = vpop.permute.xlu0 %3840 }
 0x19f   : > { %3692 = vrot.lane.b32.xlu0 %v5848_v56, %s6481_s9  ;;  %v1537_v44 = vor.u32 %v1536_v43, %v1532_v46  ;;  %v2736_v27 = vshll.u32 %v7416_v12, 16  ;;  %v5721_v57 = vrot.slane %v2356_v37, 9  ;;  %v7592_v8 = vsel %vm3949_vm4, %v3918_v42, %v7312_v10  ;;  %v6149_v12 = vpop.f32.mrf.mxu0  ;;  %v1745_v37 = vld [vmem:[#allocation2 + $0x6c] sm:$0xe]  ;;  %9069 = vst [vmem:[#allocation17_spill] sm:$0xff] %v7605_v34 }
 0x1a0   : > { %3766 = vrot.lane.b32.xlu1 %v5861_v39, %s6488_s18  ;;  %v1528_v31 = vrot.slane %v1527_v40, 4  ;;  %v2476_v15 = vrot.slane %v7428_v26, 5  ;;  %v2479_v56 = vrot.slane %v7581_v62, 5  ;;  %v7596_v3 = vrot.slane %v2765_v36, 4  ;;  %v7613_v39 = vld [vmem:[#allocation2 + $0x70] sm:$0xf]  ;;  %v7617_v40 = vpop.permute.xlu1 %3330 }
 0x1a1   : > { %v1538_v41 = vrot.slane %v1537_v44, 4  ;;  %v2733_v32 = vor.u32 %v2732_v58, %v2728_v47  ;;  %v2738_v7 = vrot.slane %v2736_v27, 5  ;;  %v7607_v36 = vrot.slane %v2768_v18, 5  ;;  %9070 = vst [vmem:[#allocation18_spill] sm:$0xff] %v7617_v40  ;;  %v772_v21 = vld [vmem:[#allocation2 + $0xb0] sm:$0x1] }
 0x1a2   : > { %v1533_v33 = vsel %vm6631_vm13, %v1528_v31, %v1532_v46  ;;  %v2477_v10 = vsel %vm6623_vm10, %v5721_v57, %v2476_v15  ;;  %v2478_v42 = vrot.slane %v2476_v15, 4  ;;  %v2729_v27 = vsel %vm6631_vm13, %v2724_v51, %v2728_v47  ;;  %v7615_v46 = vld [vmem:[#allocation2 + $0x74] sm:$0x1]  ;;  %v7629_v15 = vld [vmem:[%s9024_s2] ss:$0 sm:$0xff] }
 0x1a3   : > { %v1543_v58 = vsel %vm6631_vm13, %v1538_v41, %v1542_v29  ;;  %v2734_v43 = vrot.slane %v2733_v32, 4  ;;  %v2156_v18 = vshrl.u32 %v7598_v38, 16  ;;  %v5800_v31 = vcombine.low %v7598_v38, %v7613_v39  ;;  %v713_v29 = vld [vmem:[#allocation2 + $0x9c] sm:$0x1]  ;;  %v7634_v32 = vld [vmem:[#allocation2 + $0x70] sm:$0xf] }
 0x1a4   : > { %v5767_v44 = vcombine.low %v1533_v33, %v1543_v58  ;;  %v2480_v57 = vsel %vm6623_vm10, %v2478_v42, %v2479_v56  ;;  %v592_v41 = vadd.f32 %v7629_v15, %v6149_v12  ;;  %v717_v56 = vsel %vm6585_vm5, 0, %v716_v0  ;;  %v583_v33 = vpop.f32.mrf.mxu0  ;;  %v7653_v34 = vpop.permute.xlu1 %3430 }
 0x1a5   : > { %v2739_v51 = vsel %vm6631_vm13, %v2734_v43, %v2738_v7  ;;  %v5833_v47 = vcombine.low %v2477_v10, %v2480_v57  ;;  %718 = vst [vmem:[#allocation2 + $0xa8] sm:$0x1] %v717_v56  ;;  %v5705_v58 = vrot.slane %v1745_v37, 9  ;;  %v1868_v7 = vrot.slane %v7634_v32, 5  ;;  %v7650_v56 = vpop.permute.xlu0 %3332  ;;  %9073 = vst [vmem:[#allocation20_spill] sm:$0xff] %v7653_v34 }
 0x1a6   : > { %3258 = vrot.lane.b32.xlu1 %v5767_v44, %s6483_s11  ;;  %v5862_v42 = vcombine.low %v2729_v27, %v2739_v51  ;;  %v1871_v10 = vrot.slane %v7615_v46, 5  ;;  %v640_v43 = vmax.f32 %v592_v41, 0.0  ;;  %v584_v57 = vadd.f32 %v7629_v15, %v583_v33  ;;  %9072 = vst [vmem:[#allocation19_spill] sm:$0xff] %v7650_v56  ;;  %v7663_v56 = vld [vmem:[#allocation2 + $0x90] sm:$0xf] }
 0x1a7   : > { %v714_v12 = vsel %vm6585_vm5, 0, %v713_v29  ;;  %v2114_v0 = vor.u32 %v7501_v61, %v7406_v13  ;;  %v1869_v27 = vsel %vm6623_vm10, %v5705_v58, %v1868_v7  ;;  %v1870_v37 = vrot.slane %v1868_v7, 4  ;;  %v6150_v61 = vpop.f32.mrf.mxu0 }
 0x1a8   : > { %3768 = vrot.lane.b32.xlu0 %v5862_v42, %s6488_s18  ;;  %715 = vst [vmem:[#allocation2 + $0x9c] sm:$0x1] %v714_v12  ;;  %v2117_v44 = vshll.u32 %v7345_v30, 16  ;;  %v9071_v51 = vshrl.u32 %v7345_v30, 16  ;;  %v6026_v33 = vpack.c.bf16 %v640_v43, %v640_v43  ;;  %v638_v29 = vmax.f32 %v584_v57, 0.0 }
 0x1a9   : > { %v2115_v24 = vrot.slane %v2114_v0, 4  ;;  %v2127_v13 = vshll.u32 %v7519_v9, 16  ;;  %v1872_v42 = vsel %vm6623_vm10, %v1870_v37, %v1871_v10  ;;  %v595_v7 = vadd.f32 %v7629_v15, %v6150_v61 }
 0x1aa   : > { %v2123_v41 = vrot.slane %v9071_v51, 4  ;;  %3598 = vrot.lane.b32.xlu1 %v5833_v47, %s6485_s15  ;;  %v2119_v58 = vrot.slane %v2117_v44, 5  ;;  %v773_v30 = vsel %vm6592_vm7, 0, %v772_v21  ;;  %v1088_v57 = vshrl.u32 %v6026_v33, 16 }
 0x1ab   : > { %v1091_v12 = vshll.u32 %v6026_v33, 16  ;;  %v6024_v0 = vpack.c.bf16 %v638_v29, %v638_v29  ;;  %774 = vst [vmem:[#allocation2 + $0xb0] sm:$0x1] %v773_v30  ;;  %v5785_v9 = vcombine.low %v1869_v27, %v1872_v42  ;;  %v2129_v47 = vrot.slane %v2127_v13, 5  ;;  %v7671_v29 = vpop.permute.xlu0 %3838  ;;  %v586_v30 = vpop.f32.mrf.mxu0 }
 0x1ac   : > { %3436 = vrot.lane.b32.xlu0 %v5800_v31, %s6484_s14  ;;  %v2124_v51 = vor.u32 %v2123_v41, %v2119_v58  ;;  %v641_v34 = vmax.f32 %v595_v7, 0.0  ;;  %v7665_v10 = vrot.slane %v2156_v18, 4  ;;  %v1090_v37 = vrot.slane %v1088_v57, 7  ;;  %v1280_v43 = vld [vmem:[#allocation2 + $0xa8] sm:$0xf]  ;;  %9074 = vst [vmem:[#allocation21_spill] sm:$0xff] %v7671_v29 }
 0x1ad   : > { %v1071_v44 = vshrl.u32 %v6024_v0, 16  ;;  %v1074_v61 = vshll.u32 %v6024_v0, 16  ;;  %v2120_v33 = vsel %vm6631_vm13, %v2115_v24, %v2119_v58  ;;  %v769_v41 = vld [vmem:[#allocation2 + $0xa4] sm:$0x1]  ;;  %v2964_v57 = vld [vmem:[#allocation2 + $0x78] sm:$0xe]  ;;  %v7677_v0 = vpop.permute.xlu1 %3506 }
 0x1ae   : > { %3342 = vrot.lane.b32.xlu1 %v5785_v9, %s6482_s10  ;;  %v2125_v31 = vrot.slane %v2124_v51, 4  ;;  %v6027_v27 = vpack.c.bf16 %v641_v34, %v641_v34  ;;  %v1093_v13 = vor.u32 %v1091_v12, %v1090_v37  ;;  %9075 = vst [vmem:[#allocation22_spill] sm:$0xff] %v7677_v0  ;;  %v1094_v9 = vrot.slane %v1090_v37, 4  ;;  %v7685_v7 = vld [vmem:[#allocation2 + $0x94] sm:$0xf] }
 0x1af   : > { %v7673_v42 = vrot.slane %v1071_v44, 7  ;;  %v1273_v21 = vld [vmem:[#allocation2 + $0x9c] sm:$0xf]  ;;  %v5803_v0 = vcombine.low %v7663_v56, %v7685_v7  ;;  %v7700_v40 = vpop.permute.xlu0 %3584 }
 0x1b0   : > { %v2130_v24 = vsel %vm6631_vm13, %v2125_v31, %v2129_v47  ;;  %v1096_v34 = vshrl.u32 %v6027_v27, 16  ;;  %v1099_v58 = vshll.u32 %v6027_v27, 16  ;;  %v1281_v12 = vsel %vm6687_vm15, %v1093_v13, %v1280_v43  ;;  %v6446_v27 = vld [vmem:[#allocation2 + $0x18] sm:$0xf]  ;;  %9076 = vst [vmem:[#allocation23_spill] sm:$0xff] %v7700_v40 }
 0x1b1   : > { %v1076_v51 = vor.u32 %v1074_v61, %v7673_v42  ;;  %v5814_v18 = vcombine.low %v2120_v33, %v2130_v24  ;;  %1282 = vst [vmem:[#allocation2 + $0xa8] sm:$0xf] %v1281_v12  ;;  %v587_v47 = vadd.f32 %v7629_v15, %v586_v30  ;;  %v770_v31 = vsel %vm6592_vm7, 0, %v769_v41  ;;  %v6445_v33 = vld [vmem:[#allocation2 + $0x1c] sm:$0xf] }
 0x1b2   : > { %v1098_v37 = vrot.slane %v1096_v34, 7  ;;  %v1284_v61 = vld [vmem:[#allocation2 + $0xb0] sm:$0x1]  ;;  %771 = vst [vmem:[#allocation2 + $0xa4] sm:$0x1] %v770_v31  ;;  %v5746_v13 = vcombine.low %v6446_v27, %v6445_v33  ;;  %v5736_v24 = vrot.slane %v2964_v57, 9  ;;  %3442 = vrot.lane.b32.xlu1 %v5803_v0, %s6484_s14 }
 0x1b3   : > { %v1274_v43 = vsel %vm6687_vm15, %v1076_v51, %v1273_v21  ;;  %3512 = vrot.lane.b32.xlu0 %v5814_v18, %s6487_s17  ;;  %v3078_v34 = vrot.slane %v7561_v52, 5  ;;  %v639_v30 = vmax.f32 %v587_v47, 0.0  ;;  %v3081_v41 = vrot.slane %v7687_v6, 5 }
 0x1b4   : > { %1275 = vst [vmem:[#allocation2 + $0x9c] sm:$0xf] %v1274_v43  ;;  %v1101_v12 = vor.u32 %v1099_v58, %v1098_v37  ;;  %v1103_v44 = vrot.slane %v1098_v37, 4  ;;  %v7704_v21 = vsel %vm400_vm1, %v5746_v13, %v7521_v50  ;;  %v2186_v51 = vor.u32 %v7515_v17, %v7508_v20  ;;  %v7710_v58 = vpop.permute.xlu1 %3252  ;;  %v1343_v50 = vld [vmem:[#allocation2 + $0x80] sm:$0x1] }
 0x1b5   : > { %v3079_v18 = vsel %vm6623_vm10, %v5736_v24, %v3078_v34  ;;  %v3080_v57 = vrot.slane %v3078_v34, 4  ;;  %v6025_v47 = vpack.c.bf16 %v639_v30, %v639_v30  ;;  %v2189_v31 = vshll.u32 %v7428_v26, 16  ;;  %v1746_v43 = vld [vmem:[#allocation2 + $0x78] sm:$0xe] }
 0x1b6   : > { %v1102_v0 = vsel %vm6699_vm0, %v1094_v9, %v1101_v12  ;;  %v1285_v37 = vsel %vm6585_vm5, %v1103_v44, %v1284_v61  ;;  %v2187_v20 = vrot.slane %v2186_v51, 4  ;;  %v9077_v17 = vshrl.u32 %v7428_v26, 16  ;;  %v1321_v13 = vld [vmem:[#allocation2 + $0x78] sm:$0xf]  ;;  %v1322_v12 = vld [vmem:[#allocation2 + $0x7c] sm:$0xf]  ;;  %v7726_v51 = vpop.permute.xlu0 %3684 }
 0x1b7   : > { %1283 = vst.msk [vmem:[#allocation2 + $0xac] sm:$0xf] %vm662_vm2, %v1102_v0  ;;  %1286 = vst [vmem:[#allocation2 + $0xb0] sm:$0x1] %v1285_v37  ;;  %v3082_v33 = vsel %vm6623_vm10, %v3080_v57, %v3081_v41  ;;  %v2199_v9 = vshll.u32 %v7581_v62, 16  ;;  %v1079_v24 = vshrl.u32 %v6025_v47, 16 }
 0x1b8   : > { %v2195_v27 = vrot.slane %v9077_v17, 4  ;;  %v1082_v44 = vshll.u32 %v6025_v47, 16  ;;  %v5880_v61 = vcombine.low %v3079_v18, %v3082_v33  ;;  %v2191_v34 = vrot.slane %v2189_v31, 5  ;;  %9078 = vst [vmem:[#allocation24_spill] sm:$0xff] %v7726_v51 }
 0x1b9   : > { %v2201_v30 = vrot.slane %v2199_v9, 5  ;;  %v5706_v40 = vrot.slane %v1746_v43, 9  ;;  %v1875_v29 = vrot.slane %v1322_v12, 5  ;;  %v1878_v0 = vrot.slane %v1343_v50, 5  ;;  %v1277_v62 = vld [vmem:[#allocation2 + $0xa4] sm:$0x1]  ;;  %v7730_v43 = vpop.permute.xlu1 %3682 }
 0x1ba   : > { %v1081_v37 = vrot.slane %v1079_v24, 7  ;;  %3852 = vrot.lane.b32.xlu0 %v5880_v61, %s6486_s16  ;;  %v2192_v41 = vsel %vm6631_vm13, %v2187_v20, %v2191_v34  ;;  %v2196_v26 = vor.u32 %v2195_v27, %v2191_v34  ;;  %v1593_v57 = vshrl.u32 %v1321_v13, 16 }
 0x1bb   : > { %v1876_v18 = vsel %vm6623_vm10, %v5706_v40, %v1875_v29  ;;  %v1877_v47 = vrot.slane %v1875_v29, 4  ;;  %v1596_v31 = vshll.u32 %v1321_v13, 16  ;;  %v1602_v33 = vshll.u32 %v1322_v12, 16 }
 0x1bc   : > { %v1084_v17 = vor.u32 %v1082_v44, %v1081_v37  ;;  %v1086_v9 = vrot.slane %v1081_v37, 4  ;;  %v2197_v24 = vrot.slane %v2196_v26, 4  ;;  %v1595_v61 = vrot.slane %v1593_v57, 4 }
 0x1bd   : > { %v1879_v20 = vsel %vm6623_vm10, %v1877_v47, %v1878_v0  ;;  %v1598_v27 = vrot.slane %v1596_v31, 5  ;;  %v1604_v34 = vrot.slane %v1602_v33, 5  ;;  %v1606_v51 = vshrl.u32 %v1322_v12, 16 }
 0x1be   : > { %v9079_v40 = vrot.slane %v7673_v42, 4  ;;  %v1278_v13 = vsel %vm6585_vm5, %v1086_v9, %v1277_v62  ;;  %v2202_v44 = vsel %vm6631_vm13, %v2197_v24, %v2201_v30  ;;  %v5786_v37 = vcombine.low %v1876_v18, %v1879_v20  ;;  %v7752_v30 = vpop.permute.xlu0 %3760 }
 0x1bf   : > { %1279 = vst [vmem:[#allocation2 + $0xa4] sm:$0x1] %v1278_v13  ;;  %v5817_v0 = vcombine.low %v2192_v41, %v2202_v44  ;;  %v1599_v26 = vor.u32 %v1598_v27, %v1595_v61  ;;  %v1608_v57 = vrot.slane %v1606_v51, 4  ;;  %v1612_v12 = vshll.u32 %v1343_v50, 16  ;;  %v2355_v27 = vld [vmem:[#allocation2 + $0x6c] sm:$0xe] }
 0x1c0   : > { %v1085_v29 = vsel %vm6699_vm0, %v9079_v40, %v1084_v17  ;;  %v9080_v47 = vshll.u32 %v7598_v38, 16  ;;  %3344 = vrot.lane.b32.xlu0 %v5786_v37, %s6482_s10  ;;  %v5735_v31 = vrot.slane %v2963_v53, 9  ;;  %v3071_v62 = vrot.slane %v7532_v16, 5  ;;  %v2542_v17 = vld [vmem:[#allocation2 + $0x84] sm:$0xf]  ;;  %v7756_v38 = vpop.permute.xlu1 %3758 }
 0x1c1   : > { %1276 = vst.msk [vmem:[#allocation2 + $0xa0] sm:$0xf] %vm662_vm2, %v1085_v29  ;;  %v3074_v33 = vrot.slane %v7732_v60, 5  ;;  %3518 = vrot.lane.b32.xlu1 %v5817_v0, %s6487_s17  ;;  %v1600_v41 = vrot.slane %v1599_v26, 4  ;;  %v1609_v51 = vor.u32 %v1608_v57, %v1604_v34  ;;  %v1614_v50 = vrot.slane %v1612_v12, 5 }
 0x1c2   : > { %v7747_v42 = vrot.slane %v9080_v47, 5  ;;  %v9081_v9 = vshrl.u32 %v7663_v56, 16  ;;  %v3922_v53 = vsel %vm3916_vm3, %v7704_v21, %v7386_v23  ;;  %v3072_v61 = vsel %vm6623_vm10, %v5735_v31, %v3071_v62  ;;  %v7777_v0 = vld [vmem:[#allocation2 + $0x74] sm:$0x1]  ;;  %v7781_v21 = vld [vmem:[#allocation2 + $0x88] sm:$0xf] }
 0x1c3   : > { %v3073_v20 = vrot.slane %v3071_v62, 4  ;;  %v9082_v40 = vshll.u32 %v7663_v56, 16  ;;  %v1605_v13 = vsel %vm6631_vm13, %v1600_v41, %v1604_v34  ;;  %v1610_v44 = vrot.slane %v1609_v51, 4  ;;  %v6447_v56 = vld [vmem:[#allocation2 + $0x10] sm:$0xf] }
 0x1c4   : > { %v7760_v24 = vrot.slane %v9081_v9, 4  ;;  %v7775_v37 = vsel %vm3949_vm4, %v3922_v53, %v7511_v54  ;;  %v2789_v26 = vshrl.u32 %v2542_v17, 16  ;;  %v2792_v57 = vshll.u32 %v2542_v17, 16  ;;  %v6448_v12 = vld [vmem:[#allocation2 + $0xc] sm:$0xf]  ;;  %v7791_v53 = vpop.permute.xlu0 %3428 }
 0x1c5   : > { %v7769_v29 = vrot.slane %v9082_v40, 5  ;;  %v3075_v23 = vsel %vm6623_vm10, %v3073_v20, %v3074_v33  ;;  %v5745_v47 = vcombine.low %v6448_v12, %v6447_v56  ;;  %v1615_v34 = vsel %vm6631_vm13, %v1610_v44, %v1614_v50  ;;  %v7798_v40 = vpop.permute.xlu1 %3250 }
 0x1c6   : > { %v5879_v31 = vcombine.low %v3072_v61, %v3075_v23  ;;  %v5720_v62 = vrot.slane %v2355_v27, 9  ;;  %v2469_v54 = vrot.slane %v7613_v39, 5  ;;  %v5770_v41 = vcombine.low %v1605_v13, %v1615_v34 }
 0x1c7   : > { %v3873_v51 = vsel %vm400_vm1, %v5745_v47, %v7549_v49  ;;  %v2472_v33 = vrot.slane %v7777_v0, 5  ;;  %v2747_v9 = vor.u32 %v7551_v14, %v7544_v2  ;;  %v2750_v27 = vshll.u32 %v7532_v16, 16 }
 0x1c8   : > { %3850 = vrot.lane.b32.xlu0 %v5879_v31, %s6486_s16  ;;  %v2470_v50 = vsel %vm6623_vm10, %v5720_v62, %v2469_v54  ;;  %v2471_v61 = vrot.slane %v2469_v54, 4  ;;  %3264 = vrot.lane.b32.xlu1 %v5770_v41, %s6483_s11  ;;  %v3920_v49 = vsel %vm3916_vm3, %v3873_v51, %v7422_v55  ;;  %v9083_v14 = vshrl.u32 %v7532_v16, 16  ;;  %v1319_v55 = vld [vmem:[#allocation2 + $0x6c] sm:$0xf]  ;;  %v7830_v51 = vld [vmem:[#allocation2 + $0x94] sm:$0xf] }
 0x1c9   : > { %v2748_v2 = vrot.slane %v2747_v9, 4  ;;  %v2760_v44 = vshll.u32 %v7732_v60, 16  ;;  %v5849_v23 = vcombine.low %v2542_v17, %v7781_v21  ;;  %v2752_v12 = vrot.slane %v2750_v27, 5  ;;  %v7817_v17 = vld [vmem:[#allocation2 + $0x90] sm:$0xf]  ;;  %v7832_v9 = vpop.permute.xlu1 %3590 }
 0x1ca   : > { %v2756_v13 = vrot.slane %v9083_v14, 4  ;;  %v2473_v56 = vsel %vm6623_vm10, %v2471_v61, %v2472_v33  ;;  %v7809_v47 = vrot.slane %v2789_v26, 4  ;;  %v7811_v34 = vrot.slane %v2792_v57, 5  ;;  %9084 = vst [vmem:[#allocation25_spill] sm:$0xff] %v7832_v9 }
 0x1cb   : > { %v5832_v31 = vcombine.low %v2470_v50, %v2473_v56  ;;  %v7815_v16 = vsel %vm3949_vm4, %v3920_v49, %v7356_v35  ;;  %v2762_v60 = vrot.slane %v2760_v44, 5  ;;  %v2753_v26 = vsel %vm6631_vm13, %v2748_v2, %v2752_v12  ;;  %v7826_v35 = vpop.permute.xlu0 %3504 }
 0x1cc   : > { %v2757_v62 = vor.u32 %v2756_v13, %v2752_v12  ;;  %3694 = vrot.lane.b32.xlu1 %v5849_v23, %s6481_s9  ;;  %v3984_v57 = vsel %vm3982_vm6, %v7592_v8, %v7577_v45  ;;  %v1569_v33 = vshrl.u32 %v1319_v55, 16  ;;  %v2813_v61 = vshrl.u32 %v7817_v17, 16 }
 0x1cd   : > { %3596 = vrot.lane.b32.xlu0 %v5832_v31, %s6485_s15  ;;  %v4017_v41 = vsel %vm4015_vm8, %v3984_v57, %v7418_v25  ;;  %v5850_v45 = vcombine.low %v7817_v17, %v7830_v51  ;;  %v1572_v8 = vshll.u32 %v1319_v55, 16  ;;  %v1578_v2 = vshll.u32 %v7634_v32, 16  ;;  %v2358_v31 = vld [vmem:[#allocation2 + $0x90] sm:$0xe] }
 0x1ce   : > { %v2758_v54 = vrot.slane %v2757_v62, 4  ;;  %v4050_v50 = vsel %vm4048_vm9, %v4017_v41, %v7278_v11  ;;  %v1571_v49 = vrot.slane %v1569_v33, 4  ;;  %v1582_v44 = vshrl.u32 %v7634_v32, 16 }
 0x1cf   : > { %v4083_v25 = vsel %vm4081_vm11, %v4050_v50, %v7480_v48  ;;  %v1574_v11 = vrot.slane %v1572_v8, 5  ;;  %v1580_v56 = vrot.slane %v1578_v2, 5  ;;  %v1588_v12 = vshll.u32 %v7615_v46, 16  ;;  %v7855_v57 = vpop.permute.xlu0 %3844 }
 0x1d0   : > { %v2763_v27 = vsel %vm6631_vm13, %v2758_v54, %v2762_v60  ;;  %v4116_v13 = vsel %vm4114_vm12, %v4083_v25, %v7349_v1  ;;  %v2771_v48 = vor.u32 %v7607_v36, %v7596_v3  ;;  %v1584_v1 = vrot.slane %v1582_v44, 4  ;;  %9085 = vst [vmem:[#allocation26_spill] sm:$0xff] %v7855_v57  ;;  %v7861_v3 = vld [vmem:[#allocation2 + $0x84] sm:$0xf]  ;;  %v7863_v36 = vpop.permute.xlu1 %3334 }
 0x1d1   : > { %v5863_v14 = vcombine.low %v2753_v26, %v2763_v27  ;;  %3696 = vrot.lane.b32.xlu0 %v5850_v45, %s6481_s9  ;;  %v4149_v23 = vsel %vm4147_vm14, %v4116_v13, 0  ;;  %v1575_v60 = vor.u32 %v1574_v11, %v1571_v49  ;;  %v7853_v26 = vld [vmem:[#allocation2 + $0x98] sm:$0x1]  ;;  %v2816_v32 = vshll.u32 %v7817_v17, 16 }
 0x1d2   : > { %v5888_v55 = vcombine.low %v4149_v23, %v4149_v23  ;;  %v5889_v62 = vcombine.high %v4149_v23, %v4149_v23  ;;  %v1590_v54 = vrot.slane %v1588_v12, 5  ;;  %v2774_v41 = vshll.u32 %v7561_v52, 16 }
 0x1d3   : > { %3770 = vrot.lane.b32.xlu1 %v5863_v14, %s6488_s18  ;;  %v9086_v46 = vshrl.u32 %v7561_v52, 16  ;;  %v1576_v50 = vrot.slane %v1575_v60, 4  ;;  %v1585_v45 = vor.u32 %v1584_v1, %v1580_v56  ;;  %v2784_v8 = vshll.u32 %v7687_v6, 16  ;;  %v6153_v60 = vpop.f32.mrf.mxu0  ;;  %v722_v1 = vld [vmem:[#allocation2 + $0xc0] sm:$0x1] }
 0x1d4   : > { %4277 = vst [vmem:[#allocation3] sm:$0xf] %v5888_v55  ;;  %4278 = vst [vmem:[#allocation3 + $0x4] sm:$0xf] %v5889_v62  ;;  %v5723_v27 = vrot.slane %v2358_v31, 9  ;;  %v2772_v25 = vrot.slane %v2771_v48, 4 }
 0x1d5   : > { %v2780_v33 = vrot.slane %v9086_v46, 4  ;;  %v2776_v49 = vrot.slane %v2774_v41, 5  ;;  %v2490_v17 = vrot.slane %v7685_v7, 5  ;;  %v2493_v2 = vrot.slane %v7853_v26, 5  ;;  %v7874_v31 = vld [vmem:[#allocation2 + $0x88] sm:$0xf]  ;;  %v7883_v41 = vpop.permute.xlu0 %3336 }
 0x1d6   : > { %v1581_v14 = vsel %vm6631_vm13, %v1576_v50, %v1580_v56  ;;  %v1586_v13 = vrot.slane %v1585_v45, 4  ;;  %v2204_v11 = vshrl.u32 %v7861_v3, 16  ;;  %v7872_v44 = vrot.slane %v2813_v61, 4  ;;  %v1747_v50 = vld [vmem:[#allocation2 + $0x84] sm:$0xe] }
 0x1d7   : > { %v2781_v23 = vor.u32 %v2780_v33, %v2776_v49  ;;  %v2786_v12 = vrot.slane %v2784_v8, 5  ;;  %v2492_v6 = vrot.slane %v2490_v17, 4  ;;  %v7876_v48 = vrot.slane %v2816_v32, 5  ;;  %v719_v45 = vld [vmem:[#allocation2 + $0xb4] sm:$0x1] }
 0x1d8   : > { %v1591_v55 = vsel %vm6631_vm13, %v1586_v13, %v1590_v54  ;;  %v2491_v62 = vsel %vm6623_vm10, %v5723_v27, %v2490_v17  ;;  %v2207_v56 = vshll.u32 %v7861_v3, 16  ;;  %v2777_v46 = vsel %vm6631_vm13, %v2772_v25, %v2776_v49  ;;  %v7889_v54 = vpop.permute.xlu1 %3434  ;;  %v7891_v8 = vld [vmem:[#allocation2 + $0x34] sm:$0xf]  ;;  %v7893_v27 = vld [vmem:[#allocation2 + $0x30] sm:$0xf]  ;;  %v599_v25 = vpop.f32.mrf.mxu0 }
 0x1d9   : > { %v5769_v61 = vcombine.low %v1581_v14, %v1591_v55  ;;  %v2782_v33 = vrot.slane %v2781_v23, 4  ;;  %v2494_v32 = vsel %vm6623_vm10, %v2492_v6, %v2493_v2  ;;  %9087 = vst [vmem:[#allocation27_spill] sm:$0xff] %v7889_v54  ;;  %v7897_v13 = vrot.slane %v2204_v11, 4  ;;  %v7902_v49 = vld [vmem:[#allocation2 + $0x88] sm:$0xf] }
 0x1da   : > { %v7899_v14 = vrot.slane %v2207_v56, 5  ;;  %v7904_v2 = vld [vmem:[#allocation2 + $0x8c] sm:$0x1]  ;;  %v5835_v6 = vcombine.low %v2491_v62, %v2494_v32  ;;  %v608_v55 = vadd.f32 %v7629_v15, %v6153_v60  ;;  %v723_v11 = vsel %vm6585_vm5, 0, %v722_v1  ;;  %v7926_v32 = vpop.permute.xlu0 %3842 }
 0x1db   : > { %3262 = vrot.lane.b32.xlu1 %v5769_v61, %s6483_s11  ;;  %v2787_v23 = vsel %vm6631_vm13, %v2782_v33, %v2786_v12  ;;  %v5802_v20 = vcombine.low %v7861_v3, %v7874_v31  ;;  %724 = vst [vmem:[#allocation2 + $0xc0] sm:$0x1] %v723_v11  ;;  %v5707_v18 = vrot.slane %v1747_v50, 9  ;;  %v6384_v17 = vld [vmem:[#allocation3] sm:$0xff]   ;;  %v1882_v12 = vrot.slane %v7902_v49, 5 }
 0x1dc   : > { %v5864_v52 = vcombine.low %v2777_v46, %v2787_v23  ;;  %v6385_v61 = vld [vmem:[#allocation3] sm:$0xff]   ;;  %v644_v54 = vmax.f32 %v608_v55, 0.0  ;;  %v1885_v62 = vrot.slane %v7904_v2, 5  ;;  %v600_v60 = vadd.f32 %v7629_v15, %v599_v25  ;;  %6171 = vmatprep.mubr.bf16.mxu1 %v6384_v17  ;;  %v7944_v56 = vld [vmem:[#allocation2 + $0xac] sm:$0xf] }
 0x1dd   : > { %v2210_v1 = vor.u32 %v7899_v14, %v7897_v13  ;;  %v720_v3 = vsel %vm6585_vm5, 0, %v719_v45  ;;  %v2162_v46 = vor.u32 %v7747_v42, %v7665_v10  ;;  %v2165_v33 = vshll.u32 %v7613_v39, 16  ;;  %6219 = vmatprep.mubr.bf16.mxu0 %v6385_v61  ;;  %v7931_v13 = vpop.permute.xlu1 %3510 }
 0x1de   : > { %3772 = vrot.lane.b32.xlu0 %v5864_v52, %s6488_s18  ;;  %v6030_v50 = vpack.c.bf16 %v644_v54, %v644_v54  ;;  %v1883_v52 = vsel %vm6623_vm10, %v5707_v18, %v1882_v12  ;;  %v1884_v25 = vrot.slane %v1882_v12, 4  ;;  %v642_v23 = vmax.f32 %v600_v60, 0.0  ;;  %721 = vst [vmem:[#allocation2 + $0xb4] sm:$0x1] %v720_v3  ;;  %9088 = vst [vmem:[#allocation28_spill] sm:$0xff] %v7931_v13 }
 0x1df   : > { %3602 = vrot.lane.b32.xlu1 %v5835_v6, %s6485_s15  ;;  %v2163_v45 = vrot.slane %v2162_v46, 4  ;;  %v2167_v14 = vrot.slane %v2165_v33, 5  ;;  %v9089_v10 = vshrl.u32 %v7613_v39, 16  ;;  %v2175_v17 = vshll.u32 %v7777_v0, 16  ;;  %v778_v18 = vld [vmem:[#allocation2 + $0xc8] sm:$0x1]  ;;  %v6154_v39 = vpop.f32.mrf.mxu0 }
 0x1e0   : > { %v1122_v55 = vshrl.u32 %v6030_v50, 16  ;;  %v1125_v11 = vshll.u32 %v6030_v50, 16  ;;  %v1886_v54 = vsel %vm6623_vm10, %v1884_v25, %v1885_v62  ;;  %v6028_v6 = vpack.c.bf16 %v642_v23, %v642_v23  ;;  %v1941_v12 = vld [vmem:[#allocation2 + $0xa8] sm:$0xf]  ;;  %v2966_v13 = vld [vmem:[#allocation2 + $0x90] sm:$0xe] }
 0x1e1   : > { %v2171_v42 = vrot.slane %v9089_v10, 4  ;;  %v5787_v61 = vcombine.low %v1883_v52, %v1886_v54  ;;  %v2168_v60 = vsel %vm6631_vm13, %v2163_v45, %v2167_v14  ;;  %v2177_v46 = vrot.slane %v2175_v17, 5  ;;  %v7949_v45 = vpop.permute.xlu0 %3588 }
 0x1e2   : > { %3440 = vrot.lane.b32.xlu0 %v5802_v20, %s6484_s14  ;;  %v7941_v33 = vrot.slane %v1122_v55, 7  ;;  %v1105_v0 = vshrl.u32 %v6028_v6, 16  ;;  %v1108_v10 = vshll.u32 %v6028_v6, 16  ;;  %v611_v50 = vadd.f32 %v7629_v15, %v6154_v39  ;;  %v1294_v62 = vld [vmem:[#allocation2 + $0xc0] sm:$0xf]  ;;  %v7961_v6 = vpop.permute.xlu1 %3256 }
 0x1e3   : > { %v2172_v3 = vor.u32 %v2171_v42, %v2167_v14  ;;  %3346 = vrot.lane.b32.xlu1 %v5787_v61, %s6482_s10  ;;  %v779_v20 = vsel %vm6592_vm7, 0, %v778_v18  ;;  %v2276_v52 = vshrl.u32 %v1941_v12, 16  ;;  %v2279_v23 = vshll.u32 %v1941_v12, 16 }
 0x1e4   : > { %v9090_v14 = vcombine.low %v7893_v27, %v7891_v8  ;;  %v1127_v17 = vor.u32 %v1125_v11, %v7941_v33  ;;  %v7959_v55 = vrot.slane %v1105_v0, 7  ;;  %v645_v54 = vmax.f32 %v611_v50, 0.0  ;;  %780 = vst [vmem:[#allocation2 + $0xc8] sm:$0x1] %v779_v20 }
 0x1e5   : > { %v2173_v25 = vrot.slane %v2172_v3, 4  ;;  %v1287_v18 = vld [vmem:[#allocation2 + $0xb4] sm:$0xf]  ;;  %v7965_v3 = vrot.slane %v2276_v52, 4  ;;  %v7967_v39 = vrot.slane %v2279_v23, 5  ;;  %v2285_v8 = vshll.u32 %v7944_v56, 16 }
 0x1e6   : > { %v7956_v42 = vsel %vm400_vm1, %v9090_v14, %v7710_v58  ;;  %v602_v58 = vpop.f32.mrf.mxu0  ;;  %v9091_v27 = vshll.u32 %v7874_v31, 16  ;;  %v1295_v0 = vsel %vm6687_vm15, %v1127_v17, %v1294_v62  ;;  %v1110_v50 = vor.u32 %v1108_v10, %v7959_v55  ;;  %v775_v14 = vld [vmem:[#allocation2 + $0xbc] sm:$0x1]  ;;  %v7990_v10 = vld [vmem:[#allocation2 + $0x98] sm:$0x1] }
 0x1e7   : > { %v2178_v61 = vsel %vm6631_vm13, %v2173_v25, %v2177_v46  ;;  %v7977_v9 = vrot.slane %v2210_v1, 4  ;;  %v9092_v46 = vshrl.u32 %v7874_v31, 16  ;;  %v1128_v52 = vrot.slane %v7941_v33, 4  ;;  %1296 = vst [vmem:[#allocation2 + $0xc0] sm:$0xf] %v1295_v0  ;;  %v7996_v0 = vpop.permute.xlu0 %3688 }
 0x1e8   : > { %v7972_v11 = vrot.slane %v9091_v27, 5  ;;  %v5816_v20 = vcombine.low %v2168_v60, %v2178_v61  ;;  %v6031_v23 = vpack.c.bf16 %v645_v54, %v645_v54  ;;  %v1288_v62 = vsel %vm6687_vm15, %v1110_v50, %v1287_v18  ;;  %9093 = vst [vmem:[#allocation29_spill] sm:$0xff] %v7996_v0  ;;  %v9097_v27 = vld [vmem:[#allocation21_spill] sm:$0xff] }
 0x1e9   : > { %v7981_v25 = vrot.slane %v9092_v46, 4  ;;  %v5805_v60 = vcombine.low %v1941_v12, %v7944_v56  ;;  %v603_v1 = vadd.f32 %v7629_v15, %v602_v58  ;;  %1289 = vst [vmem:[#allocation2 + $0xb4] sm:$0xf] %v1288_v62  ;;  %v7994_v54 = vrot.slane %v2285_v8, 5  ;;  %v8004_v58 = vpop.permute.xlu1 %3686 }
 0x1ea   : > { %3516 = vrot.lane.b32.xlu0 %v5816_v20, %s6487_s17  ;;  %v1130_v17 = vshrl.u32 %v6031_v23, 16  ;;  %v1133_v61 = vshll.u32 %v6031_v23, 16  ;;  %v776_v12 = vsel %vm6592_vm7, 0, %v775_v14  ;;  %v3986_v15 = vsel %vm3982_vm6, %v7815_v16, %v7484_v63  ;;  %9094 = vst [vmem:[#allocation30_spill] sm:$0xff] %v8004_v58  ;;  %v9095_v20 = vld [vmem:[#allocation12_spill] sm:$0xff] }
 0x1eb   : > { %3446 = vrot.lane.b32.xlu1 %v5805_v60, %s6484_s14  ;;  %v643_v4 = vmax.f32 %v603_v1, 0.0  ;;  %v5738_v18 = vrot.slane %v2966_v13, 9  ;;  %777 = vst [vmem:[#allocation2 + $0xbc] sm:$0x1] %v776_v12  ;;  %v4019_v8 = vsel %vm4015_vm8, %v3986_v15, %v9095_v20  ;;  %v3092_v46 = vrot.slane %v7830_v51, 5  ;;  %v9096_v1 = vld [vmem:[#allocation15_spill] sm:$0xff] }
 0x1ec   : > { %v1132_v50 = vrot.slane %v1130_v17, 7  ;;  %v3095_v23 = vrot.slane %v7990_v10, 5  ;;  %v1298_v62 = vld [vmem:[#allocation2 + $0xc8] sm:$0x1]  ;;  %v4052_v14 = vsel %vm4048_vm9, %v4019_v8, %v9096_v1  ;;  %v2234_v63 = vor.u32 %v7769_v29, %v7760_v24  ;;  %v2357_v58 = vld [vmem:[#allocation2 + $0x84] sm:$0xe] }
 0x1ed   : > { %v6029_v60 = vpack.c.bf16 %v643_v4, %v643_v4  ;;  %v2237_v16 = vshll.u32 %v7685_v7, 16  ;;  %v4085_v12 = vsel %vm4081_vm11, %v4052_v14, %v7756_v38  ;;  %v3093_v15 = vsel %vm6623_vm10, %v5738_v18, %v3092_v46  ;;  %v8026_v38 = vpop.permute.xlu0 %3764 }
 0x1ee   : > { %v1135_v13 = vor.u32 %v1133_v61, %v1132_v50  ;;  %v1137_v17 = vrot.slane %v1132_v50, 4  ;;  %v4118_v4 = vsel %vm4114_vm12, %v4085_v12, %v9097_v27  ;;  %v3094_v0 = vrot.slane %v3092_v46, 4  ;;  %v1748_v50 = vld [vmem:[#allocation2 + $0x90] sm:$0xe]  ;;  %v8031_v46 = vpop.permute.xlu1 %3762 }
 0x1ef   : > { %v1113_v20 = vshrl.u32 %v6029_v60, 16  ;;  %v1116_v33 = vshll.u32 %v6029_v60, 16  ;;  %v4150_v29 = vsel %vm4147_vm14, %v4118_v4, 0  ;;  %v2235_v61 = vrot.slane %v2234_v63, 4 }
 0x1f0   : > { %v1136_v8 = vsel %vm6699_vm0, %v1128_v52, %v1135_v13  ;;  %v1299_v24 = vsel %vm6585_vm5, %v1137_v17, %v1298_v62  ;;  %v5890_v60 = vcombine.low %v4150_v29, %v4150_v29  ;;  %v5891_v1 = vcombine.high %v4150_v29, %v4150_v29  ;;  %v1345_v17 = vld [vmem:[#allocation2 + $0x98] sm:$0x1] }
 0x1f1   : > { %1297 = vst.msk [vmem:[#allocation2 + $0xc4] sm:$0xf] %vm662_vm2, %v1136_v8  ;;  %1300 = vst [vmem:[#allocation2 + $0xc8] sm:$0x1] %v1299_v24  ;;  %v1115_v18 = vrot.slane %v1113_v20, 7  ;;  %v3096_v27 = vsel %vm6623_vm10, %v3094_v0, %v3095_v23  ;;  %v2239_v14 = vrot.slane %v2237_v16, 5  ;;  %v8051_v28 = vpop.permute.xlu0 %3432 }
 0x1f2   : > { %v5882_v52 = vcombine.low %v3093_v15, %v3096_v27  ;;  %v9098_v62 = vshrl.u32 %v7685_v7, 16  ;;  %v2247_v63 = vshll.u32 %v7853_v26, 16  ;;  %v1291_v8 = vld [vmem:[#allocation2 + $0xbc] sm:$0x1]  ;;  %4279 = vst [vmem:[#allocation3 + $0x8] sm:$0xf] %v5890_v60 }
 0x1f3   : > { %v1118_v12 = vor.u32 %v1116_v33, %v1115_v18  ;;  %v1120_v4 = vrot.slane %v1115_v18, 4  ;;  %4280 = vst [vmem:[#allocation3 + $0xc] sm:$0xf] %v5891_v1  ;;  %v6451_v20 = vld [vmem:[#allocation2 + $0x28] sm:$0xf]  ;;  %v5708_v0 = vrot.slane %v1748_v50, 9  ;;  %v2240_v1 = vsel %vm6631_vm13, %v2235_v61, %v2239_v14 }
 0x1f4   : > { %v2243_v13 = vrot.slane %v9098_v62, 4  ;;  %v6452_v24 = vld [vmem:[#allocation2 + $0x24] sm:$0xf]  ;;  %v2289_v23 = vshrl.u32 %v7944_v56, 16  ;;  %3856 = vrot.lane.b32.xlu0 %v5882_v52, %s6486_s16  ;;  %v2249_v7 = vrot.slane %v2247_v63, 5  ;;  %v1889_v15 = vrot.slane %v1326_v22, 5 }
 0x1f5   : > { %v5747_v29 = vcombine.low %v6452_v24, %v6451_v20  ;;  %v1325_v27 = vld [vmem:[#allocation2 + $0x90] sm:$0xf]  ;;  %v9099_v26 = vrot.slane %v7959_v55, 4  ;;  %v1292_v18 = vsel %vm6585_vm5, %v1120_v4, %v1291_v8  ;;  %v1892_v50 = vrot.slane %v1345_v17, 5  ;;  %9100 = vst [vmem:[#allocation12_spill] sm:$0xff] %v8051_v28  ;;  %v8055_v8 = vpop.permute.xlu1 %3254 }
 0x1f6   : > { %v2244_v16 = vor.u32 %v2243_v13, %v2239_v14  ;;  %1293 = vst [vmem:[#allocation2 + $0xbc] sm:$0x1] %v1292_v18  ;;  %v1890_v55 = vsel %vm6623_vm10, %v5708_v0, %v1889_v15  ;;  %v1891_v62 = vrot.slane %v1889_v15, 4  ;;  %v9101_v13 = vld [vmem:[#allocation18_spill] sm:$0xff]  ;;  %v1641_v63 = vshrl.u32 %v1325_v27, 16 }
 0x1f7   : > { %v1119_v33 = vsel %vm6699_vm0, %v9099_v26, %v1118_v12  ;;  %v3879_v60 = vsel %vm400_vm1, %v5747_v29, %v7798_v40  ;;  %v1644_v12 = vshll.u32 %v1325_v27, 16  ;;  %v1650_v40 = vshll.u32 %v1326_v22, 16  ;;  %v2965_v4 = vld [vmem:[#allocation2 + $0x84] sm:$0xe]  ;;  %v8061_v29 = vld [vmem:[#allocation2 + $0x8c] sm:$0x1] }
 0x1f8   : > { %1290 = vst.msk [vmem:[#allocation2 + $0xb8] sm:$0xf] %vm662_vm2, %v1119_v33  ;;  %v2245_v52 = vrot.slane %v2244_v16, 4  ;;  %v3924_v19 = vsel %vm3916_vm3, %v3879_v60, %v9101_v13  ;;  %v1893_v61 = vsel %vm6623_vm10, %v1891_v62, %v1892_v50  ;;  %v1654_v14 = vshrl.u32 %v1326_v22, 16  ;;  %v8063_v0 = vld [vmem:[#allocation2 + $0x9c] sm:$0xf] }
 0x1f9   : > { %v1660_v24 = vshll.u32 %v1345_v17, 16  ;;  %v5788_v15 = vcombine.low %v1890_v55, %v1893_v61  ;;  %v1643_v26 = vrot.slane %v1641_v63, 4  ;;  %v1646_v27 = vrot.slane %v1644_v12, 5  ;;  %v8065_v33 = vld [vmem:[#allocation2 + $0xa0] sm:$0xf] }
 0x1fa   : > { %v2250_v20 = vsel %vm6631_vm13, %v2245_v52, %v2249_v7  ;;  %v1652_v18 = vrot.slane %v1650_v40, 5  ;;  %v1656_v60 = vrot.slane %v1654_v14, 4  ;;  %v5737_v28 = vrot.slane %v2965_v4, 9  ;;  %v6394_v12 = vld [vmem:[#allocation3 + $0x8] sm:$0xff]   ;;  %v8075_v40 = vpop.permute.xlu0 %3508 }
 0x1fb   : > { %v5819_v16 = vcombine.low %v2240_v1, %v2250_v20  ;;  %v1662_v13 = vrot.slane %v1660_v24, 5  ;;  %3348 = vrot.lane.b32.xlu0 %v5788_v15, %s6482_s10  ;;  %v1647_v22 = vor.u32 %v1646_v27, %v1643_v26  ;;  %v3085_v17 = vrot.slane %v7781_v21, 5  ;;  %v6393_v1 = vld [vmem:[#allocation3 + $0x8] sm:$0xff]   ;;  %v8080_v24 = vpop.permute.xlu1 %3594  ;;  %6220 = vmatmul.mubr.bf16.vlgmr.msra.gmra.mxu0 %v6394_v12 }
 0x1fc   : > { %v3088_v7 = vrot.slane %v8061_v29, 5  ;;  %v2837_v50 = vshrl.u32 %v8063_v0, 16  ;;  %v1657_v52 = vor.u32 %v1656_v60, %v1652_v18  ;;  %v2840_v55 = vshll.u32 %v8063_v0, 16  ;;  %6172 = vmatmul.mubr.bf16.vlgmr.msra.gmra.mxu1 %v6393_v1 }
 0x1fd   : > { %3522 = vrot.lane.b32.xlu1 %v5819_v16, %s6487_s17  ;;  %v2846_v62 = vshll.u32 %v8065_v33, 16  ;;  %v2850_v63 = vshrl.u32 %v8065_v33, 16  ;;  %v1648_v20 = vrot.slane %v1647_v22, 4  ;;  %v3086_v61 = vsel %vm6623_vm10, %v5737_v28, %v3085_v17  ;;  %v9103_v22 = vld [vmem:[#allocation14_spill] sm:$0xff] }
 0x1fe   : > { %v3087_v14 = vrot.slane %v3085_v17, 4  ;;  %v9102_v16 = vor.u32 %v7967_v39, %v7965_v3  ;;  %v1658_v26 = vrot.slane %v1657_v52, 4  ;;  %v2839_v27 = vrot.slane %v2837_v50, 4  ;;  %v1957_v3 = vld [vmem:[#allocation2 + $0x8c] sm:$0x1] }
 0x1ff   : > { %v2842_v60 = vrot.slane %v2840_v55, 5  ;;  %v8087_v57 = vrot.slane %v2289_v23, 4  ;;  %v8091_v4 = vsel %vm3949_vm4, %v3924_v19, %v9103_v22  ;;  %v1653_v28 = vsel %vm6631_vm13, %v1648_v20, %v1652_v18  ;;  %v9105_v22 = vld [vmem:[#allocation19_spill] sm:$0xff] }
 0x200   : > { %v8085_v15 = vrot.slane %v9102_v16, 4  ;;  %v3089_v17 = vsel %vm6623_vm10, %v3087_v14, %v3088_v7  ;;  %v1663_v39 = vsel %vm6631_vm13, %v1658_v26, %v1662_v13  ;;  %v8099_v1 = vrot.slane %v2846_v62, 5  ;;  %v2548_v62 = vld [vmem:[#allocation2 + $0xa8] sm:$0xf]  ;;  %v8117_v26 = vld [vmem:[#allocation2 + $0xac] sm:$0xf] }
 0x201   : > { %v5881_v50 = vcombine.low %v3086_v61, %v3089_v17  ;;  %v8101_v52 = vrot.slane %v2850_v63, 4  ;;  %v5772_v23 = vcombine.low %v1653_v28, %v1663_v39  ;;  %v5851_v19 = vcombine.low %v8063_v0, %v8065_v33  ;;  %v8110_v61 = vpop.permute.xlu0 %3848 }
 0x202   : > { %v5722_v12 = vrot.slane %v2357_v58, 9  ;;  %v2843_v18 = vor.u32 %v2842_v60, %v2839_v27  ;;  %v2483_v7 = vrot.slane %v7874_v31, 5  ;;  %v2486_v20 = vrot.slane %v1957_v3, 5  ;;  %v8119_v31 = vpop.permute.xlu1 %3338 }
 0x203   : > { %3854 = vrot.lane.b32.xlu0 %v5881_v50, %s6486_s16  ;;  %v2795_v13 = vor.u32 %v7811_v34, %v7809_v47  ;;  %3268 = vrot.lane.b32.xlu1 %v5772_v23, %s6483_s11  ;;  %v2223_v63 = vshll.u32 %v1957_v3, 16  ;;  %v2798_v14 = vshll.u32 %v7781_v21, 16  ;;  %v9104_v0 = vshrl.u32 %v7781_v21, 16  ;;  %v9107_v50 = vld [vmem:[#allocation13_spill] sm:$0xff] }
 0x204   : > { %v2808_v16 = vshll.u32 %v8061_v29, 16  ;;  %v2484_v47 = vsel %vm6623_vm10, %v5722_v12, %v2483_v7  ;;  %v2485_v34 = vrot.slane %v2483_v7, 4  ;;  %v3988_v60 = vsel %vm3982_vm6, %v7775_v37, %v7826_v35  ;;  %v9106_v29 = vld [vmem:[#allocation23_spill] sm:$0xff] }
 0x205   : > { %v2804_v58 = vrot.slane %v9104_v0, 4  ;;  %v2796_v27 = vrot.slane %v2795_v13, 4  ;;  %v8129_v21 = vsel %vm3916_vm3, %v7956_v42, %v9105_v22  ;;  %v2800_v28 = vrot.slane %v2798_v14, 5  ;;  %v1323_v22 = vld [vmem:[#allocation2 + $0x84] sm:$0xf] }
 0x206   : > { %v4021_v17 = vsel %vm4015_vm8, %v3988_v60, %v9106_v29  ;;  %v2861_v3 = vshrl.u32 %v2548_v62, 16  ;;  %v2487_v39 = vsel %vm6623_vm10, %v2485_v34, %v2486_v20  ;;  %v2864_v12 = vshll.u32 %v2548_v62, 16  ;;  %v9108_v34 = vld [vmem:[#allocation17_spill] sm:$0xff]  ;;  %v8149_v29 = vpop.permute.xlu0 %3340 }
 0x207   : > { %v4054_v23 = vsel %vm4048_vm9, %v4021_v17, %v9107_v50  ;;  %v2870_v7 = vshll.u32 %v8117_v26, 16  ;;  %3698 = vrot.lane.b32.xlu1 %v5851_v19, %s6481_s9  ;;  %v5834_v37 = vcombine.low %v2484_v47, %v2487_v39  ;;  %v2805_v35 = vor.u32 %v2804_v58, %v2800_v28 }
 0x208   : > { %v2810_v42 = vrot.slane %v2808_v16, 5  ;;  %v4087_v13 = vsel %vm4081_vm11, %v4054_v23, %v7752_v30  ;;  %v8141_v14 = vrot.slane %v2843_v18, 4  ;;  %v8143_v0 = vrot.slane %v2223_v63, 5  ;;  %v8155_v18 = vpop.permute.xlu1 %3438 }
 0x209   : > { %v2801_v20 = vsel %vm6631_vm13, %v2796_v27, %v2800_v28  ;;  %v4120_v60 = vsel %vm4114_vm12, %v4087_v13, %v9108_v34  ;;  %3600 = vrot.lane.b32.xlu0 %v5834_v37, %s6485_s15  ;;  %v2806_v19 = vrot.slane %v2805_v35, 4  ;;  %v8153_v16 = vrot.slane %v2861_v3, 4  ;;  %v1749_v3 = vld [vmem:[#allocation2 + $0x9c] sm:$0xe] }
 0x20a   : > { %v4151_v58 = vsel %vm4147_vm14, %v4120_v60, 0  ;;  %v2866_v30 = vrot.slane %v2864_v12, 5  ;;  %v8157_v17 = vrot.slane %v2870_v7, 5  ;;  %v2874_v27 = vshrl.u32 %v8117_v26, 16 }
 0x20b   : > { %v5892_v63 = vcombine.low %v4151_v58, %v4151_v58  ;;  %v5893_v47 = vcombine.high %v4151_v58, %v4151_v58  ;;  %v2811_v28 = vsel %vm6631_vm13, %v2806_v19, %v2810_v42  ;;  %v5852_v39 = vcombine.low %v2548_v62, %v8117_v26  ;;  %v2360_v42 = vld [vmem:[#allocation2 + $0xa8] sm:$0xe] }
 0x20c   : > { %v1617_v50 = vshrl.u32 %v1323_v22, 16  ;;  %v1620_v23 = vshll.u32 %v1323_v22, 16  ;;  %v5865_v37 = vcombine.low %v2801_v20, %v2811_v28  ;;  %v1626_v12 = vshll.u32 %v7902_v49, 16 }
 0x20d   : > { %4281 = vst [vmem:[#allocation3 + $0x10] sm:$0xf] %v5892_v63  ;;  %4282 = vst [vmem:[#allocation3 + $0x14] sm:$0xf] %v5893_v47  ;;  %v1630_v35 = vshrl.u32 %v7902_v49, 16  ;;  %3700 = vrot.lane.b32.xlu0 %v5852_v39, %s6481_s9  ;;  %v1636_v34 = vshll.u32 %v7904_v2, 16  ;;  %v2819_v62 = vor.u32 %v7876_v48, %v7872_v44  ;;  %v8176_v63 = vpop.permute.xlu0 %3846  ;;  %v8179_v44 = vpop.permute.xlu1 %3514 }
 0x20e   : > { %v1619_v7 = vrot.slane %v1617_v50, 4  ;;  %v1622_v13 = vrot.slane %v1620_v23, 5  ;;  %3774 = vrot.lane.b32.xlu1 %v5865_v37, %s6488_s18  ;;  %v1628_v20 = vrot.slane %v1626_v12, 5  ;;  %v2822_v22 = vshll.u32 %v7830_v51, 16  ;;  %v8174_v49 = vld [vmem:[#allocation2 + $0xb0] sm:$0x1] }
 0x20f   : > { %v1632_v60 = vrot.slane %v1630_v35, 4  ;;  %v9109_v19 = vshrl.u32 %v7830_v51, 16  ;;  %v1638_v28 = vrot.slane %v1636_v34, 5  ;;  %v2820_v2 = vrot.slane %v2819_v62, 4  ;;  %v8183_v35 = vld [vmem:[#allocation2 + $0x9c] sm:$0xf] }
 0x210   : > { %v1623_v47 = vor.u32 %v1622_v13, %v1619_v7  ;;  %v2832_v39 = vshll.u32 %v7990_v10, 16  ;;  %v2824_v50 = vrot.slane %v2822_v22, 5  ;;  %v5725_v23 = vrot.slane %v2360_v42, 9  ;;  %v6453_v62 = vld [vmem:[#allocation2 + $0x48] sm:$0xf] }
 0x211   : > { %v2828_v58 = vrot.slane %v9109_v19, 4  ;;  %v1633_v48 = vor.u32 %v1632_v60, %v1628_v20  ;;  %v9110_v37 = vrot.slane %v7944_v56, 5  ;;  %v2867_v51 = vor.u32 %v2866_v30, %v8153_v16  ;;  %v6454_v60 = vld [vmem:[#allocation2 + $0x4c] sm:$0xf]  ;;  %v8189_v42 = vld [vmem:[#allocation2 + $0xa4] sm:$0x1] }
 0x212   : > { %v1624_v19 = vrot.slane %v1623_v47, 4  ;;  %v2834_v55 = vrot.slane %v2832_v39, 5  ;;  %v2507_v7 = vrot.slane %v8174_v49, 5  ;;  %v2825_v10 = vsel %vm6631_vm13, %v2820_v2, %v2824_v50  ;;  %v8199_v39 = vld [vmem:[#allocation2 + $0xa0] sm:$0xf] }
 0x213   : > { %v2506_v12 = vrot.slane %v9110_v37, 4  ;;  %v1634_v13 = vrot.slane %v1633_v48, 4  ;;  %v2829_v34 = vor.u32 %v2828_v58, %v2824_v50  ;;  %v5750_v22 = vcombine.low %v6453_v62, %v6454_v60  ;;  %v8220_v60 = vld [vmem:[#allocation2 + $0xa0] sm:$0xf] }
 0x214   : > { %v1629_v37 = vsel %vm6631_vm13, %v1624_v19, %v1628_v20  ;;  %v9111_v16 = vrot.slane %v7944_v56, 5  ;;  %v2252_v58 = vshrl.u32 %v8183_v35, 16  ;;  %v6398_v2 = vld [vmem:[#allocation3 + $0x10] sm:$0xff]   ;;  %v8205_v48 = vsel %vm3949_vm4, %v8129_v21, %v7791_v53  ;;  %v8222_v21 = vpop.permute.xlu1 %3260 }
 0x215   : > { %v2508_v47 = vsel %vm6623_vm10, %v2506_v12, %v2507_v7  ;;  %v1639_v20 = vsel %vm6631_vm13, %v1634_v13, %v1638_v28  ;;  %v2830_v56 = vrot.slane %v2829_v34, 4  ;;  %v2255_v50 = vshll.u32 %v8183_v35, 16  ;;  %6175 = vmatprep.mubr.bf16.mxu1 %v6398_v2  ;;  %v6399_v53 = vld [vmem:[#allocation3 + $0x10] sm:$0xff]  }
 0x216   : > { %v2505_v30 = vsel %vm6623_vm10, %v5725_v23, %v9111_v16  ;;  %v8210_v23 = vpop.permute.xlu0 %3592  ;;  %v8212_v19 = vrot.slane %v2867_v51, 4  ;;  %v8214_v12 = vrot.slane %v2874_v27, 4  ;;  %v5771_v7 = vcombine.low %v1629_v37, %v1639_v20  ;;  %v8233_v16 = vld [vmem:[#allocation2 + $0xc0] sm:$0xf]  ;;  %v2968_v2 = vld [vmem:[#allocation2 + $0xa8] sm:$0xe]  ;;  %6223 = vmatprep.mubr.bf16.mxu0 %v6399_v53 }
 0x217   : > { %v8218_v62 = vsel %vm400_vm1, %v5750_v22, %v7961_v6  ;;  %v2835_v28 = vsel %vm6631_vm13, %v2830_v56, %v2834_v55  ;;  %v5837_v13 = vcombine.low %v2505_v30, %v2508_v47  ;;  %v5709_v34 = vrot.slane %v1749_v3, 9  ;;  %v9112_v56 = vld [vmem:[#allocation22_spill] sm:$0xff]  ;;  %v8315_v53 = vld [vmem:[#allocation2 + $0xb4] sm:$0xf] }
 0x218   : > { %v1896_v51 = vrot.slane %v8220_v60, 5  ;;  %3266 = vrot.lane.b32.xlu1 %v5771_v7, %s6483_s11  ;;  %v5866_v27 = vcombine.low %v2825_v10, %v2835_v28  ;;  %v8228_v37 = vrot.slane %v2252_v58, 4  ;;  %v1899_v6 = vrot.slane %v8189_v42, 5  ;;  %v8240_v10 = vld [vmem:[#allocation2 + $0xc4] sm:$0xf] }
 0x219   : > { %v2220_v22 = vor.u32 %v7981_v25, %v7972_v11  ;;  %v8235_v20 = vrot.slane %v2255_v50, 5  ;;  %v5804_v3 = vcombine.low %v8183_v35, %v8199_v39  ;;  %v2216_v25 = vsel %vm6631_vm13, %v7977_v9, %v7972_v11  ;;  %v8252_v7 = vld [vmem:[#allocation2 + $0xb0] sm:$0x1]  ;;  %v6455_v55 = vld [vmem:[#allocation2 + $0x40] sm:$0xf] }
 0x21a   : > { %v1898_v30 = vrot.slane %v1896_v51, 4  ;;  %3776 = vrot.lane.b32.xlu0 %v5866_v27, %s6488_s18  ;;  %v1897_v47 = vsel %vm6623_vm10, %v5709_v34, %v1896_v51  ;;  %v3990_v50 = vsel %vm3982_vm6, %v8091_v4, %v9112_v56  ;;  %v9113_v34 = vld [vmem:[#allocation16_spill] sm:$0xff]  ;;  %v8260_v27 = vpop.permute.xlu0 %3692 }
 0x21b   : > { %v2221_v58 = vrot.slane %v2220_v22, 4  ;;  %v4023_v51 = vsel %vm4015_vm8, %v3990_v50, %v9113_v34  ;;  %v8269_v22 = vpop.permute.xlu1 %3690  ;;  %v3109_v34 = vrot.slane %v8252_v7, 5 }
 0x21c   : > { %v1900_v35 = vsel %vm6623_vm10, %v1898_v30, %v1899_v6  ;;  %3606 = vrot.lane.b32.xlu1 %v5837_v13, %s6485_s15  ;;  %v4056_v4 = vsel %vm4048_vm9, %v4023_v51, %v7730_v43  ;;  %v5740_v6 = vrot.slane %v2968_v2, 9  ;;  %v5807_v30 = vcombine.low %v8233_v16, %v8240_v10  ;;  %v1750_v51 = vld [vmem:[#allocation2 + $0xa8] sm:$0xe] }
 0x21d   : > { %v2226_v9 = vsel %vm6631_vm13, %v2221_v58, %v8143_v0  ;;  %v4089_v56 = vsel %vm4081_vm11, %v4056_v4, %v8031_v46  ;;  %v9114_v13 = vrot.slane %v8117_v26, 5  ;;  %v5789_v0 = vcombine.low %v1897_v47, %v1900_v35  ;;  %v1329_v35 = vld [vmem:[#allocation2 + $0xa8] sm:$0xf] }
 0x21e   : > { %3444 = vrot.lane.b32.xlu0 %v5804_v3, %s6484_s14  ;;  %v5818_v58 = vcombine.low %v2216_v25, %v2226_v9  ;;  %v4122_v43 = vsel %vm4114_vm12, %v4089_v56, %v7926_v32  ;;  %v2292_v2 = vor.u32 %v8087_v57, %v7994_v54  ;;  %v6456_v3 = vld [vmem:[#allocation2 + $0x3c] sm:$0xf]  ;;  %v1347_v25 = vld [vmem:[#allocation2 + $0xb0] sm:$0x1]  ;;  %v8294_v28 = vpop.permute.xlu0 %3768 }
 0x21f   : > { %v3108_v50 = vrot.slane %v9114_v13, 4  ;;  %v4152_v11 = vsel %vm4147_vm14, %v4122_v43, 0  ;;  %v9115_v46 = vmov %v9114_v13  ;;  %v2295_v13 = vshll.u32 %v8174_v49, 16  ;;  %v1330_v43 = vld [vmem:[#allocation2 + $0xac] sm:$0xf] }
 0x220   : > { %v3107_v4 = vsel %vm6623_vm10, %v5740_v6, %v9115_v46  ;;  %v5749_v47 = vcombine.low %v6456_v3, %v6455_v55  ;;  %3350 = vrot.lane.b32.xlu1 %v5789_v0, %s6482_s10  ;;  %v5894_v32 = vcombine.low %v4152_v11, %v4152_v11  ;;  %v5895_v9 = vcombine.high %v4152_v11, %v4152_v11  ;;  %v2967_v0 = vld [vmem:[#allocation2 + $0x9c] sm:$0xe] }
 0x221   : > { %v3110_v57 = vsel %vm6623_vm10, %v3108_v50, %v3109_v34  ;;  %v2293_v56 = vrot.slane %v2292_v2, 4  ;;  %v2297_v26 = vrot.slane %v2295_v13, 5  ;;  %v5710_v46 = vrot.slane %v1750_v51, 9  ;;  %v8301_v2 = vpop.permute.xlu1 %3766 }
 0x222   : > { %v3885_v6 = vsel %vm400_vm1, %v5749_v47, %v8055_v8  ;;  %v1903_v49 = vrot.slane %v1330_v43, 5  ;;  %3520 = vrot.lane.b32.xlu0 %v5818_v58, %s6487_s17  ;;  %4283 = vst [vmem:[#allocation3 + $0x18] sm:$0xf] %v5894_v32  ;;  %4284 = vst [vmem:[#allocation3 + $0x1c] sm:$0xf] %v5895_v9  ;;  %v2288_v55 = vsel %vm6631_vm13, %v8085_v15, %v7994_v54  ;;  %v1906_v11 = vrot.slane %v1347_v25, 5 }
 0x223   : > { %v1689_v50 = vshrl.u32 %v1329_v35, 16  ;;  %v1692_v34 = vshll.u32 %v1329_v35, 16  ;;  %v5884_v8 = vcombine.low %v3107_v4, %v3110_v57  ;;  %v2298_v51 = vsel %vm6631_vm13, %v2293_v56, %v2297_v26  ;;  %v2567_v35 = vld [vmem:[#allocation2 + $0xa4] sm:$0x1] }
 0x224   : > { %v3928_v58 = vsel %vm3916_vm3, %v3885_v6, %v7863_v36  ;;  %v1905_v13 = vrot.slane %v1903_v49, 4  ;;  %3450 = vrot.lane.b32.xlu1 %v5807_v30, %s6484_s14  ;;  %v1904_v3 = vsel %vm6623_vm10, %v5710_v46, %v1903_v49  ;;  %v1698_v47 = vshll.u32 %v1330_v43, 16 }
 0x225   : > { %v1691_v54 = vrot.slane %v1689_v50, 4  ;;  %v1694_v15 = vrot.slane %v1692_v34, 5  ;;  %v1702_v4 = vshrl.u32 %v1330_v43, 16  ;;  %v1708_v9 = vshll.u32 %v1347_v25, 16  ;;  %v8325_v34 = vld [vmem:[#allocation2 + $0xb8] sm:$0xf] }
 0x226   : > { %v1907_v32 = vsel %vm6623_vm10, %v1905_v13, %v1906_v11  ;;  %v5739_v57 = vrot.slane %v2967_v0, 9  ;;  %3860 = vrot.lane.b32.xlu0 %v5884_v8, %s6486_s16  ;;  %v5821_v56 = vcombine.low %v2288_v55, %v2298_v51  ;;  %v1700_v26 = vrot.slane %v1698_v47, 5  ;;  %v8327_v55 = vpop.permute.xlu0 %3436  ;;  %v8336_v47 = vpop.permute.xlu1 %3258 }
 0x227   : > { %v1695_v36 = vor.u32 %v1694_v15, %v1691_v54  ;;  %v9116_v30 = vrot.slane %v8065_v33, 5  ;;  %v9117_v46 = vshrl.u32 %v8233_v16, 16  ;;  %v9118_v50 = vshll.u32 %v8233_v16, 16  ;;  %v8334_v15 = vld [vmem:[#allocation2 + $0xa4] sm:$0x1] }
 0x228   : > { %v1704_v25 = vrot.slane %v1702_v4, 4  ;;  %v3102_v43 = vrot.slane %v2567_v35, 5  ;;  %3526 = vrot.lane.b32.xlu1 %v5821_v56, %s6487_s17  ;;  %v5790_v0 = vcombine.low %v1904_v3, %v1907_v32  ;;  %v1710_v51 = vrot.slane %v1708_v9, 5  ;;  %v2359_v16 = vld [vmem:[#allocation2 + $0x9c] sm:$0xe]  ;;  %v9120_v4 = vld [vmem:[#allocation20_spill] sm:$0xff] }
 0x229   : > { %v3101_v6 = vrot.slane %v9116_v30, 4  ;;  %v8319_v49 = vrot.slane %v9117_v46, 4  ;;  %v8323_v11 = vrot.slane %v9118_v50, 5  ;;  %v1696_v8 = vrot.slane %v1695_v36, 4  ;;  %v6401_v9 = vld [vmem:[#allocation3 + $0x18] sm:$0xff]  }
 0x22a   : > { %v9119_v13 = vmov %v9116_v30  ;;  %v8340_v30 = vsel %vm3949_vm4, %v3928_v58, %v9120_v4  ;;  %v1705_v46 = vor.u32 %v1704_v25, %v1700_v26  ;;  %v2885_v32 = vshrl.u32 %v8315_v53, 16  ;;  %3352 = vrot.lane.b32.xlu0 %v5790_v0, %s6482_s10  ;;  %6176 = vmatmul.mubr.bf16.gmra.mxu1 %v6401_v9 }
 0x22b   : > { %v3100_v54 = vsel %vm6623_vm10, %v5739_v57, %v9119_v13  ;;  %v3103_v3 = vsel %vm6623_vm10, %v3101_v6, %v3102_v43  ;;  %v1701_v33 = vsel %vm6631_vm13, %v1696_v8, %v1700_v26  ;;  %v2888_v57 = vshll.u32 %v8315_v53, 16  ;;  %v6402_v43 = vld [vmem:[#allocation3 + $0x18] sm:$0xff]  }
 0x22c   : > { %v5853_v58 = vcombine.low %v8315_v53, %v8325_v34  ;;  %v1706_v36 = vrot.slane %v1705_v46, 4  ;;  %v5883_v50 = vcombine.low %v3100_v54, %v3103_v3  ;;  %v5724_v25 = vrot.slane %v2359_v16, 9  ;;  %6224 = vmatmul.mubr.bf16.gmra.mxu0 %v6402_v43  ;;  %v8367_v46 = vpop.permute.xlu0 %3512 }
 0x22d   : > { %v2497_v6 = vrot.slane %v8199_v39, 5  ;;  %v2500_v13 = vrot.slane %v8334_v15, 5  ;;  %v2849_v26 = vsel %vm6631_vm13, %v8141_v14, %v8099_v1  ;;  %v2853_v0 = vor.u32 %v8101_v52, %v8099_v1 }
 0x22e   : > { %v2856_v8 = vshll.u32 %v2567_v35, 16  ;;  %v1711_v53 = vsel %vm6631_vm13, %v1706_v36, %v1710_v51  ;;  %v3992_v4 = vsel %vm3982_vm6, %v8205_v48, %v8075_v40  ;;  %3858 = vrot.lane.b32.xlu0 %v5883_v50, %s6486_s16  ;;  %v2552_v35 = vld [vmem:[#allocation2 + $0xc0] sm:$0xf]  ;;  %v8372_v51 = vpop.permute.xlu1 %3598  ;;  %v8374_v9 = vrot.slane %v2885_v32, 4  ;;  %v8385_v50 = vld [vmem:[#allocation2 + $0x9c] sm:$0xf] }
 0x22f   : > { %v2498_v54 = vsel %vm6623_vm10, %v5724_v25, %v2497_v6  ;;  %v2499_v16 = vrot.slane %v2497_v6, 4  ;;  %v5774_v3 = vcombine.low %v1701_v33, %v1711_v53  ;;  %v2854_v14 = vrot.slane %v2853_v0, 4  ;;  %v9121_v33 = vld [vmem:[#allocation24_spill] sm:$0xff]  ;;  %9122 = vst [vmem:[#allocation15_spill] sm:$0xff] %v8385_v50  ;;  %v9123_v6 = vld [vmem:[#allocation26_spill] sm:$0xff] }
 0x230   : > { %v2858_v1 = vrot.slane %v2856_v8, 5  ;;  %v4025_v52 = vsel %vm4015_vm8, %v3992_v4, %v7949_v45  ;;  %v8379_v40 = vsel %vm3916_vm3, %v8218_v62, %v7883_v41  ;;  %v8388_v45 = vrot.slane %v2888_v57, 5 }
 0x231   : > { %v2501_v48 = vsel %vm6623_vm10, %v2499_v16, %v2500_v13  ;;  %v4058_v36 = vsel %vm4048_vm9, %v4025_v52, %v9121_v33  ;;  %3272 = vrot.lane.b32.xlu1 %v5774_v3, %s6483_s11  ;;  %v8396_v13 = vld [vmem:[#allocation2 + $0xc4] sm:$0xf]  ;;  %v2909_v0 = vshrl.u32 %v2552_v35, 16  ;;  %v2912_v8 = vshll.u32 %v2552_v35, 16 }
 0x232   : > { %v5836_v25 = vcombine.low %v2498_v54, %v2501_v48  ;;  %v2859_v32 = vsel %vm6631_vm13, %v2854_v14, %v2858_v1  ;;  %v4091_v41 = vsel %vm4081_vm11, %v4058_v36, %v8026_v38  ;;  %v5854_v53 = vcombine.low %v2552_v35, %v8396_v13  ;;  %v2362_v14 = vld [vmem:[#allocation2 + $0xc0] sm:$0xe]  ;;  %v8405_v1 = vpop.permute.xlu0 %3852  ;;  %v8413_v36 = vld [vmem:[#allocation2 + $0xc8] sm:$0x1] }
 0x233   : > { %v5867_v62 = vcombine.low %v2849_v26, %v2859_v32  ;;  %v4124_v43 = vsel %vm4114_vm12, %v4091_v41, %v9123_v6  ;;  %v1665_v54 = vshrl.u32 %v8385_v50, 16  ;;  %v1668_v16 = vshll.u32 %v8385_v50, 16 }
 0x234   : > { %3604 = vrot.lane.b32.xlu0 %v5836_v25, %s6485_s15  ;;  %v4153_v57 = vsel %vm4147_vm14, %v4124_v43, 0  ;;  %v1674_v26 = vshll.u32 %v8220_v60, 16  ;;  %v1678_v3 = vshrl.u32 %v8220_v60, 16  ;;  %v1684_v33 = vshll.u32 %v8189_v42, 16  ;;  %v8415_v25 = vpop.permute.xlu1 %3342 }
 0x235   : > { %v5896_v4 = vcombine.low %v4153_v57, %v4153_v57  ;;  %v5897_v38 = vcombine.high %v4153_v57, %v4153_v57  ;;  %3702 = vrot.lane.b32.xlu1 %v5853_v58, %s6481_s9  ;;  %v1667_v52 = vrot.slane %v1665_v54, 4  ;;  %v1670_v48 = vrot.slane %v1668_v16, 5  ;;  %v8422_v57 = vld [vmem:[#allocation2 + $0xb4] sm:$0xf] }
 0x236   : > { %v2873_v35 = vsel %vm6631_vm13, %v8212_v19, %v8157_v17  ;;  %v1676_v60 = vrot.slane %v1674_v26, 5  ;;  %v1680_v32 = vrot.slane %v1678_v3, 4  ;;  %v2877_v58 = vor.u32 %v8214_v12, %v8157_v17 }
 0x237   : > { %4285 = vst [vmem:[#allocation3 + $0x20] sm:$0xf] %v5896_v4  ;;  %4286 = vst [vmem:[#allocation3 + $0x24] sm:$0xf] %v5897_v38  ;;  %v2880_v41 = vshll.u32 %v8252_v7, 16  ;;  %v1671_v42 = vor.u32 %v1670_v48, %v1667_v52  ;;  %v1686_v6 = vrot.slane %v1684_v33, 5  ;;  %v8434_v33 = vpop.permute.xlu0 %3344 }
 0x238   : > { %3704 = vrot.lane.b32.xlu0 %v5854_v53, %s6481_s9  ;;  %v5727_v43 = vrot.slane %v2362_v14, 9  ;;  %v2518_v19 = vrot.slane %v8240_v10, 5  ;;  %v1681_v54 = vor.u32 %v1680_v32, %v1676_v60  ;;  %v2878_v16 = vrot.slane %v2877_v58, 4  ;;  %v1751_v48 = vld [vmem:[#allocation2 + $0xb4] sm:$0xe] }
 0x239   : > { %v2882_v4 = vrot.slane %v2880_v41, 5  ;;  %v2521_v38 = vrot.slane %v8413_v36, 5  ;;  %3778 = vrot.lane.b32.xlu1 %v5867_v62, %s6488_s18  ;;  %v1672_v12 = vrot.slane %v1671_v42, 4  ;;  %v8429_v26 = vrot.slane %v2909_v0, 4  ;;  %v8442_v0 = vld [vmem:[#allocation2 + $0xbc] sm:$0x1]  ;;  %v8444_v42 = vpop.permute.xlu1 %3442 }
 0x23a   : > { %v2519_v7 = vsel %vm6623_vm10, %v5727_v43, %v2518_v19  ;;  %v2520_v53 = vrot.slane %v2518_v19, 4  ;;  %v1682_v3 = vrot.slane %v1681_v54, 4  ;;  %v2300_v52 = vshrl.u32 %v8422_v57, 16  ;;  %9124 = vst [vmem:[#allocation21_spill] sm:$0xff] %v8444_v42  ;;  %v8448_v54 = vld [vmem:[#allocation2 + $0x60] sm:$0xf] }
 0x23b   : > { %v2883_v14 = vsel %vm6631_vm13, %v2878_v16, %v2882_v4  ;;  %v8436_v32 = vrot.slane %v2912_v8, 5  ;;  %v1677_v62 = vsel %vm6631_vm13, %v1672_v12, %v1676_v60  ;;  %v8450_v16 = vld [vmem:[#allocation2 + $0x64] sm:$0xf]  ;;  %v8454_v60 = vld [vmem:[#allocation2 + $0xb8] sm:$0xf]  ;;  %v8478_v50 = vpop.permute.xlu0 %3850 }
 0x23c   : > { %v5868_v58 = vcombine.low %v2873_v35, %v2883_v14  ;;  %v2522_v41 = vsel %vm6623_vm10, %v2520_v53, %v2521_v38  ;;  %v1687_v43 = vsel %vm6631_vm13, %v1682_v3, %v1686_v6  ;;  %v8457_v4 = vld [vmem:[#allocation2 + $0xb8] sm:$0xf]  ;;  %v8460_v12 = vrot.slane %v2300_v52, 4 }
 0x23d   : > { %v5839_v19 = vcombine.low %v2519_v7, %v2522_v41  ;;  %v5773_v38 = vcombine.low %v1677_v62, %v1687_v43  ;;  %v5806_v6 = vcombine.low %v8422_v57, %v8454_v60  ;;  %v5711_v7 = vrot.slane %v1751_v48, 9  ;;  %v8483_v42 = vpop.permute.xlu1 %3518 }
 0x23e   : > { %3780 = vrot.lane.b32.xlu0 %v5868_v58, %s6488_s18  ;;  %v1910_v53 = vrot.slane %v8457_v4, 5  ;;  %v1913_v3 = vrot.slane %v8442_v0, 5  ;;  %v2258_v14 = vor.u32 %v8235_v20, %v8228_v37  ;;  %v2261_v41 = vshll.u32 %v8199_v39, 16  ;;  %v6405_v8 = vld [vmem:[#allocation3 + $0x20] sm:$0xff]  }
 0x23f   : > { %3270 = vrot.lane.b32.xlu1 %v5773_v38, %s6483_s11  ;;  %v9125_v62 = vshrl.u32 %v8199_v39, 16  ;;  %v2271_v58 = vshll.u32 %v8334_v15, 16  ;;  %v2330_v48 = vor.u32 %v8323_v11, %v8319_v49  ;;  %v2333_v43 = vshll.u32 %v8240_v10, 16  ;;  %v6406_v17 = vld [vmem:[#allocation3 + $0x20] sm:$0xff]   ;;  %6179 = vmatprep.mubr.bf16.mxu1 %v6405_v8  ;;  %v2969_v11 = vld [vmem:[#allocation2 + $0xb4] sm:$0xe] }
 0x240   : > { %v1911_v35 = vsel %vm6623_vm10, %v5711_v7, %v1910_v53  ;;  %v1912_v37 = vrot.slane %v1910_v53, 4  ;;  %v2259_v20 = vrot.slane %v2258_v14, 4  ;;  %v2263_v56 = vrot.slane %v2261_v41, 5  ;;  %6227 = vmatprep.mubr.bf16.mxu0 %v6406_v17  ;;  %v9127_v17 = vld [vmem:[#allocation28_spill] sm:$0xff] }
 0x241   : > { %v2267_v52 = vrot.slane %v9125_v62, 4  ;;  %v2273_v39 = vrot.slane %v2271_v58, 5  ;;  %v2331_v38 = vrot.slane %v2330_v48, 4  ;;  %v2335_v15 = vrot.slane %v2333_v43, 5 }
 0x242   : > { %3448 = vrot.lane.b32.xlu0 %v5806_v6, %s6484_s14  ;;  %v9126_v62 = vshrl.u32 %v8240_v10, 16  ;;  %v1914_v7 = vsel %vm6623_vm10, %v1912_v37, %v1913_v3  ;;  %v2264_v8 = vsel %vm6631_vm13, %v2259_v20, %v2263_v56  ;;  %v2343_v14 = vshll.u32 %v8413_v36, 16  ;;  %v2569_v6 = vld [vmem:[#allocation2 + $0xbc] sm:$0x1]  ;;  %v9129_v36 = vld [vmem:[#allocation30_spill] sm:$0xff] }
 0x243   : > { %v2268_v53 = vor.u32 %v2267_v52, %v2263_v56  ;;  %3610 = vrot.lane.b32.xlu1 %v5839_v19, %s6485_s15  ;;  %v5791_v41 = vcombine.low %v1911_v35, %v1914_v7  ;;  %v2336_v10 = vsel %vm6631_vm13, %v2331_v38, %v2335_v15  ;;  %v3994_v48 = vsel %vm3982_vm6, %v8340_v30, %v9127_v17  ;;  %v9128_v37 = vld [vmem:[#allocation25_spill] sm:$0xff]  ;;  %v8508_v7 = vpop.permute.xlu0 %3596 }
 0x244   : > { %v2339_v49 = vrot.slane %v9126_v62, 4  ;;  %v2345_v3 = vrot.slane %v2343_v14, 5  ;;  %v4027_v20 = vsel %vm4015_vm8, %v3994_v48, %v9128_v37  ;;  %v5741_v56 = vrot.slane %v2969_v11, 9 }
 0x245   : > { %v2269_v43 = vrot.slane %v2268_v53, 4  ;;  %v4060_v62 = vsel %vm4048_vm9, %v4027_v20, %v9129_v36  ;;  %v3113_v19 = vrot.slane %v8325_v34, 5  ;;  %v3116_v35 = vrot.slane %v2569_v6, 5  ;;  %v8525_v20 = vld [vmem:[#allocation2 + $0xb4] sm:$0xf] }
 0x246   : > { %v2340_v58 = vor.u32 %v2339_v49, %v2335_v15  ;;  %v4093_v15 = vsel %vm4081_vm11, %v4060_v62, %v8301_v2  ;;  %v2891_v30 = vor.u32 %v8388_v45, %v8374_v9  ;;  %v2894_v49 = vshll.u32 %v8325_v34, 16  ;;  %v2361_v2 = vld [vmem:[#allocation2 + $0xb4] sm:$0xe] }
 0x247   : > { %v2274_v38 = vsel %vm6631_vm13, %v2269_v43, %v2273_v39  ;;  %3354 = vrot.lane.b32.xlu1 %v5791_v41, %s6482_s10  ;;  %v4126_v14 = vsel %vm4114_vm12, %v4093_v15, %v8176_v63  ;;  %v3114_v39 = vsel %vm6623_vm10, %v5741_v56, %v3113_v19  ;;  %v3115_v17 = vrot.slane %v3113_v19, 4  ;;  %v8523_v63 = vld [vmem:[#allocation2 + $0xbc] sm:$0x1]  ;;  %s5999_s10 = sshll.u32 %s9149_s25, 8 }
 0x248   : > { %v2341_v52 = vrot.slane %v2340_v58, 4  ;;  %v5820_v11 = vcombine.low %v2264_v8, %v2274_v38  ;;  %v8517_v58 = vpop.permute.xlu1 %3264  ;;  %v4154_v45 = vsel %vm4147_vm14, %v4126_v14, 0  ;;  %v2892_v48 = vrot.slane %v2891_v30, 4 }
 0x249   : > { %v5898_v8 = vcombine.low %v4154_v45, %v4154_v45  ;;  %v5899_v41 = vcombine.high %v4154_v45, %v4154_v45  ;;  %v2896_v43 = vrot.slane %v2894_v49, 5  ;;  %v9131_v56 = vshll.u32 %v8422_v57, 16  ;;  %v6459_v49 = vld [vmem:[#allocation2 + $0x58] sm:$0xf]  ;;  %v6460_v57 = vld [vmem:[#allocation2 + $0x54] sm:$0xf] }
 0x24a   : > { %v2346_v53 = vsel %vm6631_vm13, %v2341_v52, %v2345_v3  ;;  %3524 = vrot.lane.b32.xlu0 %v5820_v11, %s6487_s17  ;;  %v9130_v3 = vshrl.u32 %v8325_v34, 16  ;;  %v2904_v36 = vshll.u32 %v2569_v6, 16  ;;  %v5726_v62 = vrot.slane %v2361_v2, 9  ;;  %v8538_v6 = vpop.permute.xlu0 %3696 }
 0x24b   : > { %v5823_v9 = vcombine.low %v2336_v10, %v2346_v53  ;;  %v8529_v52 = vrot.slane %v9131_v56, 5  ;;  %v3117_v10 = vsel %vm6623_vm10, %v3115_v17, %v3116_v35  ;;  %v2313_v19 = vshrl.u32 %v8454_v60, 16  ;;  %4287 = vst [vmem:[#allocation3 + $0x28] sm:$0xf] %v5898_v8  ;;  %4288 = vst [vmem:[#allocation3 + $0x2c] sm:$0xf] %v5899_v41 }
 0x24c   : > { %v2900_v37 = vrot.slane %v9130_v3, 4  ;;  %v5885_v34 = vcombine.low %v3114_v39, %v3117_v10  ;;  %v2511_v15 = vrot.slane %v8454_v60, 5  ;;  %v2906_v30 = vrot.slane %v2904_v36, 5  ;;  %v8545_v45 = vpop.permute.xlu1 %3694  ;;  %v8557_v10 = vld [vmem:[#allocation2 + $0xc8] sm:$0x1] }
 0x24d   : > { %3530 = vrot.lane.b32.xlu1 %v5823_v9, %s6487_s17  ;;  %v5751_v11 = vcombine.low %v6460_v57, %v6459_v49  ;;  %v2514_v53 = vrot.slane %v8523_v63, 5  ;;  %v1713_v35 = vshrl.u32 %v8525_v20, 16  ;;  %v2897_v14 = vsel %vm6631_vm13, %v2892_v48, %v2896_v43  ;;  %v781_v36 = vld [vmem:[#allocation2 + $0xd4] sm:$0x1] }
 0x24e   : > { %v2901_v38 = vor.u32 %v2900_v37, %v2896_v43  ;;  %3862 = vrot.lane.b32.xlu0 %v5885_v34, %s6486_s16  ;;  %v2512_v39 = vsel %vm6623_vm10, %v5726_v62, %v2511_v15  ;;  %v2513_v9 = vrot.slane %v2511_v15, 4  ;;  %v1716_v41 = vshll.u32 %v8525_v20, 16 }
 0x24f   : > { %v3891_v17 = vsel %vm400_vm1, %v5751_v11, %v8336_v47  ;;  %v1715_v8 = vrot.slane %v1713_v35, 4  ;;  %v1722_v3 = vshll.u32 %v8457_v4, 16  ;;  %v1726_v43 = vshrl.u32 %v8457_v4, 16 }
 0x250   : > { %v2902_v2 = vrot.slane %v2901_v38, 4  ;;  %v2515_v48 = vsel %vm6623_vm10, %v2513_v9, %v2514_v53  ;;  %v1732_v56 = vshll.u32 %v8442_v0, 16  ;;  %v1718_v34 = vrot.slane %v1716_v41, 5  ;;  %v8569_v9 = vpop.permute.xlu0 %3772 }
 0x251   : > { %v5838_v47 = vcombine.low %v2512_v39, %v2515_v48  ;;  %v1724_v38 = vrot.slane %v1722_v3, 5  ;;  %v1728_v15 = vrot.slane %v1726_v43, 4  ;;  %v2915_v57 = vor.u32 %v8436_v32, %v8429_v26  ;;  %v9134_v3 = vld [vmem:[#allocation7_spill] sm:$0xff]  ;;  %v8575_v48 = vpop.permute.xlu1 %3770  ;;  %v9136_v43 = vld [vmem:[#allocation8_spill] sm:$0xff] }
 0x252   : > { %v2907_v37 = vsel %vm6631_vm13, %v2902_v2, %v2906_v30  ;;  %v1734_v49 = vrot.slane %v1732_v56, 5  ;;  %v2918_v30 = vshll.u32 %v8396_v13, 16  ;;  %v1719_v11 = vor.u32 %v1718_v34, %v1715_v8  ;;  %v6407_v39 = vld [vmem:[#allocation3 + $0x28] sm:$0xff]  }
 0x253   : > { %v5869_v62 = vcombine.low %v2897_v14, %v2907_v37  ;;  %3608 = vrot.lane.b32.xlu0 %v5838_v47, %s6485_s15  ;;  %v9132_v0 = vshrl.u32 %v8396_v13, 16  ;;  %v2928_v35 = vshll.u32 %v8557_v10, 16  ;;  %v782_v2 = vsel %vm6592_vm7, 0, %v781_v36  ;;  %v9135_v37 = vld [vmem:[#allocation10_spill] sm:$0xff]  ;;  %v9138_v36 = vld [vmem:[#allocation12_spill] sm:$0xff]  ;;  %6180 = vmatmul.mubr.bf16.gmra.mxu1 %v6407_v39  ;;  %v9140_v39 = vld [vmem:[#allocation27_spill] sm:$0xff]  ;;  %s8922_s15 = scalar_lea.vmem %s9029_s7, %s5999_s10 }
 0x254   : > { %v1729_v41 = vor.u32 %v1728_v15, %v1724_v38  ;;  %v2916_v26 = vrot.slane %v2915_v57, 4  ;;  %v2920_v32 = vrot.slane %v2918_v30, 5  ;;  %783 = vst [vmem:[#allocation2 + $0xd4] sm:$0x1] %v782_v2  ;;  %v2945_v8 = vsel %vm6631_vm13, %v9135_v37, %v9134_v3  ;;  %v6408_v57 = vld [vmem:[#allocation3 + $0x28] sm:$0xff]  }
 0x255   : > { %3782 = vrot.lane.b32.xlu1 %v5869_v62, %s6488_s18  ;;  %v2924_v53 = vrot.slane %v9132_v0, 4  ;;  %v9137_v56 = vor.u32 %v9136_v43, %v9134_v3  ;;  %v3963_v47 = vsel %vm3949_vm4, %v8379_v40, %v9138_v36  ;;  %v1720_v34 = vrot.slane %v1719_v11, 4  ;;  %6228 = vmatmul.mubr.bf16.gmra.mxu0 %v6408_v57  ;;  %v8617_v36 = vpop.permute.xlu1 %3262  ;;  %v9141_v57 = vld [vmem:[#allocation29_spill] sm:$0xff] }
 0x256   : > { %v2306_v15 = vor.u32 %v8529_v52, %v8460_v12  ;;  %v9139_v30 = vcombine.low %v8448_v54, %v8450_v16  ;;  %v1730_v14 = vrot.slane %v1729_v41, 4  ;;  %v2930_v43 = vrot.slane %v2928_v35, 5  ;;  %v2971_v16 = vld [vmem:[#allocation2 + $0xcc] sm:$0xe] }
 0x257   : > { %v8580_v62 = vrot.slane %v9137_v56, 4  ;;  %v2925_v2 = vor.u32 %v2924_v53, %v2920_v32  ;;  %v6425_v56 = vld [vmem:[%s9027_s5 + $0x38] sm:$0xff]   ;;  %v3932_v40 = vsel %vm3916_vm3, %v3891_v17, %v8119_v31  ;;  %v1725_v12 = vsel %vm6631_vm13, %v1720_v34, %v1724_v38 }
 0x258   : > { %v3894_v0 = vsel %vm400_vm1, %v9139_v30, %v8222_v21  ;;  %v2309_v52 = vshll.u32 %v8454_v60, 16  ;;  %v2315_v54 = vrot.slane %v2313_v19, 4  ;;  %v1735_v21 = vsel %vm6631_vm13, %v1730_v14, %v1734_v49  ;;  %6251 = vmatprep.subr.bf16.mxu0 %v6425_v56  ;;  %6299 = vmatprep.subr.bf16.mxu1 %v6425_v56  ;;  %v8609_v19 = vpop.permute.xlu0 %3440 }
 0x259   : > { %v2921_v11 = vsel %vm6631_vm13, %v2916_v26, %v2920_v32  ;;  %v2926_v53 = vrot.slane %v2925_v2, 4  ;;  %v2319_v35 = vshll.u32 %v8523_v63, 16  ;;  %v5775_v31 = vcombine.low %v1725_v12, %v1735_v21  ;;  %6252 = vmatpush3.bf16.msra.mxu0 %v6425_v56  ;;  %6307 = vmatpush3.bf16.msra.mxu1 %v6425_v56  ;;  %v2970_v32 = vld [vmem:[#allocation2 + $0xc0] sm:$0xe] }
 0x25a   : > { %v2307_v17 = vrot.slane %v2306_v15, 4  ;;  %v2311_v38 = vrot.slane %v2309_v52, 5  ;;  %v3996_v60 = vsel %vm3982_vm6, %v3963_v47, %v8367_v46  ;;  %v3965_v49 = vsel %vm3949_vm4, %v3932_v40, %v9140_v39 }
 0x25b   : > { %v2931_v41 = vsel %vm6631_vm13, %v2926_v53, %v2930_v43  ;;  %v5743_v26 = vrot.slane %v2971_v16, 9  ;;  %v4029_v63 = vsel %vm4015_vm8, %v3996_v60, %v8210_v23  ;;  %3274 = vrot.lane.b32.xlu1 %v5775_v31, %s6483_s11  ;;  %v2571_v47 = vld [vmem:[#allocation2 + $0xd4] sm:$0x1]  ;;  %v2321_v15 = vrot.slane %v2319_v35, 5  ;;  %v9142_v53 = vld [vmem:[#allocation6_spill] sm:$0xff] }
 0x25c   : > { %v5870_v46 = vcombine.low %v2921_v11, %v2931_v41  ;;  %v2316_v34 = vor.u32 %v2315_v54, %v2311_v38  ;;  %v4062_v30 = vsel %vm4048_vm9, %v4029_v63, %v9141_v57  ;;  %v2952_v14 = vshll.u32 %v2571_v47, 16  ;;  %v8649_v41 = vpop.permute.xlu1 %3602 }
 0x25d   : > { %v3130_v2 = vrot.slane %v2571_v47, 5  ;;  %v4095_v43 = vsel %vm4081_vm11, %v4062_v30, %v8294_v28  ;;  %v3120_v56 = vrot.slane %v8396_v13, 5  ;;  %v2312_v23 = vsel %vm6631_vm13, %v2307_v17, %v2311_v38  ;;  %v6430_v13 = vld [vmem:[%s9027_s5 + $0x30] sm:$0xff]   ;;  %v3517_v38 = vpop.permute.xlu0 %3516 }
 0x25e   : > { %3784 = vrot.lane.b32.xlu0 %v5870_v46, %s6488_s18  ;;  %v2317_v40 = vrot.slane %v2316_v34, 4  ;;  %v4128_v12 = vsel %vm4114_vm12, %v4095_v43, %v8110_v61  ;;  %v5742_v52 = vrot.slane %v2970_v32, 9  ;;  %v2954_v54 = vrot.slane %v2952_v14, 5  ;;  %6253 = vmatprep.subr.bf16.mxu0 %v6430_v13 }
 0x25f   : > { %v3934_v16 = vsel %vm3916_vm3, %v3894_v0, %v8149_v29  ;;  %v4155_v21 = vsel %vm4147_vm14, %v4128_v12, 0  ;;  %v3123_v28 = vrot.slane %v8557_v10, 5  ;;  %v9143_v35 = vrot.slane %v9142_v53, 5  ;;  %v9144_v0 = vld [vmem:[#allocation9_spill] sm:$0xff]  ;;  %6300 = vmatprep.subr.bf16.mxu1 %v6430_v13  ;;  %6254 = vmatpush3.bf16.msra.mxu0 %v6430_v13 }
 0x260   : > { %v2322_v11 = vsel %vm6631_vm13, %v2317_v40, %v2321_v15  ;;  %v5900_v31 = vcombine.low %v4155_v21, %v4155_v21  ;;  %v5901_v17 = vcombine.high %v4155_v21, %v4155_v21  ;;  %v2955_v29 = vsel %vm6631_vm13, %v8580_v62, %v2954_v54  ;;  %6308 = vmatpush3.bf16.msra.mxu1 %v6430_v13  ;;  %v6439_v40 = vld [vmem:[%s9027_s5 + $0x8] sm:$0xff]   ;;  %v6440_v54 = vld [vmem:[%s9027_s5] sm:$0xff]   ;;  %v6461_v21 = vld [vmem:[#allocation2 + $0x70] sm:$0xf] }
 0x261   : > { %v3128_v61 = vsel %vm6623_vm10, %v5743_v26, %v9143_v35  ;;  %v5822_v10 = vcombine.low %v2312_v23, %v2322_v11  ;;  %v3131_v60 = vsel %vm6623_vm10, %v9144_v0, %v3130_v2  ;;  %v3122_v39 = vrot.slane %v3120_v56, 4  ;;  %v6431_v26 = vld [vmem:[%s9027_s5 + $0x28] sm:$0xff]  }
 0x262   : > { %v5871_v62 = vcombine.low %v2945_v8, %v2955_v29  ;;  %v3967_v63 = vsel %vm3949_vm4, %v3934_v16, %v8327_v55  ;;  %4289 = vst [vmem:[#allocation3 + $0x30] sm:$0xf] %v5900_v31  ;;  %4290 = vst [vmem:[#allocation3 + $0x34] sm:$0xf] %v5901_v17  ;;  %v3121_v32 = vsel %vm6623_vm10, %v5742_v52, %v3120_v56  ;;  %v6432_v55 = vld [vmem:[%s9027_s5 + $0x20] sm:$0xff]   ;;  %6255 = vmatprep.subr.bf16.mxu0 %v6431_v26  ;;  %v6438_v56 = vld [vmem:[%s9027_s5 + $0x10] sm:$0xff]  }
 0x263   : > { %v3998_v46 = vsel %vm3982_vm6, %v3965_v49, %v8179_v44  ;;  %3528 = vrot.lane.b32.xlu0 %v5822_v10, %s6487_s17  ;;  %v3124_v5 = vsel %vm6623_vm10, %v3122_v39, %v3123_v28  ;;  %v4000_v37 = vsel %vm3982_vm6, %v3967_v63, %v3517_v38  ;;  %v5887_v8 = vcombine.low %v3128_v61, %v3131_v60  ;;  %v6462_v28 = vld [vmem:[#allocation2 + $0x6c] sm:$0xf] }
 0x264   : > { %v4031_v3 = vsel %vm4015_vm8, %v3998_v46, %v8080_v24  ;;  %3786 = vrot.lane.b32.xlu1 %v5871_v62, %s6488_s18  ;;  %v4033_v49 = vsel %vm4015_vm8, %v4000_v37, %v8508_v7  ;;  %v5886_v59 = vcombine.low %v3121_v32, %v3124_v5  ;;  %6256 = vmatpush3.bf16.msra.mxu0 %v6431_v26  ;;  %v8689_v7 = vpop.permute.xlu1 %3346  ;;  %v6464_v37 = vld [vmem:[#allocation2 + $0x7c] sm:$0xf] }
 0x265   : > { %v4064_v44 = vsel %vm4048_vm9, %v4031_v3, %v8269_v22  ;;  %v4066_v24 = vsel %vm4048_vm9, %v4033_v49, %v8260_v27  ;;  %6257 = vmatprep.subr.bf16.mxu0 %v6432_v55  ;;  %v6433_v27 = vld [vmem:[%s9027_s5 + $0x18] sm:$0xff]   ;;  %6301 = vmatprep.subr.bf16.mxu1 %v6431_v26  ;;  %v5753_v13 = vcombine.low %v6462_v28, %v6461_v21 }
 0x266   : > { %v4097_v47 = vsel %vm4081_vm11, %v4064_v44, %v8575_v48  ;;  %v4099_v15 = vsel %vm4081_vm11, %v4066_v24, %v8569_v9  ;;  %6309 = vmatpush3.bf16.msra.mxu1 %v6431_v26  ;;  %v8708_v52 = vpop.permute.xlu0 %3856 }
 0x267   : > { %v4130_v34 = vsel %vm4114_vm12, %v4097_v47, %v8478_v50  ;;  %3864 = vrot.lane.b32.xlu0 %v5886_v59, %s6486_s16  ;;  %v4132_v48 = vsel %vm4114_vm12, %v4099_v15, %v8405_v1  ;;  %v5759_v1 = vcombine.low %v8525_v20, %v8457_v4  ;;  %6302 = vmatprep.subr.bf16.mxu1 %v6432_v55 }
 0x268   : > { %v4156_v22 = vsel %vm4147_vm14, %v4130_v34, 0  ;;  %3866 = vrot.lane.b32.xlu1 %v5887_v8, %s6486_s16  ;;  %v4157_v9 = vsel %vm4147_vm14, %v4132_v48, 0  ;;  %6258 = vmatpush3.bf16.msra.mxu0 %v6432_v55  ;;  %v8703_v23 = vpop.permute.xlu1 %3446  ;;  %v3897_v61 = vsel %vm400_vm1, %v5753_v13, %v8617_v36 }
 0x269   : > { %v5902_v50 = vcombine.low %v4156_v22, %v4156_v22  ;;  %v5903_v57 = vcombine.high %v4156_v22, %v4156_v22  ;;  %v6409_v30 = vld [vmem:[#allocation3 + $0x30] sm:$0xff]   ;;  %v5904_v14 = vcombine.low %v4157_v9, %v4157_v9  ;;  %v5905_v2 = vcombine.high %v4157_v9, %v4157_v9  ;;  %6259 = vmatprep.subr.bf16.mxu0 %v6433_v27 }
 0x26a   : > { %v6410_v43 = vld [vmem:[#allocation3 + $0x30] sm:$0xff]   ;;  %6183 = vmatprep.mubr.bf16.mxu1 %v6409_v30  ;;  %6310 = vmatpush3.bf16.msra.mxu1 %v6432_v55  ;;  %v3936_v17 = vsel %vm3916_vm3, %v3897_v61, %v8415_v25  ;;  %v6466_v30 = vld [vmem:[#allocation2 + $0x84] sm:$0xf] }
 0x26b   : > { %4291 = vst [vmem:[#allocation3 + $0x38] sm:$0xf] %v5902_v50  ;;  %4292 = vst [vmem:[#allocation3 + $0x3c] sm:$0xf] %v5903_v57  ;;  %6231 = vmatprep.mubr.bf16.mxu0 %v6410_v43  ;;  %6303 = vmatprep.subr.bf16.mxu1 %v6433_v27  ;;  %v3969_v29 = vsel %vm3949_vm4, %v3936_v17, %v8155_v18  ;;  %v6465_v9 = vld [vmem:[#allocation2 + $0x88] sm:$0xf] }
 0x26c   : > { %4293 = vst [vmem:[#allocation3 + $0x40] sm:$0xf] %v5904_v14  ;;  %4294 = vst [vmem:[#allocation3 + $0x44] sm:$0xf] %v5905_v2  ;;  %6260 = vmatpush3.bf16.msra.mxu0 %v6433_v27  ;;  %v4002_v0 = vsel %vm3982_vm6, %v3969_v29, %v8483_v42 }
 0x26d   : > { %6261 = vmatprep.subr.bf16.mxu0 %v6438_v56  ;;  %v8717_v31 = vpop.permute.xlu0 %3348  ;;  %v4035_v25 = vsel %vm4015_vm8, %v4002_v0, %v8372_v51  ;;  %v6463_v51 = vld [vmem:[#allocation2 + $0x78] sm:$0xf] }
 0x26e   : > { %6311 = vmatpush3.bf16.msra.mxu1 %v6433_v27  ;;  %v4068_v39 = vsel %vm4048_vm9, %v4035_v25, %v8545_v45  ;;  %v5754_v55 = vcombine.low %v6463_v51, %v6464_v37 }
 0x26f   : > { %v8713_v11 = vpop.permute.xlu1 %3522  ;;  %6304 = vmatprep.subr.bf16.mxu1 %v6438_v56 }
 0x270   : > { %6262 = vmatpush3.bf16.msra.mxu0 %v6438_v56  ;;  %v3900_v49 = vsel %vm400_vm1, %v5754_v55, %v8517_v58 }
 0x271   : > { %6263 = vmatprep.subr.bf16.mxu0 %v6439_v40  ;;  %v3938_v24 = vsel %vm3916_vm3, %v3900_v49, %v8434_v33  ;;  %v5755_v33 = vcombine.low %v6466_v30, %v6465_v9 }
 0x272   : > { %v6411_v12 = vld [vmem:[#allocation3 + $0x38] sm:$0xff]   ;;  %6312 = vmatpush3.bf16.msra.mxu1 %v6438_v56  ;;  %v3971_v34 = vsel %vm3949_vm4, %v3938_v24, %v8609_v19 }
 0x273   : > { %v6412_v16 = vld [vmem:[#allocation3 + $0x38] sm:$0xff]   ;;  %6184 = vmatmul.mubr.bf16.gmra.mxu1 %v6411_v12  ;;  %v6414_v53 = vld [vmem:[#allocation3 + $0x40] sm:$0xff]   ;;  %6305 = vmatprep.subr.bf16.mxu1 %v6439_v40 }
 0x274   : > { %6232 = vmatmul.mubr.bf16.gmra.mxu0 %v6412_v16  ;;  %v6415_v35 = vld [vmem:[#allocation3 + $0x40] sm:$0xff]   ;;  %6187 = vmatprep.mubr.bf16.mxu1 %v6414_v53 }
 0x275   : > { %6235 = vmatprep.mubr.bf16.mxu0 %v6415_v35  ;;  %6264 = vmatpush3.bf16.msra.mxu0 %v6439_v40  ;;  %v8721_v38 = vpop.permute.xlu1 %3268  ;;  %v3855_v36 = vpop.permute.xlu0 %3854  ;;  %v9145_v16 = vld [vmem:[#allocation21_spill] sm:$0xff] }
 0x276   : > { %6265 = vmatprep.subr.bf16.mxu0 %v6440_v54  ;;  %6313 = vmatpush3.bf16.msra.mxu1 %v6439_v40 }
 0x277   : > { %6306 = vmatprep.subr.bf16.mxu1 %v6440_v54 }
 0x279   : > { %6266 = vmatpush3.bf16.msra.mxu0 %v6440_v54  ;;  %v8725_v10 = vpop.permute.xlu1 %3698 }
 0x27a   : > { %6314 = vmatpush3.bf16.msra.mxu1 %v6440_v54 }
 0x27b   : > { %v3601_v60 = vpop.permute.xlu0 %3600 }
 0x27f   : > { %v8736_v5 = vpop.permute.xlu0 %3700 }
 0x280   : > { %v3775_v26 = vpop.permute.xlu1 %3774 }
 0x281   : > { %v4101_v62 = vsel %vm4081_vm11, %v4068_v39, %v3775_v26 }
 0x282   : > { %v4134_v18 = vsel %vm4114_vm12, %v4101_v62, %v3855_v36 }
 0x283   : > { %v4158_v63 = vsel %vm4147_vm14, %v4134_v18, 0  ;;  %v9146_v18 = vld [vmem:[#allocation15_spill] sm:$0xff] }
 0x284   : > { %v5906_v32 = vcombine.low %v4158_v63, %v4158_v63  ;;  %v5907_v46 = vcombine.high %v4158_v63, %v4158_v63 }
 0x286   : > { %4295 = vst [vmem:[#allocation3 + $0x48] sm:$0xf] %v5906_v32  ;;  %4296 = vst [vmem:[#allocation3 + $0x4c] sm:$0xf] %v5907_v46  ;;  %v6468_v32 = vld [vmem:[#allocation2 + $0x94] sm:$0xf] }
 0x287   : > { %v6469_v46 = vld [vmem:[#allocation2 + $0x90] sm:$0xf] }
 0x28a   : > { %v3267_v42 = vpop.permute.xlu1 %3266 }
 0x28b   : > { %v3903_v2 = vsel %vm400_vm1, %v5755_v33, %v3267_v42  ;;  %v5756_v42 = vcombine.low %v6469_v46, %v6468_v32 }
 0x28c   : > { %v3777_v3 = vpop.permute.xlu0 %3776 }
 0x28d   : > { %v6416_v45 = vld [vmem:[#allocation3 + $0x48] sm:$0xff]   ;;  %v3906_v37 = vsel %vm400_vm1, %v5756_v42, %v8721_v38 }
 0x28e   : > { %v8738_v8 = vpop.permute.xlu1 %3606  ;;  %v6417_v44 = vld [vmem:[#allocation3 + $0x48] sm:$0xff]   ;;  %6188 = vmatmul.mubr.bf16.gmra.mxu1 %v6416_v45  ;;  %v3942_v24 = vsel %vm3916_vm3, %v3906_v37, %v8717_v31 }
 0x28f   : > { %6236 = vmatmul.mubr.bf16.gmra.mxu0 %v6417_v44 }
 0x290   : > { %v8742_v59 = vpop.permute.xlu0 %3444 }
 0x292   : > { %v3351_v47 = vpop.permute.xlu1 %3350 }
 0x294   : > { %v3521_v15 = vpop.permute.xlu0 %3520 }
 0x295   : > { %v4004_v22 = vsel %vm3982_vm6, %v3971_v34, %v3521_v15  ;;  %v3975_v34 = vsel %vm3949_vm4, %v3942_v24, %v8742_v59 }
 0x296   : > { %v4037_v48 = vsel %vm4015_vm8, %v4004_v22, %v3601_v60  ;;  %v8750_v27 = vpop.permute.xlu1 %3450 }
 0x297   : > { %v4070_v58 = vsel %vm4048_vm9, %v4037_v48, %v8538_v6  ;;  %v3940_v6 = vsel %vm3916_vm3, %v3903_v2, %v8689_v7 }
 0x298   : > { %v4103_v50 = vsel %vm4081_vm11, %v4070_v58, %v3777_v3  ;;  %v8755_v57 = vpop.permute.xlu0 %3860  ;;  %v3973_v21 = vsel %vm3949_vm4, %v3940_v6, %v9145_v16 }
 0x299   : > { %v4136_v19 = vsel %vm4114_vm12, %v4103_v50, %v8708_v52  ;;  %v4006_v13 = vsel %vm3982_vm6, %v3973_v21, %v8713_v11 }
 0x29a   : > { %v4159_v14 = vsel %vm4147_vm14, %v4136_v19, 0  ;;  %v3527_v40 = vpop.permute.xlu1 %3526  ;;  %v4039_v17 = vsel %vm4015_vm8, %v4006_v13, %v8649_v41  ;;  %v6467_v41 = vld [vmem:[#allocation2 + $0xa0] sm:$0xf]  ;;  %v6470_v13 = vld [vmem:[#allocation2 + $0xa8] sm:$0xf] }
 0x29b   : > { %v5908_v43 = vcombine.low %v4159_v14, %v4159_v14  ;;  %v5909_v56 = vcombine.high %v4159_v14, %v4159_v14  ;;  %v4072_v7 = vsel %vm4048_vm9, %v4039_v17, %v8725_v10  ;;  %v5757_v63 = vcombine.low %v9146_v18, %v6467_v41  ;;  %v9147_v18 = vld [vmem:[#allocation11_spill] sm:$0xff] }
 0x29c   : > { %v8761_v12 = vpop.permute.xlu0 %3352 }
 0x29d   : > { %4297 = vst [vmem:[#allocation3 + $0x50] sm:$0xf] %v5908_v43  ;;  %4298 = vst [vmem:[#allocation3 + $0x54] sm:$0xf] %v5909_v56 }
 0x2a0   : > { %v3859_v54 = vpop.permute.xlu0 %3858 }
 0x2a3   : > { %v8767_v28 = vpop.permute.xlu1 %3272 }
 0x2a4   : > { %v6419_v53 = vld [vmem:[#allocation3 + $0x50] sm:$0xff]  }
 0x2a5   : > { %v6420_v35 = vld [vmem:[#allocation3 + $0x50] sm:$0xff]   ;;  %6191 = vmatprep.mubr.bf16.mxu1 %v6419_v53 }
 0x2a6   : > { %v3605_v52 = vpop.permute.xlu0 %3604  ;;  %6239 = vmatprep.mubr.bf16.mxu0 %v6420_v35  ;;  %v6471_v53 = vld [vmem:[#allocation2 + $0xac] sm:$0xf] }
 0x2a7   : > { %v3703_v61 = vpop.permute.xlu1 %3702  ;;  %v5758_v35 = vcombine.low %v6470_v13, %v6471_v53 }
 0x2aa   : > { %v8773_v29 = vpop.permute.xlu0 %3704 }
 0x2ab   : > { %v3779_v36 = vpop.permute.xlu1 %3778 }
 0x2ac   : > { %v4105_v0 = vsel %vm4081_vm11, %v4072_v7, %v3779_v36 }
 0x2ad   : > { %v4138_v25 = vsel %vm4114_vm12, %v4105_v0, %v3859_v54 }
 0x2ae   : > { %v4160_v11 = vsel %vm4147_vm14, %v4138_v25, 0  ;;  %v3912_v25 = vsel %vm400_vm1, %v5758_v35, %v8767_v28 }
 0x2af   : > { %v5910_v60 = vcombine.low %v4160_v11, %v4160_v11  ;;  %v5911_v39 = vcombine.high %v4160_v11, %v4160_v11  ;;  %v3946_v20 = vsel %vm3916_vm3, %v3912_v25, %v8761_v12 }
 0x2b0   : > { %v3781_v26 = vpop.permute.xlu0 %3780 }
 0x2b1   : > { %4299 = vst [vmem:[#allocation3 + $0x58] sm:$0xf] %v5910_v60  ;;  %4300 = vst [vmem:[#allocation3 + $0x5c] sm:$0xf] %v5911_v39  ;;  %v3271_v62 = vpop.permute.xlu1 %3270 }
 0x2b2   : > { %v3909_v10 = vsel %vm400_vm1, %v5757_v63, %v3271_v62 }
 0x2b3   : > { %v3944_v55 = vsel %vm3916_vm3, %v3909_v10, %v3351_v47 }
 0x2b4   : > { %v3449_v51 = vpop.permute.xlu0 %3448  ;;  %v3977_v15 = vsel %vm3949_vm4, %v3944_v55, %v8703_v23 }
 0x2b5   : > { %v3611_v3 = vpop.permute.xlu1 %3610  ;;  %v4010_v50 = vsel %vm3982_vm6, %v3977_v15, %v3527_v40  ;;  %v3979_v41 = vsel %vm3949_vm4, %v3946_v20, %v3449_v51 }
 0x2b6   : > { %v4043_v23 = vsel %vm4015_vm8, %v4010_v50, %v8738_v8 }
 0x2b8   : > { %v6422_v45 = vld [vmem:[#allocation3 + $0x58] sm:$0xff]  }
 0x2b9   : > { %v3355_v44 = vpop.permute.xlu1 %3354  ;;  %v6423_v49 = vld [vmem:[#allocation3 + $0x58] sm:$0xff]   ;;  %6192 = vmatmul.mubr.bf16.gmra.mxu1 %v6422_v45 }
 0x2ba   : > { %6240 = vmatmul.mubr.bf16.gmra.mxu0 %v6423_v49  ;;  %v8841_v49 = vld [vmem:[%s9026_s4 + $0x1] ss:$0 sm:$0xff] }
 0x2bb   : > { %v8808_v8 = vpop.f32.mrf.mxu0 }
 0x2bc   : > { %v3525_v22 = vpop.permute.xlu0 %3524  ;;  %v8806_v54 = vpop.f32.mrf.mxu1 }
 0x2bd   : > { %v4008_v48 = vsel %vm3982_vm6, %v3975_v34, %v3525_v22  ;;  %v4968_v0 = vpop.f32.mrf.mxu0 }
 0x2be   : > { %v4041_v38 = vsel %vm4015_vm8, %v4008_v48, %v3605_v52  ;;  %v4542_v17 = vpop.f32.mrf.mxu1 }
 0x2bf   : > { %v4074_v47 = vsel %vm4048_vm9, %v4041_v38, %v8736_v5  ;;  %v3531_v58 = vpop.permute.xlu1 %3530  ;;  %v4076_v5 = vsel %vm4048_vm9, %v4043_v23, %v3703_v61  ;;  %v6222_v62 = vpop.f32.mrf.mxu0 }
 0x2c0   : > { %v4107_v31 = vsel %vm4081_vm11, %v4074_v47, %v3781_v26  ;;  %v3863_v19 = vpop.permute.xlu0 %3862  ;;  %v6174_v26 = vpop.f32.mrf.mxu1 }
 0x2c1   : > { %v4140_v59 = vsel %vm4114_vm12, %v4107_v31, %v8755_v57  ;;  %v4969_v31 = vadd.f32 %v8841_v49, %v4968_v0 }
 0x2c2   : > { %v4161_v9 = vsel %vm4147_vm14, %v4140_v59, 0  ;;  %v4545_v10 = vpop.f32.mrf.mxu1 }
 0x2c3   : > { %v5912_v30 = vcombine.low %v4161_v9, %v4161_v9  ;;  %v5913_v33 = vcombine.high %v4161_v9, %v4161_v9 }
 0x2c5   : > { %4301 = vst [vmem:[#allocation3 + $0x60] sm:$0xf] %v5912_v30  ;;  %4302 = vst [vmem:[#allocation3 + $0x64] sm:$0xf] %v5913_v33  ;;  %v3609_v6 = vpop.permute.xlu0 %3608  ;;  %v5127_v30 = vmax.f32 %v4969_v31, 0.0 }
 0x2c7   : > { %v3783_v14 = vpop.permute.xlu1 %3782 }
 0x2c8   : > { %v4109_v2 = vsel %vm4081_vm11, %v4076_v5, %v3783_v14  ;;  %v4980_v5 = vadd.f32 %v6222_v62, %v8841_v49 }
 0x2c9   : > { %v4142_v43 = vsel %vm4114_vm12, %v4109_v2, %v3863_v19 }
 0x2ca   : > { %v4162_v56 = vsel %vm4147_vm14, %v4142_v43, 0 }
 0x2cb   : > { %v5914_v57 = vcombine.low %v4162_v56, %v4162_v56  ;;  %v5915_v40 = vcombine.high %v4162_v56, %v4162_v56  ;;  %v4977_v56 = vadd.f32 %v8808_v8, %v8841_v49 }
 0x2cc   : > { %v6426_v16 = vld [vmem:[#allocation3 + $0x60] sm:$0xff]  }
 0x2cd   : > { %4303 = vst [vmem:[#allocation3 + $0x68] sm:$0xf] %v5914_v57  ;;  %4304 = vst [vmem:[#allocation3 + $0x6c] sm:$0xf] %v5915_v40  ;;  %v3275_v21 = vpop.permute.xlu1 %3274  ;;  %v6427_v52 = vld [vmem:[#allocation3 + $0x60] sm:$0xff]   ;;  %6195 = vmatprep.mubr.bf16.mxu1 %v6426_v16  ;;  %v5129_v53 = vmax.f32 %v4977_v56, 0.0 }
 0x2ce   : > { %v3915_v61 = vsel %vm400_vm1, %v5759_v1, %v3275_v21  ;;  %6243 = vmatprep.mubr.bf16.mxu0 %v6427_v52  ;;  %v5130_v52 = vmax.f32 %v4980_v5, 0.0 }
 0x2cf   : > { %v3948_v7 = vsel %vm3916_vm3, %v3915_v61, %v3355_v44  ;;  %v8836_v44 = vld [vmem:[%s9026_s4] ss:$0 sm:$0xff] }
 0x2d0   : > { %v3785_v36 = vpop.permute.xlu0 %3784  ;;  %v3981_v11 = vsel %vm3949_vm4, %v3948_v7, %v8750_v27  ;;  %v4546_v34 = vadd.f32 %v8836_v44, %v4545_v10  ;;  %v4543_v50 = vadd.f32 %v8836_v44, %v4542_v17  ;;  %v4554_v33 = vadd.f32 %v6174_v26, %v8836_v44 }
 0x2d1   : > { %v4014_v60 = vsel %vm3982_vm6, %v3981_v11, %v3531_v58  ;;  %v4551_v43 = vadd.f32 %v8806_v54, %v8836_v44 }
 0x2d2   : > { %v4047_v39 = vsel %vm4015_vm8, %v4014_v60, %v3611_v3  ;;  %v4971_v3 = vpop.f32.mrf.mxu0  ;;  %v4670_v59 = vmax.f32 %v4546_v34, 0.0  ;;  %v4669_v23 = vmax.f32 %v4543_v50, 0.0 }
 0x2d3   : > { %v4080_v63 = vsel %vm4048_vm9, %v4047_v39, %v9147_v18  ;;  %v4972_v15 = vadd.f32 %v8841_v49, %v4971_v3  ;;  %v4671_v13 = vmax.f32 %v4551_v43, 0.0 }
 0x2d4   : > { %v6428_v4 = vld [vmem:[#allocation3 + $0x68] sm:$0xff]   ;;  %v5159_v2 = vadd.f32 %v5127_v30, %v4669_v23 }
 0x2d5   : > { %v6429_v1 = vld [vmem:[#allocation3 + $0x68] sm:$0xff]   ;;  %v3529_v28 = vpop.permute.xlu0 %3528  ;;  %6196 = vmatmul.mubr.bf16.gmra.mxu1 %v6428_v4  ;;  %v5128_v9 = vmax.f32 %v4972_v15, 0.0  ;;  %v5161_v61 = vadd.f32 %v5129_v53, %v4671_v13 }
 0x2d6   : > { %v3787_v32 = vpop.permute.xlu1 %3786  ;;  %v4012_v27 = vsel %vm3982_vm6, %v3979_v41, %v3529_v28  ;;  %6244 = vmatmul.mubr.bf16.gmra.mxu0 %v6429_v1 }
 0x2d7   : > { %v4045_v46 = vsel %vm4015_vm8, %v4012_v27, %v3609_v6  ;;  %v4113_v42 = vsel %vm4081_vm11, %v4080_v63, %v3787_v32  ;;  %v5160_v19 = vadd.f32 %v5128_v9, %v4670_v59  ;;  %v4672_v6 = vmax.f32 %v4554_v33, 0.0 }
 0x2d8   : > { %v4078_v12 = vsel %vm4048_vm9, %v4045_v46, %v8773_v29 }
 0x2d9   : > { %v4111_v51 = vsel %vm4081_vm11, %v4078_v12, %v3785_v36  ;;  %v3865_v37 = vpop.permute.xlu0 %3864  ;;  %v5255_v16 = vpack.c.bf16 %v5160_v19, %v5159_v2  ;;  %v5162_v35 = vadd.f32 %v5130_v52, %v4672_v6 }
 0x2da   : > { %v3867_v55 = vpop.permute.xlu1 %3866  ;;  %v4144_v45 = vsel %vm4114_vm12, %v4111_v51, %v3865_v37 }
 0x2db   : > { %v4146_v29 = vsel %vm4114_vm12, %v4113_v42, %v3867_v55  ;;  %v4163_v24 = vsel %vm4147_vm14, %v4144_v45, 0  ;;  %v5256_v54 = vpack.c.bf16 %v5162_v35, %v5161_v61 }
 0x2dc   : > { %v4164_v22 = vsel %vm4147_vm14, %v4146_v29, 0  ;;  %v5916_v48 = vcombine.low %v4163_v24, %v4163_v24  ;;  %v5917_v38 = vcombine.high %v4163_v24, %v4163_v24 }
 0x2dd   : > { %v5918_v47 = vcombine.low %v4164_v22, %v4164_v22  ;;  %v5919_v58 = vcombine.high %v4164_v22, %v4164_v22 }
 0x2de   : > { %4305 = vst [vmem:[#allocation3 + $0x70] sm:$0xf] %v5916_v48  ;;  %4306 = vst [vmem:[#allocation3 + $0x74] sm:$0xf] %v5917_v38 }
 0x2df   : > { %4307 = vst [vmem:[#allocation3 + $0x78] sm:$0xf] %v5918_v47  ;;  %4308 = vst [vmem:[#allocation3 + $0x7c] sm:$0xf] %v5919_v58 }
 0x2e5   : > { %v6434_v14 = vld [vmem:[#allocation3 + $0x70] sm:$0xff]  }
 0x2e6   : > { %v6435_v57 = vld [vmem:[#allocation3 + $0x70] sm:$0xff]   ;;  %6199 = vmatprep.mubr.bf16.mxu1 %v6434_v14  ;;  %v6436_v40 = vld [vmem:[#allocation3 + $0x78] sm:$0xff]  }
 0x2e7   : > { %6247 = vmatprep.mubr.bf16.mxu0 %v6435_v57  ;;  %v6437_v21 = vld [vmem:[#allocation3 + $0x78] sm:$0xff]   ;;  %6200 = vmatmul.mubr.bf16.gmra.mxu1 %v6436_v40 }
 0x2e8   : > { %6248 = vmatmul.mubr.bf16.gmra.mxu0 %v6437_v21 }
 0x2e9   : > { %6267 = vmatprep.mubr.bf16.mxu0 %v5255_v16 }
 0x2ea   : > { %v6177_v17 = vpop.f32.mrf.mxu1 }
 0x2eb   : > { %v4567_v39 = vadd.f32 %v6177_v17, %v8836_v44 }
 0x2ec   : > { %v6225_v7 = vpop.f32.mrf.mxu0  ;;  %v4558_v36 = vpop.f32.mrf.mxu1 }
 0x2ed   : > { %v4559_v25 = vadd.f32 %v8836_v44, %v4558_v36  ;;  %v4993_v4 = vadd.f32 %v6225_v7, %v8841_v49  ;;  %v4675_v46 = vmax.f32 %v4567_v39, 0.0 }
 0x2ee   : > { %v4984_v8 = vpop.f32.mrf.mxu0  ;;  %v6178_v0 = vpop.f32.mrf.mxu1 }
 0x2ef   : > { %v4985_v11 = vadd.f32 %v8841_v49, %v4984_v8  ;;  %v4570_v60 = vadd.f32 %v6178_v0, %v8836_v44  ;;  %v4673_v63 = vmax.f32 %v4559_v25, 0.0  ;;  %v5133_v42 = vmax.f32 %v4993_v4, 0.0 }
 0x2f0   : > { %6268 = vmatmul.mubr.bf16.vlgmr.msra.gmra.mxu0 %v5256_v54  ;;  %v6226_v20 = vpop.f32.mrf.mxu0  ;;  %v4561_v1 = vpop.f32.mrf.mxu1 }
 0x2f1   : > { %v4996_v26 = vadd.f32 %v6226_v20, %v8841_v49  ;;  %v4676_v62 = vmax.f32 %v4570_v60, 0.0  ;;  %v4562_v41 = vadd.f32 %v8836_v44, %v4561_v1  ;;  %v5131_v28 = vmax.f32 %v4985_v11, 0.0 }
 0x2f2   : > { %v4987_v18 = vpop.f32.mrf.mxu0  ;;  %v5165_v55 = vadd.f32 %v5133_v42, %v4675_v46 }
 0x2f3   : > { %v5134_v32 = vmax.f32 %v4996_v26, 0.0  ;;  %v4988_v27 = vadd.f32 %v8841_v49, %v4987_v18  ;;  %v4674_v12 = vmax.f32 %v4562_v41, 0.0  ;;  %v5163_v51 = vadd.f32 %v5131_v28, %v4673_v63 }
 0x2f5   : > { %v5132_v10 = vmax.f32 %v4988_v27, 0.0  ;;  %v5166_v3 = vadd.f32 %v5134_v32, %v4676_v62 }
 0x2f7   : > { %v5164_v37 = vadd.f32 %v5132_v10, %v4674_v12  ;;  %v5258_v29 = vpack.c.bf16 %v5166_v3, %v5165_v55 }
 0x2f9   : > { %v5257_v45 = vpack.c.bf16 %v5164_v37, %v5163_v51 }
 0x2fb   : > { %6271 = vmatprep.mubr.bf16.mxu1 %v5257_v45 }
 0x2fc   : > { %6272 = vmatmul.mubr.bf16.vlgmr.msra.gmra.mxu1 %v5258_v29 }
 0x313   : > { %v6181_v24 = vpop.f32.mrf.mxu1 }
 0x314   : > { %v4583_v50 = vadd.f32 %v6181_v24, %v8836_v44 }
 0x315   : > { %v6229_v34 = vpop.f32.mrf.mxu0  ;;  %v4574_v15 = vpop.f32.mrf.mxu1 }
 0x316   : > { %v4575_v38 = vadd.f32 %v8836_v44, %v4574_v15  ;;  %v5009_v31 = vadd.f32 %v6229_v34, %v8841_v49  ;;  %v4679_v56 = vmax.f32 %v4583_v50, 0.0 }
 0x317   : > { %v5000_v22 = vpop.f32.mrf.mxu0  ;;  %v6182_v48 = vpop.f32.mrf.mxu1 }
 0x318   : > { %v5001_v47 = vadd.f32 %v8841_v49, %v5000_v22  ;;  %v4586_v58 = vadd.f32 %v6182_v48, %v8836_v44  ;;  %v4677_v5 = vmax.f32 %v4575_v38, 0.0  ;;  %v5137_v57 = vmax.f32 %v5009_v31, 0.0 }
 0x319   : > { %v6230_v59 = vpop.f32.mrf.mxu0  ;;  %v4577_v9 = vpop.f32.mrf.mxu1 }
 0x31a   : > { %v5012_v23 = vadd.f32 %v6230_v59, %v8841_v49  ;;  %v4680_v30 = vmax.f32 %v4586_v58, 0.0  ;;  %v4578_v33 = vadd.f32 %v8836_v44, %v4577_v9  ;;  %v5135_v14 = vmax.f32 %v5001_v47, 0.0 }
 0x31b   : > { %v5003_v19 = vpop.f32.mrf.mxu0  ;;  %v5169_v13 = vadd.f32 %v5137_v57, %v4679_v56 }
 0x31c   : > { %v5138_v2 = vmax.f32 %v5012_v23, 0.0  ;;  %v5004_v43 = vadd.f32 %v8841_v49, %v5003_v19  ;;  %v4678_v40 = vmax.f32 %v4578_v33, 0.0  ;;  %v5167_v21 = vadd.f32 %v5135_v14, %v4677_v5 }
 0x31e   : > { %v5136_v6 = vmax.f32 %v5004_v43, 0.0  ;;  %v5170_v16 = vadd.f32 %v5138_v2, %v4680_v30 }
 0x320   : > { %v5168_v52 = vadd.f32 %v5136_v6, %v4678_v40  ;;  %v5260_v35 = vpack.c.bf16 %v5170_v16, %v5169_v13 }
 0x322   : > { %v5259_v53 = vpack.c.bf16 %v5168_v52, %v5167_v21 }
 0x324   : > { %6275 = vmatprep.mubr.bf16.mxu1 %v5259_v53 }
 0x325   : > { %6276 = vmatmul.mubr.bf16.gmra.mxu1 %v5260_v35 }
 0x333   : > { %v6185_v61 = vpop.f32.mrf.mxu1 }
 0x334   : > { %v6233_v17 = vpop.f32.mrf.mxu0  ;;  %v4599_v25 = vadd.f32 %v6185_v61, %v8836_v44 }
 0x335   : > { %v4590_v54 = vpop.f32.mrf.mxu1  ;;  %v5025_v11 = vadd.f32 %v6233_v17, %v8841_v49 }
 0x336   : > { %v5016_v7 = vpop.f32.mrf.mxu0  ;;  %v4591_v36 = vadd.f32 %v8836_v44, %v4590_v54  ;;  %v4683_v32 = vmax.f32 %v4599_v25, 0.0 }
 0x337   : > { %v5017_v8 = vadd.f32 %v8841_v49, %v5016_v7  ;;  %v6186_v0 = vpop.f32.mrf.mxu1  ;;  %v5141_v27 = vmax.f32 %v5025_v11, 0.0 }
 0x338   : > { %v4602_v60 = vadd.f32 %v6186_v0, %v8836_v44  ;;  %v6234_v39 = vpop.f32.mrf.mxu0  ;;  %v4681_v41 = vmax.f32 %v4591_v36, 0.0 }
 0x339   : > { %v5028_v4 = vadd.f32 %v6234_v39, %v8841_v49  ;;  %v4593_v20 = vpop.f32.mrf.mxu1  ;;  %v5139_v18 = vmax.f32 %v5017_v8, 0.0  ;;  %v5173_v51 = vadd.f32 %v5141_v27, %v4683_v32 }
 0x33a   : > { %v4684_v1 = vmax.f32 %v4602_v60, 0.0  ;;  %v4594_v26 = vadd.f32 %v8836_v44, %v4593_v20  ;;  %v5019_v62 = vpop.f32.mrf.mxu0 }
 0x33b   : > { %v5142_v63 = vmax.f32 %v5028_v4, 0.0  ;;  %v5020_v28 = vadd.f32 %v8841_v49, %v5019_v62  ;;  %v5171_v10 = vadd.f32 %v5139_v18, %v4681_v41 }
 0x33c   : > { %v4682_v46 = vmax.f32 %v4594_v26, 0.0 }
 0x33d   : > { %v5140_v42 = vmax.f32 %v5020_v28, 0.0  ;;  %v5174_v12 = vadd.f32 %v5142_v63, %v4684_v1 }
 0x33f   : > { %v5172_v3 = vadd.f32 %v5140_v42, %v4682_v46  ;;  %v5262_v55 = vpack.c.bf16 %v5174_v12, %v5173_v51 }
 0x341   : > { %v5261_v37 = vpack.c.bf16 %v5172_v3, %v5171_v10 }
 0x343   : > { %6279 = vmatprep.mubr.bf16.mxu1 %v5261_v37 }
 0x344   : > { %6280 = vmatmul.mubr.bf16.gmra.mxu1 %v5262_v55 }
 0x34e   : > { %v6189_v45 = vpop.f32.mrf.mxu1 }
 0x34f   : > { %v6237_v29 = vpop.f32.mrf.mxu0  ;;  %v4615_v38 = vadd.f32 %v6189_v45, %v8836_v44 }
 0x350   : > { %v4606_v24 = vpop.f32.mrf.mxu1  ;;  %v5041_v47 = vadd.f32 %v6237_v29, %v8841_v49 }
 0x351   : > { %v5032_v34 = vpop.f32.mrf.mxu0  ;;  %v4607_v15 = vadd.f32 %v8836_v44, %v4606_v24  ;;  %v4687_v2 = vmax.f32 %v4615_v38, 0.0 }
 0x352   : > { %v5033_v22 = vadd.f32 %v8841_v49, %v5032_v34  ;;  %v6190_v48 = vpop.f32.mrf.mxu1  ;;  %v5145_v43 = vmax.f32 %v5041_v47, 0.0 }
 0x353   : > { %v4618_v58 = vadd.f32 %v6190_v48, %v8836_v44  ;;  %v6238_v50 = vpop.f32.mrf.mxu0  ;;  %v4685_v33 = vmax.f32 %v4607_v15, 0.0 }
 0x354   : > { %v5044_v31 = vadd.f32 %v6238_v50, %v8841_v49  ;;  %v4609_v59 = vpop.f32.mrf.mxu1  ;;  %v5143_v19 = vmax.f32 %v5033_v22, 0.0  ;;  %v5177_v21 = vadd.f32 %v5145_v43, %v4687_v2 }
 0x355   : > { %v4688_v9 = vmax.f32 %v4618_v58, 0.0  ;;  %v4610_v23 = vadd.f32 %v8836_v44, %v4609_v59  ;;  %v5035_v30 = vpop.f32.mrf.mxu0 }
 0x356   : > { %v5146_v5 = vmax.f32 %v5044_v31, 0.0  ;;  %v5036_v14 = vadd.f32 %v8841_v49, %v5035_v30  ;;  %v5175_v6 = vadd.f32 %v5143_v19, %v4685_v33 }
 0x357   : > { %v4686_v56 = vmax.f32 %v4610_v23, 0.0 }
 0x358   : > { %v5144_v57 = vmax.f32 %v5036_v14, 0.0  ;;  %v5178_v40 = vadd.f32 %v5146_v5, %v4688_v9 }
 0x35a   : > { %v5176_v16 = vadd.f32 %v5144_v57, %v4686_v56  ;;  %v5264_v13 = vpack.c.bf16 %v5178_v40, %v5177_v21 }
 0x35c   : > { %v5263_v52 = vpack.c.bf16 %v5176_v16, %v5175_v6 }
 0x35e   : > { %6283 = vmatprep.mubr.bf16.mxu1 %v5263_v52 }
 0x35f   : > { %6284 = vmatmul.mubr.bf16.gmra.mxu1 %v5264_v13 }
 0x379   : > { %v6193_v53 = vpop.f32.mrf.mxu1 }
 0x37a   : > { %v6241_v35 = vpop.f32.mrf.mxu0  ;;  %v4631_v8 = vadd.f32 %v6193_v53, %v8836_v44 }
 0x37b   : > { %v4622_v61 = vpop.f32.mrf.mxu1  ;;  %v5057_v0 = vadd.f32 %v6241_v35, %v8841_v49 }
 0x37c   : > { %v5048_v17 = vpop.f32.mrf.mxu0  ;;  %v4623_v54 = vadd.f32 %v8836_v44, %v4622_v61  ;;  %v4691_v63 = vmax.f32 %v4631_v8, 0.0 }
 0x37d   : > { %v5049_v7 = vadd.f32 %v8841_v49, %v5048_v17  ;;  %v6194_v36 = vpop.f32.mrf.mxu1  ;;  %v5149_v28 = vmax.f32 %v5057_v0, 0.0 }
 0x37e   : > { %v4634_v25 = vadd.f32 %v6194_v36, %v8836_v44  ;;  %v6242_v11 = vpop.f32.mrf.mxu0  ;;  %v4689_v26 = vmax.f32 %v4623_v54, 0.0 }
 0x37f   : > { %v5060_v60 = vadd.f32 %v6242_v11, %v8841_v49  ;;  %v4625_v39 = vpop.f32.mrf.mxu1  ;;  %v5147_v62 = vmax.f32 %v5049_v7, 0.0  ;;  %v5181_v10 = vadd.f32 %v5149_v28, %v4691_v63 }
 0x380   : > { %v4692_v4 = vmax.f32 %v4634_v25, 0.0  ;;  %v4626_v20 = vadd.f32 %v8836_v44, %v4625_v39  ;;  %v5051_v1 = vpop.f32.mrf.mxu0 }
 0x381   : > { %v5150_v41 = vmax.f32 %v5060_v60, 0.0  ;;  %v5052_v18 = vadd.f32 %v8841_v49, %v5051_v1  ;;  %v5179_v42 = vadd.f32 %v5147_v62, %v4689_v26 }
 0x382   : > { %v4690_v32 = vmax.f32 %v4626_v20, 0.0  ;;  %v8914_v20 = vld [vmem:[%s9028_s6] ss:$0 sm:$0xff] }
 0x383   : > { %v5148_v27 = vmax.f32 %v5052_v18, 0.0  ;;  %v5182_v46 = vadd.f32 %v5150_v41, %v4692_v4 }
 0x385   : > { %v5180_v12 = vadd.f32 %v5148_v27, %v4690_v32  ;;  %v5266_v51 = vpack.c.bf16 %v5182_v46, %v5181_v10 }
 0x387   : > { %v5265_v3 = vpack.c.bf16 %v5180_v12, %v5179_v42 }
 0x389   : > { %6287 = vmatprep.mubr.bf16.mxu1 %v5265_v3 }
 0x38a   : > { %6288 = vmatmul.mubr.bf16.gmra.mxu1 %v5266_v51 }
 0x395   : > { %v6197_v37 = vpop.f32.mrf.mxu1 }
 0x396   : > { %v6245_v55 = vpop.f32.mrf.mxu0  ;;  %v4647_v22 = vadd.f32 %v6197_v37, %v8836_v44 }
 0x397   : > { %v4638_v45 = vpop.f32.mrf.mxu1  ;;  %v5073_v48 = vadd.f32 %v6245_v55, %v8841_v49 }
 0x398   : > { %v5064_v29 = vpop.f32.mrf.mxu0  ;;  %v4639_v24 = vadd.f32 %v8836_v44, %v4638_v45  ;;  %v4695_v5 = vmax.f32 %v4647_v22, 0.0 }
 0x399   : > { %v5065_v34 = vadd.f32 %v8841_v49, %v5064_v29  ;;  %v6198_v15 = vpop.f32.mrf.mxu1  ;;  %v5153_v14 = vmax.f32 %v5073_v48, 0.0 }
 0x39a   : > { %v4650_v38 = vadd.f32 %v6198_v15, %v8836_v44  ;;  %v6246_v47 = vpop.f32.mrf.mxu0  ;;  %v4693_v23 = vmax.f32 %v4639_v24, 0.0 }
 0x39b   : > { %v5076_v58 = vadd.f32 %v6246_v47, %v8841_v49  ;;  %v4641_v50 = vpop.f32.mrf.mxu1  ;;  %v5151_v30 = vmax.f32 %v5065_v34, 0.0  ;;  %v5185_v6 = vadd.f32 %v5153_v14, %v4695_v5 }
 0x39c   : > { %v4696_v31 = vmax.f32 %v4650_v38, 0.0  ;;  %v4642_v59 = vadd.f32 %v8836_v44, %v4641_v50  ;;  %v5067_v9 = vpop.f32.mrf.mxu0 }
 0x39d   : > { %v5154_v33 = vmax.f32 %v5076_v58, 0.0  ;;  %v5068_v19 = vadd.f32 %v8841_v49, %v5067_v9  ;;  %v5183_v57 = vadd.f32 %v5151_v30, %v4693_v23 }
 0x39e   : > { %v4694_v2 = vmax.f32 %v4642_v59, 0.0 }
 0x39f   : > { %v5152_v43 = vmax.f32 %v5068_v19, 0.0  ;;  %v5186_v56 = vadd.f32 %v5154_v33, %v4696_v31 }
 0x3a1   : > { %v5184_v40 = vadd.f32 %v5152_v43, %v4694_v2  ;;  %v5268_v21 = vpack.c.bf16 %v5186_v56, %v5185_v6 }
 0x3a3   : > { %v5267_v16 = vpack.c.bf16 %v5184_v40, %v5183_v57 }
 0x3a5   : > { %6291 = vmatprep.mubr.bf16.mxu1 %v5267_v16 }
 0x3a6   : > { %6292 = vmatmul.mubr.bf16.gmra.mxu1 %v5268_v21 }
 0x3a7   : > { %v6201_v52 = vpop.f32.mrf.mxu1 }
 0x3a8   : > { %v6249_v13 = vpop.f32.mrf.mxu0  ;;  %v4663_v7 = vadd.f32 %v6201_v52, %v8836_v44 }
 0x3a9   : > { %v4654_v53 = vpop.f32.mrf.mxu1  ;;  %v5089_v36 = vadd.f32 %v6249_v13, %v8841_v49 }
 0x3aa   : > { %v5080_v35 = vpop.f32.mrf.mxu0  ;;  %v4655_v61 = vadd.f32 %v8836_v44, %v4654_v53  ;;  %v4699_v18 = vmax.f32 %v4663_v7, 0.0 }
 0x3ab   : > { %v5081_v17 = vadd.f32 %v8841_v49, %v5080_v35  ;;  %v6202_v54 = vpop.f32.mrf.mxu1  ;;  %v5157_v63 = vmax.f32 %v5089_v36, 0.0 }
 0x3ac   : > { %v4666_v8 = vadd.f32 %v6202_v54, %v8836_v44  ;;  %v6250_v0 = vpop.f32.mrf.mxu0  ;;  %v4697_v1 = vmax.f32 %v4655_v61, 0.0 }
 0x3ad   : > { %v5092_v25 = vadd.f32 %v6250_v0, %v8841_v49  ;;  %v4657_v11 = vpop.f32.mrf.mxu1  ;;  %v5155_v26 = vmax.f32 %v5081_v17, 0.0  ;;  %v5189_v51 = vadd.f32 %v5157_v63, %v4699_v18 }
 0x3ae   : > { %v4700_v60 = vmax.f32 %v4666_v8, 0.0  ;;  %v4658_v39 = vadd.f32 %v8836_v44, %v4657_v11  ;;  %v5083_v4 = vpop.f32.mrf.mxu0 }
 0x3af   : > { %v5158_v62 = vmax.f32 %v5092_v25, 0.0  ;;  %v5084_v41 = vadd.f32 %v8841_v49, %v5083_v4  ;;  %v5187_v12 = vadd.f32 %v5155_v26, %v4697_v1 }
 0x3b0   : > { %v4698_v28 = vmax.f32 %v4658_v39, 0.0  ;;  %v6269_v32 = vpop.f32.mrf.mxu0 }
 0x3b1   : > { %v5156_v27 = vmax.f32 %v5084_v41, 0.0  ;;  %v5385_v46 = vadd.f32 %v6269_v32, %v8914_v20  ;;  %v5190_v44 = vadd.f32 %v5158_v62, %v4700_v60 }
 0x3b2   : > { %v5376_v42 = vpop.f32.mrf.mxu0 }
 0x3b3   : > { %v5188_v10 = vadd.f32 %v5156_v27, %v4698_v28  ;;  %v5505_v49 = vmax.f32 %v5385_v46, 0.0  ;;  %v5377_v3 = vadd.f32 %v8914_v20, %v5376_v42  ;;  %v5270_v24 = vpack.c.bf16 %v5190_v44, %v5189_v51 }
 0x3b4   : > { %v6270_v37 = vpop.f32.mrf.mxu0 }
 0x3b5   : > { %5537 = vst.msk [vmem:[%s8922_s15 + $0x10] sm:$0xff] %vm400_vm1, %v5505_v49  ;;  %v5503_v55 = vmax.f32 %v5377_v3, 0.0  ;;  %v5269_v45 = vpack.c.bf16 %v5188_v10, %v5187_v12  ;;  %v5388_v29 = vadd.f32 %v6270_v37, %v8914_v20 }
 0x3b6   : > { %v5379_v34 = vpop.f32.mrf.mxu0 }
 0x3b7   : > { %5535 = vst.msk [vmem:[%s8922_s15] sm:$0xff] %vm400_vm1, %v5503_v55  ;;  %6295 = vmatprep.mubr.bf16.mxu1 %v5269_v45  ;;  %v5506_v15 = vmax.f32 %v5388_v29, 0.0  ;;  %v5380_v22 = vadd.f32 %v8914_v20, %v5379_v34 }
 0x3b8   : > { %6296 = vmatmul.mubr.bf16.gmra.mxu1 %v5270_v24 }
 0x3b9   : > { %5538 = vst.msk [vmem:[%s8922_s15 + $0x18] sm:$0xff] %vm400_vm1, %v5506_v15  ;;  %v5504_v48 = vmax.f32 %v5380_v22, 0.0 }
 0x3bb   : > { %5536 = vst.msk [vmem:[%s8922_s15 + $0x8] sm:$0xff] %vm400_vm1, %v5504_v48 }
 0x3bc   : > { %v6273_v38 = vpop.f32.mrf.mxu1 }
 0x3bd   : > { %v5401_v47 = vadd.f32 %v6273_v38, %v8914_v20 }
 0x3be   : > { %v5392_v58 = vpop.f32.mrf.mxu1 }
 0x3bf   : > { %v5509_v50 = vmax.f32 %v5401_v47, 0.0  ;;  %v5393_v31 = vadd.f32 %v8914_v20, %v5392_v58 }
 0x3c0   : > { %v6274_v59 = vpop.f32.mrf.mxu1 }
 0x3c1   : > { %5541 = vst.msk [vmem:[%s8922_s15 + $0x30] sm:$0xff] %vm400_vm1, %v5509_v50  ;;  %v5507_v9 = vmax.f32 %v5393_v31, 0.0  ;;  %v5404_v23 = vadd.f32 %v6274_v59, %v8914_v20 }
 0x3c2   : > { %v5395_v30 = vpop.f32.mrf.mxu1 }
 0x3c3   : > { %5539 = vst.msk [vmem:[%s8922_s15 + $0x20] sm:$0xff] %vm400_vm1, %v5507_v9  ;;  %v5510_v33 = vmax.f32 %v5404_v23, 0.0  ;;  %v5396_v19 = vadd.f32 %v8914_v20, %v5395_v30 }
 0x3c5   : > { %5542 = vst.msk [vmem:[%s8922_s15 + $0x38] sm:$0xff] %vm400_vm1, %v5510_v33  ;;  %v5508_v5 = vmax.f32 %v5396_v19, 0.0 }
 0x3c7   : > { %5540 = vst.msk [vmem:[%s8922_s15 + $0x28] sm:$0xff] %vm400_vm1, %v5508_v5 }
 0x3e5   : > { %v6277_v14 = vpop.f32.mrf.mxu1 }
 0x3e6   : > { %v5417_v2 = vadd.f32 %v6277_v14, %v8914_v20 }
 0x3e7   : > { %v5408_v43 = vpop.f32.mrf.mxu1 }
 0x3e8   : > { %v5513_v56 = vmax.f32 %v5417_v2, 0.0  ;;  %v5409_v57 = vadd.f32 %v8914_v20, %v5408_v43 }
 0x3e9   : > { %v6278_v40 = vpop.f32.mrf.mxu1 }
 0x3ea   : > { %5545 = vst.msk [vmem:[%s8922_s15 + $0x50] sm:$0xff] %vm400_vm1, %v5513_v56  ;;  %v5511_v6 = vmax.f32 %v5409_v57, 0.0  ;;  %v5420_v16 = vadd.f32 %v6278_v40, %v8914_v20 }
 0x3eb   : > { %v5411_v21 = vpop.f32.mrf.mxu1 }
 0x3ec   : > { %5543 = vst.msk [vmem:[%s8922_s15 + $0x40] sm:$0xff] %vm400_vm1, %v5511_v6  ;;  %v5514_v52 = vmax.f32 %v5420_v16, 0.0  ;;  %v5412_v13 = vadd.f32 %v8914_v20, %v5411_v21 }
 0x3ee   : > { %5546 = vst.msk [vmem:[%s8922_s15 + $0x58] sm:$0xff] %vm400_vm1, %v5514_v52  ;;  %v5512_v53 = vmax.f32 %v5412_v13, 0.0 }
 0x3f0   : > { %5544 = vst.msk [vmem:[%s8922_s15 + $0x48] sm:$0xff] %vm400_vm1, %v5512_v53 }
 0x404   : > { %v6281_v35 = vpop.f32.mrf.mxu1 }
 0x405   : > { %v5433_v61 = vadd.f32 %v6281_v35, %v8914_v20 }
 0x406   : > { %v5424_v17 = vpop.f32.mrf.mxu1 }
 0x407   : > { %v5517_v54 = vmax.f32 %v5433_v61, 0.0  ;;  %v5425_v7 = vadd.f32 %v8914_v20, %v5424_v17 }
 0x408   : > { %v6282_v36 = vpop.f32.mrf.mxu1 }
 0x409   : > { %5549 = vst.msk [vmem:[%s8922_s15 + $0x70] sm:$0xff] %vm400_vm1, %v5517_v54  ;;  %v5515_v8 = vmax.f32 %v5425_v7, 0.0  ;;  %v5436_v0 = vadd.f32 %v6282_v36, %v8914_v20 }
 0x40a   : > { %v5427_v25 = vpop.f32.mrf.mxu1 }
 0x40b   : > { %5547 = vst.msk [vmem:[%s8922_s15 + $0x60] sm:$0xff] %vm400_vm1, %v5515_v8  ;;  %v5518_v11 = vmax.f32 %v5436_v0, 0.0  ;;  %v5428_v60 = vadd.f32 %v8914_v20, %v5427_v25 }
 0x40d   : > { %5550 = vst.msk [vmem:[%s8922_s15 + $0x78] sm:$0xff] %vm400_vm1, %v5518_v11  ;;  %v5516_v39 = vmax.f32 %v5428_v60, 0.0 }
 0x40f   : > { %5548 = vst.msk [vmem:[%s8922_s15 + $0x68] sm:$0xff] %vm400_vm1, %v5516_v39 }
 0x41f   : > { %v6285_v4 = vpop.f32.mrf.mxu1 }
 0x420   : > { %v5449_v1 = vadd.f32 %v6285_v4, %v8914_v20 }
 0x421   : > { %v5440_v26 = vpop.f32.mrf.mxu1 }
 0x422   : > { %v5521_v62 = vmax.f32 %v5449_v1, 0.0  ;;  %v5441_v41 = vadd.f32 %v8914_v20, %v5440_v26 }
 0x423   : > { %v6286_v18 = vpop.f32.mrf.mxu1 }
 0x424   : > { %5553 = vst.msk [vmem:[%s8922_s15 + $0x90] sm:$0xff] %vm400_vm1, %v5521_v62  ;;  %v5519_v63 = vmax.f32 %v5441_v41, 0.0  ;;  %v5452_v28 = vadd.f32 %v6286_v18, %v8914_v20 }
 0x425   : > { %v5443_v32 = vpop.f32.mrf.mxu1 }
 0x426   : > { %5551 = vst.msk [vmem:[%s8922_s15 + $0x80] sm:$0xff] %vm400_vm1, %v5519_v63  ;;  %v5522_v27 = vmax.f32 %v5452_v28, 0.0  ;;  %v5444_v46 = vadd.f32 %v8914_v20, %v5443_v32 }
 0x428   : > { %5554 = vst.msk [vmem:[%s8922_s15 + $0x98] sm:$0xff] %vm400_vm1, %v5522_v27  ;;  %v5520_v44 = vmax.f32 %v5444_v46, 0.0 }
 0x42a   : > { %5552 = vst.msk [vmem:[%s8922_s15 + $0x88] sm:$0xff] %vm400_vm1, %v5520_v44 }
 0x44a   : > { %v6289_v42 = vpop.f32.mrf.mxu1 }
 0x44b   : > { %v5465_v12 = vadd.f32 %v6289_v42, %v8914_v20 }
 0x44c   : > { %v5456_v10 = vpop.f32.mrf.mxu1 }
 0x44d   : > { %v5525_v49 = vmax.f32 %v5465_v12, 0.0  ;;  %v5457_v3 = vadd.f32 %v8914_v20, %v5456_v10 }
 0x44e   : > { %v6290_v51 = vpop.f32.mrf.mxu1 }
 0x44f   : > { %5557 = vst.msk [vmem:[%s8922_s15 + $0xb0] sm:$0xff] %vm400_vm1, %v5525_v49  ;;  %v5523_v37 = vmax.f32 %v5457_v3, 0.0  ;;  %v5468_v55 = vadd.f32 %v6290_v51, %v8914_v20 }
 0x450   : > { %v5459_v45 = vpop.f32.mrf.mxu1 }
 0x451   : > { %5555 = vst.msk [vmem:[%s8922_s15 + $0xa0] sm:$0xff] %vm400_vm1, %v5523_v37  ;;  %v5526_v29 = vmax.f32 %v5468_v55, 0.0  ;;  %v5460_v24 = vadd.f32 %v8914_v20, %v5459_v45 }
 0x453   : > { %5558 = vst.msk [vmem:[%s8922_s15 + $0xb8] sm:$0xff] %vm400_vm1, %v5526_v29  ;;  %v5524_v34 = vmax.f32 %v5460_v24, 0.0 }
 0x455   : > { %5556 = vst.msk [vmem:[%s8922_s15 + $0xa8] sm:$0xff] %vm400_vm1, %v5524_v34 }
 0x466   : > { %v6293_v15 = vpop.f32.mrf.mxu1 }
 0x467   : > { %v5481_v22 = vadd.f32 %v6293_v15, %v8914_v20 }
 0x468   : > { %v5472_v48 = vpop.f32.mrf.mxu1 }
 0x469   : > { %v5529_v38 = vmax.f32 %v5481_v22, 0.0  ;;  %v5473_v47 = vadd.f32 %v8914_v20, %v5472_v48 }
 0x46a   : > { %v6294_v58 = vpop.f32.mrf.mxu1 }
 0x46b   : > { %5561 = vst.msk [vmem:[%s8922_s15 + $0xd0] sm:$0xff] %vm400_vm1, %v5529_v38  ;;  %v5527_v50 = vmax.f32 %v5473_v47, 0.0  ;;  %v5484_v31 = vadd.f32 %v6294_v58, %v8914_v20 }
 0x46c   : > { %v5475_v59 = vpop.f32.mrf.mxu1 }
 0x46d   : > { %5559 = vst.msk [vmem:[%s8922_s15 + $0xc0] sm:$0xff] %vm400_vm1, %v5527_v50  ;;  %v5530_v9 = vmax.f32 %v5484_v31, 0.0  ;;  %v5476_v23 = vadd.f32 %v8914_v20, %v5475_v59 }
 0x46f   : > { %5562 = vst.msk [vmem:[%s8922_s15 + $0xd8] sm:$0xff] %vm400_vm1, %v5530_v9  ;;  %v5528_v30 = vmax.f32 %v5476_v23, 0.0 }
 0x471   : > { %5560 = vst.msk [vmem:[%s8922_s15 + $0xc8] sm:$0xff] %vm400_vm1, %v5528_v30 }
 0x478   : > { %v6297_v33 = vpop.f32.mrf.mxu1 }
 0x479   : > { %v5497_v19 = vadd.f32 %v6297_v33, %v8914_v20 }
 0x47a   : > { %v5488_v5 = vpop.f32.mrf.mxu1 }
 0x47b   : > { %v5533_v14 = vmax.f32 %v5497_v19, 0.0  ;;  %v5489_v2 = vadd.f32 %v8914_v20, %v5488_v5 }
 0x47c   : > { %v6298_v43 = vpop.f32.mrf.mxu1 }
 0x47d   : > { %5565 = vst.msk [vmem:[%s8922_s15 + $0xf0] sm:$0xff] %vm400_vm1, %v5533_v14  ;;  %v5531_v56 = vmax.f32 %v5489_v2, 0.0  ;;  %v5500_v57 = vadd.f32 %v6298_v43, %v8914_v20 }
 0x47e   : > { %v5491_v40 = vpop.f32.mrf.mxu1 }
 0x47f   : > { %5563 = vst.msk [vmem:[%s8922_s15 + $0xe0] sm:$0xff] %vm400_vm1, %v5531_v56  ;;  %v5534_v6 = vmax.f32 %v5500_v57, 0.0  ;;  %v5492_v16 = vadd.f32 %v8914_v20, %v5491_v40 }
 0x481   : > { %5566 = vst.msk [vmem:[%s8922_s15 + $0xf8] sm:$0xff] %vm400_vm1, %v5534_v6  ;;  %v5532_v21 = vmax.f32 %v5492_v16, 0.0 }
 0x483   : > { %5564 = vst.msk [vmem:[%s8922_s15 + $0xe8] sm:$0xff] %vm400_vm1, %v5532_v21 }
 0x484 PF: > { %s17_s24 = sadd.s32 1, %s6478_s24  }
 0x485   : > { %p14_p4 = scmp.ge.s32.totalorder %s17_s24, 4  }
 0x487   :  { %16 = sbr.rel (!%p14_p4) target bundleno = 1 (0x1), region = 83 }

</bundles_post_ra>
